<compile_context>
chip_gen: v6e
topology: v6e:2x2x1
jax: 0.10.0
libtpu: 0.0.40
codegen_flags: <defaults>
</compile_context>

<pallas_src>
import jax
import jax.numpy as jnp
from jax.experimental import pallas as pl
from jax.experimental.pallas import tpu as pltpu

EPS = 1e-5


def _conv3x3_inorm(z, wrow_ref, zw_ref, *, relu):
    """3x3 'same' conv + InstanceNorm (+ optional ReLU) on one image.

    z:        (H, W, C) float32 activations (channels on the lane axis).
    wrow_ref: (3, 3C, C) bf16 ref; row kh is the fused [(kw, ci) -> co] matrix.
    zw_ref:   (H+2, W, 3C) bf16 VMEM scratch; rows 0 and H+1 are pre-zeroed halos.
    Returns (H, W, C) float32 (conv bias omitted: cancelled exactly by the IN).
    """
    H, W, C = z.shape

    # Width (+/-1) shifts on the XLU (roll) + zero boundary (VPU select):
    #   z_m1[h, w] = z[h, w-1],  z_p1[h, w] = z[h, w+1],  0 outside the image.
    col = jax.lax.broadcasted_iota(jnp.int32, (H, W, C), 1)
    z_m1 = jnp.where(col == 0, 0.0, pltpu.roll(z, shift=1, axis=1))
    z_p1 = jnp.where(col == W - 1, 0.0, pltpu.roll(z, shift=W - 1, axis=1))

    # Single store of the width-fused interior rows (bf16 MXU operand layout):
    #   zw[h+1, w, kw*C + ci] = z[h, w + kw - 1, ci].
    zw_ref[1:H + 1, :, :] = jnp.concatenate(
        [z_m1.astype(jnp.bfloat16), z.astype(jnp.bfloat16),
         z_p1.astype(jnp.bfloat16)], axis=-1)

    # Gather-form conv: y[h] = sum_kh zw[h + kh] @ Wrow[kh].
    # Static ref slices are free views; the three matmuls accumulate into one
    # value (in-place in the MXU result buffer on v7x).
    y = jnp.dot(zw_ref[0:H, :, :].reshape(H * W, 3 * C), wrow_ref[0, :, :],
                preferred_element_type=jnp.float32)
    y = y + jnp.dot(zw_ref[1:H + 1, :, :].reshape(H * W, 3 * C), wrow_ref[1, :, :],
                    preferred_element_type=jnp.float32)
    y = y + jnp.dot(zw_ref[2:H + 2, :, :].reshape(H * W, 3 * C), wrow_ref[2, :, :],
                    preferred_element_type=jnp.float32)

    # InstanceNorm2d(affine=False): one streaming stats pass (sum + sum of
    # squares), then one normalize pass.  All stats math in f32.
    inv_hw = 1.0 / float(H * W)
    mean = jnp.sum(y, axis=0, keepdims=True) * inv_hw
    ex2 = jnp.sum(y * y, axis=0, keepdims=True) * inv_hw
    var = jnp.maximum(ex2 - mean * mean, 0.0)
    yn = (y - mean) * jax.lax.rsqrt(var + EPS)
    if relu:
        yn = jnp.maximum(yn, 0.0)
    return yn.reshape(H, W, C)


def residual_kernel(x_ref, w1_ref, w2_ref, out_ref, zw_ref):
    H, W, C = x_ref.shape
    # Zero the two halo rows once; both convs' gather-form matmuls consume them.
    zw_ref[0, :, :] = jnp.zeros((W, 3 * C), jnp.bfloat16)
    zw_ref[H + 1, :, :] = jnp.zeros((W, 3 * C), jnp.bfloat16)

    h1 = _conv3x3_inorm(x_ref[...].astype(jnp.float32), w1_ref, zw_ref, relu=True)
    h2 = _conv3x3_inorm(h1, w2_ref, zw_ref, relu=False)

    # Residual add: re-read x late (short live range; the input block is still
    # resident in its pipeline buffer), add in f32, store bf16.
    out_ref[...] = (x_ref[...].astype(jnp.float32) + h2).astype(out_ref.dtype)


def _pack_conv_weight(w):
    """PyTorch (O, I, 3, 3) conv weight -> (3, 3C, C) bf16 tap-row matrices:
    out[kh, kw*C + ci, co] = w[co, ci, kh, kw]."""
    C = w.shape[0]
    wt = jnp.transpose(w.astype(jnp.float32), (2, 3, 1, 0))   # (kh, kw, ci, co)
    return wt.reshape(3, 3 * C, C).astype(jnp.bfloat16)


def residual_forward(x_nhwc, w1, b1, w2, b2):
    """x_nhwc: (N, H, W, C) activations (bf16 in HBM); w*: PyTorch (C, C, 3, 3); b*: (C,).

    Layout is NHWC bf16 end to end (no host transposes / no f32 upcast in HBM);
    the math is identical to the NCHW PyTorch module.  b1/b2 are accepted for API
    parity but unused: InstanceNorm2d(affine=False) cancels a per-channel conv
    bias exactly, so adding it would be dead compute.
    """
    del b1, b2
    N, H, W, C = x_nhwc.shape
    x = x_nhwc.astype(jnp.bfloat16)
    w1r = _pack_conv_weight(w1)
    w2r = _pack_conv_weight(w2)

    return pl.pallas_call(
        residual_kernel,
        out_shape=jax.ShapeDtypeStruct((N, H, W, C), jnp.bfloat16),
        grid_spec=pltpu.PrefetchScalarGridSpec(
            num_scalar_prefetch=0,
            grid=(N,),
            in_specs=[
                pl.BlockSpec((pl.Squeezed(), H, W, C), lambda n: (n, 0, 0, 0)),
                pl.BlockSpec((3, 3 * C, C), lambda n: (0, 0, 0)),
                pl.BlockSpec((3, 3 * C, C), lambda n: (0, 0, 0)),
            ],
            out_specs=pl.BlockSpec((pl.Squeezed(), H, W, C),
                                   lambda n: (n, 0, 0, 0)),
            scratch_shapes=[pltpu.VMEM((H + 2, W, 3 * C), jnp.bfloat16)],
        ),
        compiler_params=pltpu.CompilerParams(
            dimension_semantics=("parallel",),     # shard batch over v7x's 2 TCs
            # 32 MiB is plenty for this configuration (blocks are KB-scale); for
            # large H/W tiles on v6e raise toward 64-100 MiB (128 MiB physical).
            vmem_limit_bytes=32 * 1024 * 1024,
        ),
    )(x, w1r, w2r)


def residual_reference(x_nhwc, w1, b1, w2, b2):
    """Pure-JAX f32 NHWC reference matching PyTorch semantics, biases included."""
    x = x_nhwc.astype(jnp.float32)

    def block(h, w, b, relu):
        w_hwio = jnp.transpose(w.astype(jnp.float32), (2, 3, 1, 0))  # (kh,kw,I,O)
        y = jax.lax.conv_general_dilated(
            h, w_hwio, window_strides=(1, 1), padding=((1, 1), (1, 1)),
            dimension_numbers=("NHWC", "HWIO", "NHWC"),
            precision=jax.lax.Precision.HIGHEST)
        y = y + b[None, None, None, :]
        mean = jnp.mean(y, axis=(1, 2), keepdims=True)
        var = jnp.mean((y - mean) ** 2, axis=(1, 2), keepdims=True)
        y = (y - mean) * jax.lax.rsqrt(var + EPS)
        return jnp.maximum(y, 0.0) if relu else y

    h = block(x, w1, b1, True)
    h = block(h, w2, b2, False)
    return x + h


if __name__ == "__main__":
    N, C, H, W = 2, 4, 16, 16
    key = jax.random.PRNGKey(0)
    kx, k1, k2, k3, k4 = jax.random.split(key, 5)
    # Activations live in NHWC bf16 (kernel's HBM contract); the reference
    # consumes the same bf16-rounded values so only kernel-side error is tested.
    x = jax.random.normal(kx, (N, H, W, C), jnp.float32).astype(jnp.bfloat16)
    # Deterministic synthetic parameters (PyTorch Conv2d weight layout (O, I, 3, 3)).
    w1 = jax.random.normal(k1, (C, C, 3, 3), jnp.float32) * 0.1
    b1 = jax.random.normal(k2, (C,), jnp.float32) * 0.1
    w2 = jax.random.normal(k3, (C, C, 3, 3), jnp.float32) * 0.1
    b2 = jax.random.normal(k4, (C,), jnp.float32) * 0.1

    out = jax.block_until_ready(residual_forward(x, w1, b1, w2, b2))
    ref = residual_reference(x, w1, b1, w2, b2)
    assert out.shape == (N, H, W, C)
    out_f32 = out.astype(jnp.float32)
    max_err = float(jnp.max(jnp.abs(out_f32 - ref)))
    # bf16 MXU operands, bf16 weights and a bf16 output store vs. an f32
    # HIGHEST-precision reference -> allow bf16-level tolerance.
    assert jnp.allclose(out_f32, ref, atol=5e-2, rtol=5e-2), max_err
    print("KERNEL_OK")
</pallas_src>

<mosaic_0001>
module attributes {stable_mosaic.version = 11 : i64} {
  func.func @residual_kernel(%arg0: i32, %arg1: memref<1x16x16x4xbf16, #tpu.memory_space<vmem>>, %arg2: memref<3x12x4xbf16, #tpu.memory_space<vmem>>, %arg3: memref<3x12x4xbf16, #tpu.memory_space<vmem>>, %arg4: memref<1x16x16x4xbf16, #tpu.memory_space<vmem>>, %arg5: memref<18x16x12xbf16, #tpu.memory_space<vmem>>) attributes {dimension_semantics = [#tpu.dimension_semantics<parallel>], iteration_bounds = array<i64: 2>, scalar_prefetch = 0 : i64, scratch_operands = 1 : i64, tpu.core_type = #tpu.core_type<tc>, window_params = [{transform_indices = @transform_0, window_bounds = array<i64: 1, 16, 16, 4>}, {pipeline_mode = #tpu.pipeline_mode<synchronous>, transform_indices = @transform_1, window_bounds = array<i64: 3, 12, 4>}, {pipeline_mode = #tpu.pipeline_mode<synchronous>, transform_indices = @transform_2, window_bounds = array<i64: 3, 12, 4>}, {transform_indices = @transform_3, window_bounds = array<i64: 1, 16, 16, 4>}]} {
    %cst = arith.constant 0.000000e+00 : bf16
    %0 = vector.broadcast %cst : bf16 to vector<16x12xbf16>
    %c0 = arith.constant 0 : index
    %c0_0 = arith.constant 0 : index
    %c0_1 = arith.constant 0 : index
    %1 = vector.load %arg5[%c0, %c0_0, %c0_1] : memref<18x16x12xbf16, #tpu.memory_space<vmem>>, vector<1x16x12xbf16>
    %2 = vector.shape_cast %1 : vector<1x16x12xbf16> to vector<16x12xbf16>
    %3 = vector.shape_cast %0 : vector<16x12xbf16> to vector<1x16x12xbf16>
    tpu.vector_store %arg5[%c0, %c0_0, %c0_1], %3 {strides = array<i32>} : memref<18x16x12xbf16, #tpu.memory_space<vmem>>, vector<1x16x12xbf16>,
    %cst_2 = arith.constant 0.000000e+00 : bf16
    %4 = vector.broadcast %cst_2 : bf16 to vector<16x12xbf16>
    %c17 = arith.constant 17 : index
    %c0_3 = arith.constant 0 : index
    %c0_4 = arith.constant 0 : index
    %5 = vector.load %arg5[%c17, %c0_3, %c0_4] : memref<18x16x12xbf16, #tpu.memory_space<vmem>>, vector<1x16x12xbf16>
    %6 = vector.shape_cast %5 : vector<1x16x12xbf16> to vector<16x12xbf16>
    %7 = vector.shape_cast %4 : vector<16x12xbf16> to vector<1x16x12xbf16>
    tpu.vector_store %arg5[%c17, %c0_3, %c0_4], %7 {strides = array<i32>} : memref<18x16x12xbf16, #tpu.memory_space<vmem>>, vector<1x16x12xbf16>,
    %c0_5 = arith.constant 0 : index
    %c0_6 = arith.constant 0 : index
    %c0_7 = arith.constant 0 : index
    %c0_8 = arith.constant 0 : index
    %8 = vector.load %arg1[%c0_5, %c0_6, %c0_7, %c0_8] : memref<1x16x16x4xbf16, #tpu.memory_space<vmem>>, vector<1x16x16x4xbf16>
    %9 = vector.shape_cast %8 : vector<1x16x16x4xbf16> to vector<16x16x4xbf16>
    %10 = arith.extf %9 : vector<16x16x4xbf16> to vector<16x16x4xf32>
    %11 = tpu.iota {dimensions = array<i32: 1>} : vector<16x16x4xi32>
    %c0_i32 = arith.constant 0 : i32
    %12 = vector.broadcast %c0_i32 : i32 to vector<16x16x4xi32>
    %13 = arith.cmpi eq, %11, %12 : vector<16x16x4xi32>
    %c1_i32 = arith.constant 1 : i32
    %14 = tpu.dynamic_rotate %10 by %c1_i32 dim 1 : vector<16x16x4xf32>, i32 -> vector<16x16x4xf32>
    %cst_9 = arith.constant 0.000000e+00 : f32
    %15 = vector.broadcast %cst_9 : f32 to vector<16x16x4xf32>
    %16 = arith.select %13, %15, %14 : vector<16x16x4xi1>, vector<16x16x4xf32>
    %c15_i32 = arith.constant 15 : i32
    %17 = vector.broadcast %c15_i32 : i32 to vector<16x16x4xi32>
    %18 = arith.cmpi eq, %11, %17 : vector<16x16x4xi32>
    %c15_i32_10 = arith.constant 15 : i32
    %19 = tpu.dynamic_rotate %10 by %c15_i32_10 dim 1 : vector<16x16x4xf32>, i32 -> vector<16x16x4xf32>
    %cst_11 = arith.constant 0.000000e+00 : f32
    %20 = vector.broadcast %cst_11 : f32 to vector<16x16x4xf32>
    %21 = arith.select %18, %20, %19 : vector<16x16x4xi1>, vector<16x16x4xf32>
    %22 = arith.truncf %16 : vector<16x16x4xf32> to vector<16x16x4xbf16>
    %23 = arith.truncf %10 : vector<16x16x4xf32> to vector<16x16x4xbf16>
    %24 = arith.truncf %21 : vector<16x16x4xf32> to vector<16x16x4xbf16>
    %25 = tpu.concatenate %22, %23, %24 in 2 : vector<16x16x4xbf16>, vector<16x16x4xbf16>, vector<16x16x4xbf16> -> vector<16x16x12xbf16>
    %c1 = arith.constant 1 : index
    %c0_12 = arith.constant 0 : index
    %c0_13 = arith.constant 0 : index
    %26 = vector.load %arg5[%c1, %c0_12, %c0_13] : memref<18x16x12xbf16, #tpu.memory_space<vmem>>, vector<16x16x12xbf16>
    tpu.vector_store %arg5[%c1, %c0_12, %c0_13], %25 {strides = array<i32>} : memref<18x16x12xbf16, #tpu.memory_space<vmem>>, vector<16x16x12xbf16>,
    %c0_14 = arith.constant 0 : index
    %c0_15 = arith.constant 0 : index
    %c0_16 = arith.constant 0 : index
    %27 = vector.load %arg5[%c0_14, %c0_15, %c0_16] : memref<18x16x12xbf16, #tpu.memory_space<vmem>>, vector<16x16x12xbf16>
    %28 = vector.shape_cast %27 : vector<16x16x12xbf16> to vector<256x12xbf16>
    %c0_17 = arith.constant 0 : index
    %c0_18 = arith.constant 0 : index
    %c0_19 = arith.constant 0 : index
    %29 = vector.load %arg2[%c0_17, %c0_18, %c0_19] : memref<3x12x4xbf16, #tpu.memory_space<vmem>>, vector<1x12x4xbf16>
    %30 = vector.shape_cast %29 : vector<1x12x4xbf16> to vector<12x4xbf16>
    %cst_20 = arith.constant dense<0.000000e+00> : vector<256x4xf32>
    %31 = tpu.matmul %28, %30, %cst_20 {dimension_numbers = #tpu.dot_dimension_numbers<[1], [0], [0], [1], [0, 0, 1, 1], [], []>} : vector<256x12xbf16>, vector<12x4xbf16>, vector<256x4xf32> -> vector<256x4xf32>
    %c1_21 = arith.constant 1 : index
    %c0_22 = arith.constant 0 : index
    %c0_23 = arith.constant 0 : index
    %32 = vector.load %arg5[%c1_21, %c0_22, %c0_23] : memref<18x16x12xbf16, #tpu.memory_space<vmem>>, vector<16x16x12xbf16>
    %33 = vector.shape_cast %32 : vector<16x16x12xbf16> to vector<256x12xbf16>
    %c1_24 = arith.constant 1 : index
    %c0_25 = arith.constant 0 : index
    %c0_26 = arith.constant 0 : index
    %34 = vector.load %arg2[%c1_24, %c0_25, %c0_26] : memref<3x12x4xbf16, #tpu.memory_space<vmem>>, vector<1x12x4xbf16>
    %35 = vector.shape_cast %34 : vector<1x12x4xbf16> to vector<12x4xbf16>
    %cst_27 = arith.constant dense<0.000000e+00> : vector<256x4xf32>
    %36 = tpu.matmul %33, %35, %cst_27 {dimension_numbers = #tpu.dot_dimension_numbers<[1], [0], [0], [1], [0, 0, 1, 1], [], []>} : vector<256x12xbf16>, vector<12x4xbf16>, vector<256x4xf32> -> vector<256x4xf32>
    %37 = arith.addf %31, %36 : vector<256x4xf32>
    %c2 = arith.constant 2 : index
    %c0_28 = arith.constant 0 : index
    %c0_29 = arith.constant 0 : index
    %38 = vector.load %arg5[%c2, %c0_28, %c0_29] : memref<18x16x12xbf16, #tpu.memory_space<vmem>>, vector<16x16x12xbf16>
    %39 = vector.shape_cast %38 : vector<16x16x12xbf16> to vector<256x12xbf16>
    %c2_30 = arith.constant 2 : index
    %c0_31 = arith.constant 0 : index
    %c0_32 = arith.constant 0 : index
    %40 = vector.load %arg2[%c2_30, %c0_31, %c0_32] : memref<3x12x4xbf16, #tpu.memory_space<vmem>>, vector<1x12x4xbf16>
    %41 = vector.shape_cast %40 : vector<1x12x4xbf16> to vector<12x4xbf16>
    %cst_33 = arith.constant dense<0.000000e+00> : vector<256x4xf32>
    %42 = tpu.matmul %39, %41, %cst_33 {dimension_numbers = #tpu.dot_dimension_numbers<[1], [0], [0], [1], [0, 0, 1, 1], [], []>} : vector<256x12xbf16>, vector<12x4xbf16>, vector<256x4xf32> -> vector<256x4xf32>
    %43 = arith.addf %37, %42 : vector<256x4xf32>
    %cst_34 = arith.constant dense<0.000000e+00> : vector<4xf32>
    %44 = vector.multi_reduction <add>, %43, %cst_34 [0] : vector<256x4xf32> to vector<4xf32>
    %45 = vector.shape_cast %44 : vector<4xf32> to vector<1x4xf32>
    %cst_35 = arith.constant 3.906250e-03 : f32
    %46 = vector.broadcast %cst_35 : f32 to vector<1x4xf32>
    %47 = arith.mulf %45, %46 : vector<1x4xf32>
    %48 = arith.mulf %43, %43 : vector<256x4xf32>
    %cst_36 = arith.constant dense<0.000000e+00> : vector<4xf32>
    %49 = vector.multi_reduction <add>, %48, %cst_36 [0] : vector<256x4xf32> to vector<4xf32>
    %50 = vector.shape_cast %49 : vector<4xf32> to vector<1x4xf32>
    %cst_37 = arith.constant 3.906250e-03 : f32
    %51 = vector.broadcast %cst_37 : f32 to vector<1x4xf32>
    %52 = arith.mulf %50, %51 : vector<1x4xf32>
    %53 = arith.mulf %47, %47 : vector<1x4xf32>
    %54 = arith.subf %52, %53 : vector<1x4xf32>
    %cst_38 = arith.constant 0.000000e+00 : f32
    %55 = vector.broadcast %cst_38 : f32 to vector<1x4xf32>
    %56 = arith.maximumf %54, %55 : vector<1x4xf32>
    %57 = vector.broadcast %47 : vector<1x4xf32> to vector<256x4xf32>
    %58 = arith.subf %43, %57 : vector<256x4xf32>
    %cst_39 = arith.constant 9.99999974E-6 : f32
    %59 = vector.broadcast %cst_39 : f32 to vector<1x4xf32>
    %60 = arith.addf %56, %59 : vector<1x4xf32>
    %61 = math.rsqrt %60 : vector<1x4xf32>
    %62 = vector.broadcast %61 : vector<1x4xf32> to vector<256x4xf32>
    %63 = arith.mulf %58, %62 : vector<256x4xf32>
    %cst_40 = arith.constant 0.000000e+00 : f32
    %64 = vector.broadcast %cst_40 : f32 to vector<256x4xf32>
    %65 = arith.maximumf %63, %64 : vector<256x4xf32>
    %66 = vector.shape_cast %65 : vector<256x4xf32> to vector<16x16x4xf32>
    %67 = tpu.iota {dimensions = array<i32: 1>} : vector<16x16x4xi32>
    %c0_i32_41 = arith.constant 0 : i32
    %68 = vector.broadcast %c0_i32_41 : i32 to vector<16x16x4xi32>
    %69 = arith.cmpi eq, %67, %68 : vector<16x16x4xi32>
    %c1_i32_42 = arith.constant 1 : i32
    %70 = tpu.dynamic_rotate %66 by %c1_i32_42 dim 1 : vector<16x16x4xf32>, i32 -> vector<16x16x4xf32>
    %cst_43 = arith.constant 0.000000e+00 : f32
    %71 = vector.broadcast %cst_43 : f32 to vector<16x16x4xf32>
    %72 = arith.select %69, %71, %70 : vector<16x16x4xi1>, vector<16x16x4xf32>
    %c15_i32_44 = arith.constant 15 : i32
    %73 = vector.broadcast %c15_i32_44 : i32 to vector<16x16x4xi32>
    %74 = arith.cmpi eq, %67, %73 : vector<16x16x4xi32>
    %c15_i32_45 = arith.constant 15 : i32
    %75 = tpu.dynamic_rotate %66 by %c15_i32_45 dim 1 : vector<16x16x4xf32>, i32 -> vector<16x16x4xf32>
    %cst_46 = arith.constant 0.000000e+00 : f32
    %76 = vector.broadcast %cst_46 : f32 to vector<16x16x4xf32>
    %77 = arith.select %74, %76, %75 : vector<16x16x4xi1>, vector<16x16x4xf32>
    %78 = arith.truncf %72 : vector<16x16x4xf32> to vector<16x16x4xbf16>
    %79 = arith.truncf %66 : vector<16x16x4xf32> to vector<16x16x4xbf16>
    %80 = arith.truncf %77 : vector<16x16x4xf32> to vector<16x16x4xbf16>
    %81 = tpu.concatenate %78, %79, %80 in 2 : vector<16x16x4xbf16>, vector<16x16x4xbf16>, vector<16x16x4xbf16> -> vector<16x16x12xbf16>
    %c1_47 = arith.constant 1 : index
    %c0_48 = arith.constant 0 : index
    %c0_49 = arith.constant 0 : index
    %82 = vector.load %arg5[%c1_47, %c0_48, %c0_49] : memref<18x16x12xbf16, #tpu.memory_space<vmem>>, vector<16x16x12xbf16>
    tpu.vector_store %arg5[%c1_47, %c0_48, %c0_49], %81 {strides = array<i32>} : memref<18x16x12xbf16, #tpu.memory_space<vmem>>, vector<16x16x12xbf16>,
    %c0_50 = arith.constant 0 : index
    %c0_51 = arith.constant 0 : index
    %c0_52 = arith.constant 0 : index
    %83 = vector.load %arg5[%c0_50, %c0_51, %c0_52] : memref<18x16x12xbf16, #tpu.memory_space<vmem>>, vector<16x16x12xbf16>
    %84 = vector.shape_cast %83 : vector<16x16x12xbf16> to vector<256x12xbf16>
    %c0_53 = arith.constant 0 : index
    %c0_54 = arith.constant 0 : index
    %c0_55 = arith.constant 0 : index
    %85 = vector.load %arg3[%c0_53, %c0_54, %c0_55] : memref<3x12x4xbf16, #tpu.memory_space<vmem>>, vector<1x12x4xbf16>
    %86 = vector.shape_cast %85 : vector<1x12x4xbf16> to vector<12x4xbf16>
    %cst_56 = arith.constant dense<0.000000e+00> : vector<256x4xf32>
    %87 = tpu.matmul %84, %86, %cst_56 {dimension_numbers = #tpu.dot_dimension_numbers<[1], [0], [0], [1], [0, 0, 1, 1], [], []>} : vector<256x12xbf16>, vector<12x4xbf16>, vector<256x4xf32> -> vector<256x4xf32>
    %c1_57 = arith.constant 1 : index
    %c0_58 = arith.constant 0 : index
    %c0_59 = arith.constant 0 : index
    %88 = vector.load %arg5[%c1_57, %c0_58, %c0_59] : memref<18x16x12xbf16, #tpu.memory_space<vmem>>, vector<16x16x12xbf16>
    %89 = vector.shape_cast %88 : vector<16x16x12xbf16> to vector<256x12xbf16>
    %c1_60 = arith.constant 1 : index
    %c0_61 = arith.constant 0 : index
    %c0_62 = arith.constant 0 : index
    %90 = vector.load %arg3[%c1_60, %c0_61, %c0_62] : memref<3x12x4xbf16, #tpu.memory_space<vmem>>, vector<1x12x4xbf16>
    %91 = vector.shape_cast %90 : vector<1x12x4xbf16> to vector<12x4xbf16>
    %cst_63 = arith.constant dense<0.000000e+00> : vector<256x4xf32>
    %92 = tpu.matmul %89, %91, %cst_63 {dimension_numbers = #tpu.dot_dimension_numbers<[1], [0], [0], [1], [0, 0, 1, 1], [], []>} : vector<256x12xbf16>, vector<12x4xbf16>, vector<256x4xf32> -> vector<256x4xf32>
    %93 = arith.addf %87, %92 : vector<256x4xf32>
    %c2_64 = arith.constant 2 : index
    %c0_65 = arith.constant 0 : index
    %c0_66 = arith.constant 0 : index
    %94 = vector.load %arg5[%c2_64, %c0_65, %c0_66] : memref<18x16x12xbf16, #tpu.memory_space<vmem>>, vector<16x16x12xbf16>
    %95 = vector.shape_cast %94 : vector<16x16x12xbf16> to vector<256x12xbf16>
    %c2_67 = arith.constant 2 : index
    %c0_68 = arith.constant 0 : index
    %c0_69 = arith.constant 0 : index
    %96 = vector.load %arg3[%c2_67, %c0_68, %c0_69] : memref<3x12x4xbf16, #tpu.memory_space<vmem>>, vector<1x12x4xbf16>
    %97 = vector.shape_cast %96 : vector<1x12x4xbf16> to vector<12x4xbf16>
    %cst_70 = arith.constant dense<0.000000e+00> : vector<256x4xf32>
    %98 = tpu.matmul %95, %97, %cst_70 {dimension_numbers = #tpu.dot_dimension_numbers<[1], [0], [0], [1], [0, 0, 1, 1], [], []>} : vector<256x12xbf16>, vector<12x4xbf16>, vector<256x4xf32> -> vector<256x4xf32>
    %99 = arith.addf %93, %98 : vector<256x4xf32>
    %cst_71 = arith.constant dense<0.000000e+00> : vector<4xf32>
    %100 = vector.multi_reduction <add>, %99, %cst_71 [0] : vector<256x4xf32> to vector<4xf32>
    %101 = vector.shape_cast %100 : vector<4xf32> to vector<1x4xf32>
    %cst_72 = arith.constant 3.906250e-03 : f32
    %102 = vector.broadcast %cst_72 : f32 to vector<1x4xf32>
    %103 = arith.mulf %101, %102 : vector<1x4xf32>
    %104 = arith.mulf %99, %99 : vector<256x4xf32>
    %cst_73 = arith.constant dense<0.000000e+00> : vector<4xf32>
    %105 = vector.multi_reduction <add>, %104, %cst_73 [0] : vector<256x4xf32> to vector<4xf32>
    %106 = vector.shape_cast %105 : vector<4xf32> to vector<1x4xf32>
    %cst_74 = arith.constant 3.906250e-03 : f32
    %107 = vector.broadcast %cst_74 : f32 to vector<1x4xf32>
    %108 = arith.mulf %106, %107 : vector<1x4xf32>
    %109 = arith.mulf %103, %103 : vector<1x4xf32>
    %110 = arith.subf %108, %109 : vector<1x4xf32>
    %cst_75 = arith.constant 0.000000e+00 : f32
    %111 = vector.broadcast %cst_75 : f32 to vector<1x4xf32>
    %112 = arith.maximumf %110, %111 : vector<1x4xf32>
    %113 = vector.broadcast %103 : vector<1x4xf32> to vector<256x4xf32>
    %114 = arith.subf %99, %113 : vector<256x4xf32>
    %cst_76 = arith.constant 9.99999974E-6 : f32
    %115 = vector.broadcast %cst_76 : f32 to vector<1x4xf32>
    %116 = arith.addf %112, %115 : vector<1x4xf32>
    %117 = math.rsqrt %116 : vector<1x4xf32>
    %118 = vector.broadcast %117 : vector<1x4xf32> to vector<256x4xf32>
    %119 = arith.mulf %114, %118 : vector<256x4xf32>
    %120 = vector.shape_cast %119 : vector<256x4xf32> to vector<16x16x4xf32>
    %c0_77 = arith.constant 0 : index
    %c0_78 = arith.constant 0 : index
    %c0_79 = arith.constant 0 : index
    %c0_80 = arith.constant 0 : index
    %121 = vector.load %arg1[%c0_77, %c0_78, %c0_79, %c0_80] : memref<1x16x16x4xbf16, #tpu.memory_space<vmem>>, vector<1x16x16x4xbf16>
    %122 = vector.shape_cast %121 : vector<1x16x16x4xbf16> to vector<16x16x4xbf16>
    %123 = arith.extf %122 : vector<16x16x4xbf16> to vector<16x16x4xf32>
    %124 = arith.addf %123, %120 : vector<16x16x4xf32>
    %125 = arith.truncf %124 : vector<16x16x4xf32> to vector<16x16x4xbf16>
    %c0_81 = arith.constant 0 : index
    %c0_82 = arith.constant 0 : index
    %c0_83 = arith.constant 0 : index
    %c0_84 = arith.constant 0 : index
    %126 = vector.load %arg4[%c0_81, %c0_82, %c0_83, %c0_84] : memref<1x16x16x4xbf16, #tpu.memory_space<vmem>>, vector<1x16x16x4xbf16>
    %127 = vector.shape_cast %126 : vector<1x16x16x4xbf16> to vector<16x16x4xbf16>
    %128 = vector.shape_cast %125 : vector<16x16x4xbf16> to vector<1x16x16x4xbf16>
    tpu.vector_store %arg4[%c0_81, %c0_82, %c0_83, %c0_84], %128 {strides = array<i32>} : memref<1x16x16x4xbf16, #tpu.memory_space<vmem>>, vector<1x16x16x4xbf16>,
    return
  }
  func.func @transform_0(%arg0: i32) -> (i32, i32, i32, i32) {
    %c0_i32 = arith.constant 0 : i32
    %c0_i32_0 = arith.constant 0 : i32
    %c0_i32_1 = arith.constant 0 : i32
    %c0_i32_2 = arith.constant 0 : i32
    return %arg0, %c0_i32, %c0_i32_0, %c0_i32_1 : i32, i32, i32, i32
  }
  func.func @transform_1(%arg0: i32) -> (i32, i32, i32) {
    %c0_i32 = arith.constant 0 : i32
    %c0_i32_0 = arith.constant 0 : i32
    %c0_i32_1 = arith.constant 0 : i32
    %c0_i32_2 = arith.constant 0 : i32
    return %c0_i32, %c0_i32_0, %c0_i32_1 : i32, i32, i32
  }
  func.func @transform_2(%arg0: i32) -> (i32, i32, i32) {
    %c0_i32 = arith.constant 0 : i32
    %c0_i32_0 = arith.constant 0 : i32
    %c0_i32_1 = arith.constant 0 : i32
    %c0_i32_2 = arith.constant 0 : i32
    return %c0_i32, %c0_i32_0, %c0_i32_1 : i32, i32, i32
  }
  func.func @transform_3(%arg0: i32) -> (i32, i32, i32, i32) {
    %c0_i32 = arith.constant 0 : i32
    %c0_i32_0 = arith.constant 0 : i32
    %c0_i32_1 = arith.constant 0 : i32
    %c0_i32_2 = arith.constant 0 : i32
    return %arg0, %c0_i32, %c0_i32_0, %c0_i32_1 : i32, i32, i32, i32
  }
}

</mosaic_0001>

<bundles_post_ra>
// kernel: tpu_custom_call.1
= control target key start
LH: loop header
LB: loop body
LE: loop exit
PB: predicated region body
PF: predicated region fallthrough
CT: control target
= control target key end

     0   :  { %s5239_s12 = smov 0   ;;  %s7972_s0 = inlined_call_operand.vmem [shape: bf16[2,16,16,4], index: 0, kind: input, shape index: {}]   ;;  %s7973_s1 = inlined_call_operand.vmem [shape: bf16[3,12,4], index: 1, kind: input, shape index: {}]   ;;  %s7974_s2 = inlined_call_operand.vmem [shape: bf16[3,12,4], index: 2, kind: input, shape index: {}]   ;;  %s7975_s3 = inlined_call_operand.vmem [shape: bf16[2,16,16,4], index: 3, kind: output, shape index: {}]  }
   0x1 LB: > { %s4305_s13 = sadd.s32 4294967295, %s5214_s12   ;;  %p4309_p0 = scmp.ge.s32.totalorder %s5214_s12, 1  ;;  %s5214_s12 = sphi %s5239_s12, %s13_s12  }
   0x2   : > { %p137_p1 = scmp.lt.s32.totalorder %s5214_s12, 3 }
   0x4   : > { %p138_p2 = pnand %p4309_p0, %p137_p1 }
   0x6   : > { %141 = sbr.rel (%p138_p2) target bundleno = 1077 (0x435), region = 32 }
   0xb   : > { %p161_p3 = scmp.lt.s32.totalorder %s4305_s13, 1  ;;  %v242_v0 = vlaneseq  ;;  %vm172_vm0 = vcmask 93184   ;;  %v5216_v3 = vmov 0   ;;  %s5217_s18 = smov 4   ;;  %vm1065_vm5 = vcmask 1045504  }
   0xc   : > { %173 = vst.msk [vmem:[#allocation2] sm:$0xf] %vm172_vm0, %v5216_v3  ;;  %174 = vst.msk [vmem:[#allocation2 + $0x4] sm:$0xf] %vm172_vm0, %v5216_v3  ;;  %s5218_s19 = smov 8   ;;  %vm1016_vm6 = vcmask 97280  }
   0xd   : > { %s8074_s13 = smov (!%p161_p3, %s4305_s13), 1  ;;  %v5249_v1 = vshrl.u32 %v242_v0, 7  ;;  %176 = vst.msk [vmem:[#allocation2 + $0x88] sm:$0xf] %vm172_vm0, %v5216_v3  ;;  %177 = vst.msk [vmem:[#allocation2 + $0x8c] sm:$0xf] %vm172_vm0, %v5216_v3 }
   0xe   : > { %s4634_s14 = sshll.u32 %s8074_s13, 7  ;;  %vm635_vm7 = vcmask 31744   ;;  %vm684_vm8 = vcmask 64512   ;;  %vm4217_vm9 = vcmask 27648  }
   0xf   : > { %7987 = vst [vmem:[#allocation3_spill] sm:$0xff] %v5249_v1  ;;  %v5253_v2 = vadd.s32 8, %v5249_v1  ;;  %s5264_s17 = scalar_lea.vmem %s7972_s0, %s4634_s14  ;;  %vm378_vm1 = vcmp.lt.s32.totalorder %v5249_v1, 7  ;;  %vm279_vm3 = vcmp.lt.s32.totalorder %v5249_v1, 1  ;;  %vm245_vm4 = vcmp.eq.s32.totalorder %v5249_v1, 0  ;;  %s7863_s7 = scalar_lea.vmem %s7975_s3, %s4634_s14 }
  0x10   : > { %v178_v4 = vld [vmem:[%s5264_s17] sm:$0xff]   ;;  %v180_v5 = vld [vmem:[%s5264_s17 + $0x8] sm:$0xff]   ;;  %v182_v6 = vld [vmem:[%s5264_s17 + $0x10] sm:$0xff]  }
  0x11   : > { %7988 = vst [vmem:[#allocation4_spill] sm:$0xff] %v5253_v2  ;;  %v211_v7 = vunpack.c.h.bf16 %v178_v4  ;;  %v210_v8 = vunpack.c.l.bf16 %v178_v4  ;;  %v212_v9 = vunpack.c.l.bf16 %v180_v5  ;;  %v213_v10 = vunpack.c.h.bf16 %v180_v5  ;;  %555 = vrot.lane.b32.xlu0 %v178_v4, %s5217_s18  ;;  %v184_v18 = vld [vmem:[%s5264_s17 + $0x18] sm:$0xff]   ;;  %v186_v30 = vld [vmem:[%s5264_s17 + $0x20] sm:$0xff]   ;;  %v5298_v35 = vld [vmem:[%s5264_s17 + $0x28] sm:$0xff]  }
  0x12   : > { %v214_v11 = vunpack.c.l.bf16 %v182_v6  ;;  %v215_v12 = vunpack.c.h.bf16 %v182_v6  ;;  %vm345_vm2 = vcmp.eq.s32.totalorder %v5253_v2, 15  ;;  %v216_v29 = vunpack.c.l.bf16 %v184_v18  ;;  %v190_v53 = vld [vmem:[%s5264_s17 + $0x30] sm:$0xff]   ;;  %v5325_v57 = vld [vmem:[%s5264_s17 + $0x38] sm:$0xff]  }
  0x13   : > { %v362_v13 = vrot.slane %v211_v7, 1  ;;  %v346_v14 = vrot.slane %v210_v8, 1  ;;  %v5272_v15 = vrot.slane %v211_v7, 7  ;;  %v347_v16 = vrot.slane %v212_v9, 1 }
  0x14   : > { %v363_v17 = vrot.slane %v213_v10, 1  ;;  %v5275_v19 = vrot.slane %v210_v8, 7  ;;  %v5277_v20 = vrot.slane %v212_v9, 7  ;;  %v348_v24 = vrot.slane %v214_v11, 1 }
  0x15   : > { %v379_v21 = vsel %vm378_vm1, %v346_v14, %v362_v13  ;;  %v395_v22 = vsel %vm378_vm1, %v362_v13, %v346_v14  ;;  %v364_v25 = vrot.slane %v215_v12, 1  ;;  %557 = vrot.lane.b32.xlu0 %v180_v5, %s5217_s18  ;;  %v217_v34 = vunpack.c.h.bf16 %v184_v18 }
  0x16   : > { %v412_v23 = vsel %vm345_vm2, 0.0, %v395_v22  ;;  %v380_v27 = vsel %vm378_vm1, %v347_v16, %v363_v17  ;;  %v396_v28 = vsel %vm378_vm1, %v363_v17, %v347_v16  ;;  %v5300_v36 = vrot.slane %v213_v10, 7  ;;  %v5352_v16 = vld [vmem:[%s5264_s17 + $0x48] sm:$0xff]  }
  0x17   : > { %v459_v26 = vpack.c.bf16 %v412_v23, %v379_v21  ;;  %v414_v31 = vsel %vm345_vm2, 0.0, %v396_v28  ;;  %v381_v32 = vsel %vm378_vm1, %v348_v24, %v364_v25  ;;  %v397_v33 = vsel %vm378_vm1, %v364_v25, %v348_v24 }
  0x18   : > { %v460_v37 = vpack.c.bf16 %v414_v31, %v380_v27  ;;  %v416_v38 = vsel %vm345_vm2, 0.0, %v397_v33  ;;  %v349_v39 = vrot.slane %v216_v29, 1  ;;  %v5305_v40 = vrot.slane %v214_v11, 7  ;;  %v5347_v11 = vld [vmem:[%s5264_s17 + $0x40] sm:$0xff]  }
  0x19   : > { %603 = vrot.lane.b32.xlu1 %v459_v26, %s5218_s19  ;;  %v365_v41 = vrot.slane %v217_v34, 1  ;;  %559 = vrot.lane.b32.xlu0 %v182_v6, %s5217_s18  ;;  %v461_v42 = vpack.c.bf16 %v416_v38, %v381_v32  ;;  %v218_v43 = vunpack.c.l.bf16 %v186_v30  ;;  %v219_v44 = vunpack.c.h.bf16 %v186_v30 }
  0x1a   : > { %v220_v45 = vunpack.c.l.bf16 %v5298_v35  ;;  %v5309_v46 = vrot.slane %v215_v12, 7  ;;  %v5311_v47 = vrot.slane %v216_v29, 7  ;;  %v221_v49 = vunpack.c.h.bf16 %v5298_v35 }
  0x1b   : > { %v398_v48 = vsel %vm378_vm1, %v365_v41, %v349_v39  ;;  %v5317_v50 = vrot.slane %v217_v34, 7  ;;  %v350_v51 = vrot.slane %v218_v43, 1  ;;  %v366_v52 = vrot.slane %v219_v44, 1 }
  0x1c   : > { %v382_v54 = vsel %vm378_vm1, %v349_v39, %v365_v41  ;;  %v418_v55 = vsel %vm345_vm2, 0.0, %v398_v48  ;;  %v351_v56 = vrot.slane %v220_v45, 1  ;;  %v5328_v58 = vrot.slane %v218_v43, 7  ;;  %v5381_v41 = vld [vmem:[%s5264_s17 + $0x50] sm:$0xff]  }
  0x1d   : > { %605 = vrot.lane.b32.xlu1 %v460_v37, %s5218_s19  ;;  %607 = vrot.lane.b32.xlu0 %v461_v42, %s5218_s19  ;;  %v399_v59 = vsel %vm378_vm1, %v366_v52, %v350_v51  ;;  %v367_v60 = vrot.slane %v221_v49, 1  ;;  %v383_v61 = vsel %vm378_vm1, %v350_v51, %v366_v52  ;;  %v222_v63 = vunpack.c.l.bf16 %v190_v53 }
  0x1e   : > { %v420_v62 = vsel %vm345_vm2, 0.0, %v399_v59  ;;  %v223_v0 = vunpack.c.h.bf16 %v190_v53  ;;  %v5337_v3 = vrot.slane %v219_v44, 7  ;;  %v462_v4 = vpack.c.bf16 %v418_v55, %v382_v54 }
  0x1f   : > { %v400_v5 = vsel %vm378_vm1, %v367_v60, %v351_v56  ;;  %v224_v6 = vunpack.c.l.bf16 %v5325_v57  ;;  %v5342_v7 = vrot.slane %v220_v45, 7  ;;  %v5344_v8 = vrot.slane %v221_v49, 7  ;;  %v5390_v45 = vld [vmem:[%s5264_s17 + $0x58] sm:$0xff]  }
  0x20   : > { %v352_v9 = vrot.slane %v222_v63, 1  ;;  %v368_v10 = vrot.slane %v223_v0, 1  ;;  %v463_v12 = vpack.c.bf16 %v420_v62, %v383_v61  ;;  %v225_v13 = vunpack.c.h.bf16 %v5325_v57 }
  0x21   : > { %561 = vrot.lane.b32.xlu1 %v184_v18, %s5217_s18  ;;  %563 = vrot.lane.b32.xlu0 %v186_v30, %s5217_s18  ;;  %v353_v14 = vrot.slane %v224_v6, 1  ;;  %v5354_v17 = vrot.slane %v222_v63, 7  ;;  %v384_v18 = vsel %vm378_vm1, %v351_v56, %v367_v60  ;;  %v422_v21 = vsel %vm345_vm2, 0.0, %v400_v5 }
  0x22   : > { %v401_v22 = vsel %vm378_vm1, %v368_v10, %v352_v9  ;;  %v385_v23 = vsel %vm378_vm1, %v352_v9, %v368_v10  ;;  %v369_v25 = vrot.slane %v225_v13, 1  ;;  %v226_v26 = vunpack.c.l.bf16 %v5347_v11  ;;  %v5418_v10 = vld [vmem:[%s5264_s17 + $0x68] sm:$0xff]  }
  0x23   : > { %v424_v24 = vsel %vm345_vm2, 0.0, %v401_v22  ;;  %v5368_v27 = vrot.slane %v223_v0, 7  ;;  %v5370_v28 = vrot.slane %v224_v6, 7  ;;  %v227_v29 = vunpack.c.h.bf16 %v5347_v11 }
  0x24   : > { %v228_v30 = vunpack.c.l.bf16 %v5352_v16  ;;  %v464_v31 = vpack.c.bf16 %v422_v21, %v384_v18  ;;  %v354_v32 = vrot.slane %v226_v26, 1  ;;  %v402_v33 = vsel %vm378_vm1, %v369_v25, %v353_v14 }
  0x25   : > { %609 = vrot.lane.b32.xlu1 %v462_v4, %s5218_s19  ;;  %611 = vrot.lane.b32.xlu0 %v463_v12, %s5218_s19  ;;  %v465_v34 = vpack.c.bf16 %v424_v24, %v385_v23  ;;  %v5377_v37 = vrot.slane %v225_v13, 7  ;;  %v370_v38 = vrot.slane %v227_v29, 1  ;;  %v229_v39 = vunpack.c.h.bf16 %v5352_v16  ;;  %v5414_v4 = vld [vmem:[%s5264_s17 + $0x60] sm:$0xff]  }
  0x26   : > { %v386_v42 = vsel %vm378_vm1, %v353_v14, %v369_v25  ;;  %v426_v43 = vsel %vm345_vm2, 0.0, %v402_v33  ;;  %v355_v44 = vrot.slane %v228_v30, 1  ;;  %v5392_v48 = vrot.slane %v226_v26, 7 }
  0x27   : > { %v5394_v49 = vrot.slane %v227_v29, 7  ;;  %v403_v51 = vsel %vm378_vm1, %v370_v38, %v354_v32  ;;  %v371_v52 = vrot.slane %v229_v39, 1  ;;  %v230_v55 = vunpack.c.l.bf16 %v5381_v41 }
  0x28   : > { %v428_v54 = vsel %vm345_vm2, 0.0, %v403_v51  ;;  %v231_v56 = vunpack.c.h.bf16 %v5381_v41  ;;  %v466_v59 = vpack.c.bf16 %v426_v43, %v386_v42  ;;  %v5405_v60 = vrot.slane %v228_v30, 7  ;;  %v5458_v42 = vld [vmem:[%s5264_s17 + $0x70] sm:$0xff]  }
  0x29   : > { %565 = vrot.lane.b32.xlu1 %v5298_v35, %s5217_s18  ;;  %567 = vrot.lane.b32.xlu0 %v190_v53, %s5217_s18  ;;  %v387_v35 = vsel %vm378_vm1, %v354_v32, %v370_v38  ;;  %v404_v61 = vsel %vm378_vm1, %v371_v52, %v355_v44  ;;  %v232_v62 = vunpack.c.l.bf16 %v5390_v45  ;;  %v5411_v53 = vrot.slane %v229_v39, 7 }
  0x2a   : > { %v356_v63 = vrot.slane %v230_v55, 1  ;;  %v372_v0 = vrot.slane %v231_v56, 1  ;;  %v467_v5 = vpack.c.bf16 %v428_v54, %v387_v35  ;;  %v233_v6 = vunpack.c.h.bf16 %v5390_v45 }
  0x2b   : > { %v357_v9 = vrot.slane %v232_v62, 1  ;;  %v5421_v12 = vrot.slane %v230_v55, 7  ;;  %v388_v13 = vsel %vm378_vm1, %v355_v44, %v371_v52  ;;  %v430_v14 = vsel %vm345_vm2, 0.0, %v404_v61 }
  0x2c   : > { %v405_v18 = vsel %vm378_vm1, %v372_v0, %v356_v63  ;;  %v5432_v21 = vsel %vm378_vm1, %v356_v63, %v372_v0  ;;  %v373_v23 = vrot.slane %v233_v6, 1  ;;  %v234_v24 = vunpack.c.l.bf16 %v5414_v4 }
  0x2d   : > { %613 = vrot.lane.b32.xlu1 %v464_v31, %s5218_s19  ;;  %615 = vrot.lane.b32.xlu0 %v465_v34, %s5218_s19  ;;  %v5436_v22 = vsel %vm345_vm2, 0.0, %v405_v18  ;;  %v5441_v25 = vrot.slane %v231_v56, 7  ;;  %v5443_v26 = vrot.slane %v232_v62, 7  ;;  %v235_v29 = vunpack.c.h.bf16 %v5414_v4 }
  0x2e   : > { %v236_v30 = vunpack.c.l.bf16 %v5418_v10  ;;  %v468_v31 = vpack.c.bf16 %v430_v14, %v388_v13  ;;  %v358_v32 = vrot.slane %v234_v24, 1  ;;  %v406_v33 = vsel %vm378_vm1, %v373_v23, %v357_v9 }
  0x2f   : > { %v5454_v34 = vrot.slane %v233_v6, 7  ;;  %v374_v38 = vrot.slane %v235_v29, 1  ;;  %v237_v39 = vunpack.c.h.bf16 %v5418_v10  ;;  %v5462_v43 = vsel %vm378_vm1, %v357_v9, %v373_v23 }
  0x30   : > { %v5466_v44 = vsel %vm345_vm2, 0.0, %v406_v33  ;;  %v359_v51 = vrot.slane %v236_v30, 1  ;;  %v5472_v52 = vrot.slane %v234_v24, 7  ;;  %v5474_v35 = vrot.slane %v235_v29, 7 }
  0x31   : > { %569 = vrot.lane.b32.xlu1 %v5325_v57, %s5217_s18  ;;  %571 = vrot.lane.b32.xlu0 %v5347_v11, %s5217_s18  ;;  %v469_v57 = vpack.c.bf16 %v5436_v22, %v5432_v21  ;;  %v5469_v11 = vld [vmem:[%s5264_s17 + $0x78] sm:$0xff]   ;;  %v407_v54 = vsel %vm378_vm1, %v374_v38, %v358_v32  ;;  %v375_v55 = vrot.slane %v237_v39, 1  ;;  %v5480_v56 = vsel %vm378_vm1, %v358_v32, %v374_v38 }
  0x32   : > { %v5484_v61 = vsel %vm345_vm2, 0.0, %v407_v54  ;;  %v238_v62 = vunpack.c.l.bf16 %v5458_v42  ;;  %v470_v63 = vpack.c.bf16 %v5466_v44, %v5462_v43  ;;  %v5491_v0 = vrot.slane %v236_v30, 7 }
  0x33   : > { %v408_v6 = vsel %vm378_vm1, %v375_v55, %v359_v51  ;;  %v240_v9 = vunpack.c.l.bf16 %v5469_v11  ;;  %v5496_v13 = vrot.slane %v237_v39, 7  ;;  %v5504_v21 = vsel %vm378_vm1, %v359_v51, %v375_v55 }
  0x34   : > { %v360_v14 = vrot.slane %v238_v62, 1  ;;  %v241_v22 = vunpack.c.h.bf16 %v5469_v11  ;;  %v5507_v23 = vrot.slane %v238_v62, 7  ;;  %v5511_v24 = vsel %vm345_vm2, 0.0, %v408_v6 }
  0x35   : > { %617 = vrot.lane.b32.xlu1 %v466_v59, %s5218_s19  ;;  %v239_v59 = vunpack.c.h.bf16 %v5458_v42  ;;  %619 = vrot.lane.b32.xlu0 %v467_v5, %s5218_s19  ;;  %v471_v5 = vpack.c.bf16 %v5484_v61, %v5480_v56  ;;  %v5515_v30 = vrot.slane %v240_v9, 1  ;;  %v5533_v38 = vsel %vm279_vm3, %v5275_v19, %v5272_v15 }
  0x36   : > { %v5527_v33 = vrot.slane %v241_v22, 1  ;;  %v5545_v51 = vsel %vm279_vm3, %v5277_v20, %v5300_v36  ;;  %v297_v54 = vsel %vm279_vm3, %v5300_v36, %v5277_v20  ;;  %v472_v55 = vpack.c.bf16 %v5511_v24, %v5504_v21 }
  0x37   : > { %v376_v18 = vrot.slane %v239_v59, 1  ;;  %v5535_v39 = vrot.slane %v239_v59, 7  ;;  %v5554_v62 = vrot.slane %v240_v9, 7  ;;  %v5086_v59 = vld [vmem:[%s7973_s1] sm:$0x3f]   ;;  %v5577_v6 = vsel %vm279_vm3, %v5305_v40, %v5309_v46 }
  0x38   : > { %v5087_v9 = vld [vmem:[%s7973_s1 + $0x8] sm:$0x3f]   ;;  %5054 = vmatprep.subr.msk.bf16.mxu1 %vm1065_vm5, %v5086_v59  ;;  %v304_v44 = vsel %vm279_vm3, %v5394_v49, %v5392_v48  ;;  %v306_v56 = vsel %vm279_vm3, %v5441_v25, %v5421_v12 }
  0x39   : > { %573 = vrot.lane.b32.xlu1 %v5352_v16, %s5217_s18  ;;  %v409_v29 = vsel %vm378_vm1, %v376_v18, %v360_v14  ;;  %575 = vrot.lane.b32.xlu0 %v5381_v41, %s5217_s18  ;;  %v5521_v16 = vsel %vm378_vm1, %v360_v14, %v376_v18  ;;  %v296_v41 = vsel %vm279_vm3, %v5272_v15, %v5275_v19  ;;  %v5562_v19 = vsel %vm245_vm4, 0.0, %v297_v54 }
  0x3a   : > { %v5525_v32 = vsel %vm345_vm2, 0.0, %v409_v29  ;;  %v5558_v15 = vsel %vm245_vm4, 0.0, %v296_v41  ;;  %v5587_v14 = vsel %vm378_vm1, %v5527_v33, %v5515_v30  ;;  %v298_v18 = vsel %vm279_vm3, %v5309_v46, %v5305_v40  ;;  %v5088_v41 = vld [vmem:[#allocation2] sm:$0xff]   ;;  %5053 = vmatprep.subr.msk.bf16.mxu0 %vm1065_vm5, %v5087_v9 }
  0x3b   : > { %v473_v20 = vpack.c.bf16 %v5525_v32, %v5521_v16  ;;  %v443_v36 = vpack.c.bf16 %v5533_v38, %v5558_v15  ;;  %v5597_v29 = vsel %vm279_vm3, %v5311_v47, %v5317_v50  ;;  %v5605_v54 = vsel %vm245_vm4, 0.0, %v298_v18  ;;  %4885 = vmatprep.mubr.msk.bf16.mxu1 %vm1016_vm6, %v5088_v41 }
  0x3c   : > { %v5615_v40 = vsel %vm279_vm3, %v5328_v58, %v5337_v3  ;;  %v445_v46 = vpack.c.bf16 %v5577_v6, %v5605_v54  ;;  %v300_v18 = vsel %vm279_vm3, %v5337_v3, %v5328_v58  ;;  %v5644_v58 = vsel %vm279_vm3, %v5342_v7, %v5344_v8 }
  0x3d   : > { %621 = vrot.lane.b32.xlu1 %v468_v31, %s5218_s19  ;;  %623 = vrot.lane.b32.xlu0 %v469_v57, %s5218_s19  ;;  %v299_v57 = vsel %vm279_vm3, %v5317_v50, %v5311_v47  ;;  %v1364_v50 = vsel %vm1065_vm5, %v5086_v59, 0  ;;  %v1067_v59 = vsel %vm1065_vm5, %v5087_v9, 0  ;;  %v278_v3 = vrot.slane %v241_v22, 7 }
  0x3e   : > { %v5609_v31 = vsel %vm245_vm4, 0.0, %v299_v57  ;;  %v5632_v57 = vld [vmem:[%s7973_s1 + $0x10] sm:$0x3f]   ;;  %4884 = vmatpush3.bf16.msra.mxu1 %v1364_v50  ;;  %v301_v9 = vsel %vm279_vm3, %v5344_v8, %v5342_v7  ;;  %4850 = vmatpush3.bf16.msra.mxu0 %v1067_v59  ;;  %v302_v22 = vsel %vm279_vm3, %v5368_v27, %v5354_v17  ;;  %v5673_v7 = vsel %vm279_vm3, %v5370_v28, %v5377_v37 }
  0x3f   : > { %v446_v47 = vpack.c.bf16 %v5597_v29, %v5609_v31  ;;  %v303_v8 = vsel %vm279_vm3, %v5377_v37, %v5370_v28  ;;  %5055 = vmatprep.subr.msk.bf16.mxu0 %vm1065_vm5, %v5632_v57  ;;  %v5699_v28 = vsel %vm279_vm3, %v5392_v48, %v5394_v49  ;;  %v5721_v59 = vsel %vm245_vm4, 0.0, %v304_v44 }
  0x40   : > { %v305_v48 = vsel %vm279_vm3, %v5411_v53, %v5405_v60  ;;  %v5731_v49 = vsel %vm279_vm3, %v5421_v12, %v5441_v25  ;;  %v451_v61 = vpack.c.bf16 %v5699_v28, %v5721_v59 }
  0x41   : > { %577 = vrot.lane.b32.xlu1 %v5390_v45, %s5217_s18  ;;  %v5636_v45 = vsel %vm245_vm4, 0.0, %v300_v18  ;;  %579 = vrot.lane.b32.xlu0 %v5414_v4, %s5217_s18  ;;  %v5659_v18 = vsel %vm279_vm3, %v5354_v17, %v5368_v27  ;;  %v5663_v4 = vsel %vm245_vm4, 0.0, %v301_v9  ;;  %v5689_v17 = vsel %vm245_vm4, 0.0, %v302_v22 }
  0x42   : > { %v447_v50 = vpack.c.bf16 %v5615_v40, %v5636_v45  ;;  %v448_v41 = vpack.c.bf16 %v5644_v58, %v5663_v4  ;;  %v5693_v27 = vsel %vm245_vm4, 0.0, %v303_v8  ;;  %v449_v37 = vpack.c.bf16 %v5659_v18, %v5689_v17 }
  0x43   : > { %v450_v43 = vpack.c.bf16 %v5673_v7, %v5693_v27  ;;  %v307_v9 = vsel %vm279_vm3, %v5454_v34, %v5443_v26  ;;  %v5767_v22 = vsel %vm279_vm3, %v5472_v52, %v5474_v35  ;;  %v308_v8 = vsel %vm279_vm3, %v5474_v35, %v5472_v52 }
  0x44   : > { %v5793_v52 = vsel %vm245_vm4, 0.0, %v308_v8  ;;  %v311_v8 = vsel %vm279_vm3, %v278_v3, %v5554_v62 }
  0x45   : > { %625 = vrot.lane.b32.xlu1 %v470_v63, %s5218_s19  ;;  %v5713_v63 = vsel %vm279_vm3, %v5405_v60, %v5411_v53  ;;  %627 = vrot.lane.b32.xlu0 %v471_v5, %s5218_s19  ;;  %v5741_v5 = vsel %vm245_vm4, 0.0, %v305_v48  ;;  %v5745_v60 = vsel %vm245_vm4, 0.0, %v306_v56  ;;  %v5751_v53 = vsel %vm279_vm3, %v5443_v26, %v5454_v34 }
  0x46   : > { %v452_v12 = vpack.c.bf16 %v5713_v63, %v5741_v5  ;;  %v453_v25 = vpack.c.bf16 %v5731_v49, %v5745_v60  ;;  %v5781_v26 = vsel %vm279_vm3, %v5491_v0, %v5496_v13  ;;  %v309_v34 = vsel %vm279_vm3, %v5496_v13, %v5491_v0 }
  0x47   : > { %v5797_v35 = vsel %vm245_vm4, 0.0, %v309_v34  ;;  %v5803_v48 = vsel %vm279_vm3, %v5507_v23, %v5535_v39  ;;  %v310_v13 = vsel %vm279_vm3, %v5535_v39, %v5507_v23  ;;  %v5816_v56 = vsel %vm279_vm3, %v5554_v62, %v278_v3 }
  0x48   : > { %v456_v0 = vpack.c.bf16 %v5781_v26, %v5797_v35  ;;  %v394_v23 = vsel %vm378_vm1, %v5515_v30, %v5527_v33  ;;  %v442_v39 = vsel %vm345_vm2, 0.0, %v5587_v14  ;;  %v5840_v24 = vsel %vm245_vm4, 0.0, %v311_v8 }
  0x49   : > { %581 = vrot.lane.b32.xlu1 %v5418_v10, %s5217_s18  ;;  %v5771_v10 = vsel %vm245_vm4, 0.0, %v307_v9  ;;  %583 = vrot.lane.b32.xlu0 %v5458_v42, %s5217_s18  ;;  %v455_v42 = vpack.c.bf16 %v5767_v22, %v5793_v52  ;;  %v5824_v9 = vsel %vm245_vm4, 0.0, %v310_v13  ;;  %v474_v30 = vpack.c.bf16 %v442_v39, %v394_v23 }
  0x4a   : > { %v454_v44 = vpack.c.bf16 %v5751_v53, %v5771_v10  ;;  %v457_v21 = vpack.c.bf16 %v5803_v48, %v5824_v9 }
  0x4d   : > { %629 = vrot.lane.b32.xlu1 %v472_v55, %s5218_s19  ;;  %631 = vrot.lane.b32.xlu0 %v473_v20, %s5218_s19  ;;  %v458_v55 = vpack.c.bf16 %v5816_v56, %v5840_v24  ;;  %v7989_v20 = vpack.c.bf16 %v5545_v51, %v5562_v19 }
  0x51   : > { %585 = vrot.lane.b32.xlu1 %v5469_v11, %s5217_s18 }
  0x55   : > { %633 = vrot.lane.b32.xlu1 %v474_v30, %s5218_s19 }
  0x83   : > { %v556_v33 = vpop.permute.xlu0 %555 }
  0x84   : > { %v638_v62 = vsel %vm635_vm7, %v443_v36, %v556_v33 }
  0x87   : > { %v558_v14 = vpop.permute.xlu0 %557 }
  0x88   : > { %v641_v11 = vsel %vm635_vm7, %v7989_v20, %v558_v14 }
  0x8b   : > { %v604_v16 = vpop.permute.xlu1 %603  ;;  %v560_v13 = vpop.permute.xlu0 %559 }
  0x8c   : > { %v686_v32 = vsel %vm684_vm8, %v638_v62, %v604_v16  ;;  %v644_v38 = vsel %vm635_vm7, %v445_v46, %v560_v13 }
  0x8d   : > { %v4330_v3 = vcombine.low %v686_v32, %v686_v32  ;;  %v4331_v34 = vcombine.high %v686_v32, %v686_v32 }
  0x8f   : > { %830 = vst.msk [vmem:[#allocation2 + $0x8] sm:$0xf] %vm172_vm0, %v4330_v3  ;;  %831 = vst.msk [vmem:[#allocation2 + $0xc] sm:$0xf] %vm172_vm0, %v4331_v34  ;;  %v606_v15 = vpop.permute.xlu1 %605  ;;  %v608_v51 = vpop.permute.xlu0 %607 }
  0x90   : > { %v688_v36 = vsel %vm684_vm8, %v641_v11, %v606_v15  ;;  %v690_v19 = vsel %vm684_vm8, %v644_v38, %v608_v51 }
  0x91   : > { %v4332_v8 = vcombine.low %v688_v36, %v688_v36  ;;  %v4333_v23 = vcombine.high %v688_v36, %v688_v36  ;;  %v4334_v39 = vcombine.low %v690_v19, %v690_v19  ;;  %v4335_v30 = vcombine.high %v690_v19, %v690_v19 }
  0x93   : > { %832 = vst.msk [vmem:[#allocation2 + $0x10] sm:$0xf] %vm172_vm0, %v4332_v8  ;;  %833 = vst.msk [vmem:[#allocation2 + $0x14] sm:$0xf] %vm172_vm0, %v4333_v23  ;;  %v562_v33 = vpop.permute.xlu1 %561  ;;  %v564_v6 = vpop.permute.xlu0 %563 }
  0x94   : > { %834 = vst.msk [vmem:[#allocation2 + $0x18] sm:$0xf] %vm172_vm0, %v4334_v39  ;;  %835 = vst.msk [vmem:[#allocation2 + $0x1c] sm:$0xf] %vm172_vm0, %v4335_v30  ;;  %v647_v46 = vsel %vm635_vm7, %v446_v47, %v562_v33  ;;  %v650_v62 = vsel %vm635_vm7, %v447_v50, %v564_v6  ;;  %v1697_v47 = vsel %vm1065_vm5, %v5632_v57, 0 }
  0x96   : > { %v5089_v54 = vld [vmem:[#allocation2 + $0x8] sm:$0xff]  }
  0x97   : > { %v610_v14 = vpop.permute.xlu1 %609  ;;  %v5090_v16 = vld [vmem:[#allocation2 + $0x8] sm:$0xff]   ;;  %4851 = vmatprep.mubr.msk.bf16.mxu0 %vm1016_vm6, %v5089_v54  ;;  %v612_v3 = vpop.permute.xlu0 %611 }
  0x98   : > { %v692_v32 = vsel %vm684_vm8, %v647_v46, %v610_v14  ;;  %4886 = vmatmul.mubr.msk.bf16.vlgmr.msra.gmra.mxu1 %vm1016_vm6, %v5090_v16  ;;  %v694_v31 = vsel %vm684_vm8, %v650_v62, %v612_v3 }
  0x99   : > { %v4336_v20 = vcombine.low %v692_v32, %v692_v32  ;;  %v4337_v11 = vcombine.high %v692_v32, %v692_v32  ;;  %v4338_v40 = vcombine.low %v694_v31, %v694_v31  ;;  %v4339_v45 = vcombine.high %v694_v31, %v694_v31 }
  0x9a   : > { %v5092_v29 = vld [vmem:[#allocation2 + $0x10] sm:$0xff]  }
  0x9b   : > { %836 = vst.msk [vmem:[#allocation2 + $0x20] sm:$0xf] %vm172_vm0, %v4336_v20  ;;  %837 = vst.msk [vmem:[#allocation2 + $0x24] sm:$0xf] %vm172_vm0, %v4337_v11  ;;  %v566_v50 = vpop.permute.xlu1 %565  ;;  %v5093_v34 = vld [vmem:[#allocation2 + $0x10] sm:$0xff]   ;;  %4852 = vmatmul.mubr.msk.bf16.vlgmr.msra.gmra.mxu0 %vm1016_vm6, %v5092_v29  ;;  %v5094_v13 = vld [vmem:[#allocation2 + $0x18] sm:$0xff]   ;;  %v568_v38 = vpop.permute.xlu0 %567 }
  0x9c   : > { %838 = vst.msk [vmem:[#allocation2 + $0x28] sm:$0xf] %vm172_vm0, %v4338_v40  ;;  %839 = vst.msk [vmem:[#allocation2 + $0x2c] sm:$0xf] %vm172_vm0, %v4339_v45  ;;  %4889 = vmatprep.mubr.msk.bf16.mxu1 %vm1016_vm6, %v5093_v34  ;;  %4918 = vmatpush3.bf16.msra.mxu0 %v1697_v47  ;;  %v5095_v57 = vld [vmem:[#allocation2 + $0x18] sm:$0xff]   ;;  %v653_v15 = vsel %vm635_vm7, %v448_v41, %v566_v50  ;;  %v656_v36 = vsel %vm635_vm7, %v449_v37, %v568_v38 }
  0x9d   : > { %4855 = vmatprep.mubr.msk.bf16.mxu0 %vm1016_vm6, %v5094_v13 }
  0x9f   : > { %v614_v8 = vpop.permute.xlu1 %613  ;;  %v616_v39 = vpop.permute.xlu0 %615 }
  0xa0   : > { %v696_v23 = vsel %vm684_vm8, %v653_v15, %v614_v8  ;;  %4890 = vmatmul.mubr.msk.bf16.gmra.mxu1 %vm1016_vm6, %v5095_v57  ;;  %v698_v30 = vsel %vm684_vm8, %v656_v36, %v616_v39 }
  0xa1   : > { %v4340_v51 = vcombine.low %v696_v23, %v696_v23  ;;  %v4341_v19 = vcombine.high %v696_v23, %v696_v23  ;;  %v4342_v58 = vcombine.low %v698_v30, %v698_v30  ;;  %v4343_v4 = vcombine.high %v698_v30, %v698_v30 }
  0xa2   : > { %v5096_v33 = vld [vmem:[#allocation2 + $0x20] sm:$0xff]  }
  0xa3   : > { %840 = vst.msk [vmem:[#allocation2 + $0x30] sm:$0xf] %vm172_vm0, %v4340_v51  ;;  %841 = vst.msk [vmem:[#allocation2 + $0x34] sm:$0xf] %vm172_vm0, %v4341_v19  ;;  %v570_v18 = vpop.permute.xlu1 %569  ;;  %v5097_v41 = vld [vmem:[#allocation2 + $0x20] sm:$0xff]   ;;  %4856 = vmatmul.mubr.msk.bf16.gmra.mxu0 %vm1016_vm6, %v5096_v33  ;;  %v5098_v17 = vld [vmem:[#allocation2 + $0x28] sm:$0xff]   ;;  %v572_v37 = vpop.permute.xlu0 %571 }
  0xa4   : > { %842 = vst.msk [vmem:[#allocation2 + $0x38] sm:$0xf] %vm172_vm0, %v4342_v58  ;;  %843 = vst.msk [vmem:[#allocation2 + $0x3c] sm:$0xf] %vm172_vm0, %v4343_v4  ;;  %4893 = vmatprep.mubr.msk.bf16.mxu1 %vm1016_vm6, %v5097_v41  ;;  %v5099_v6 = vld [vmem:[#allocation2 + $0x28] sm:$0xff]   ;;  %4859 = vmatprep.mubr.msk.bf16.mxu0 %vm1016_vm6, %v5098_v17  ;;  %v659_v54 = vsel %vm635_vm7, %v450_v43, %v570_v18  ;;  %v662_v46 = vsel %vm635_vm7, %v451_v61, %v572_v37 }
  0xa7   : > { %v618_v62 = vpop.permute.xlu1 %617  ;;  %v620_v20 = vpop.permute.xlu0 %619 }
  0xa8   : > { %v700_v14 = vsel %vm684_vm8, %v659_v54, %v618_v62  ;;  %4894 = vmatmul.mubr.msk.bf16.gmra.mxu1 %vm1016_vm6, %v5099_v6  ;;  %v702_v11 = vsel %vm684_vm8, %v662_v46, %v620_v20 }
  0xa9   : > { %v4344_v16 = vcombine.low %v700_v14, %v700_v14  ;;  %v4345_v32 = vcombine.high %v700_v14, %v700_v14  ;;  %v4346_v7 = vcombine.low %v702_v11, %v702_v11  ;;  %v4347_v27 = vcombine.high %v702_v11, %v702_v11 }
  0xaa   : > { %v5100_v3 = vld [vmem:[#allocation2 + $0x30] sm:$0xff]  }
  0xab   : > { %844 = vst.msk [vmem:[#allocation2 + $0x40] sm:$0xf] %vm172_vm0, %v4344_v16  ;;  %845 = vst.msk [vmem:[#allocation2 + $0x44] sm:$0xf] %vm172_vm0, %v4345_v32  ;;  %v574_v28 = vpop.permute.xlu1 %573  ;;  %v5101_v43 = vld [vmem:[#allocation2 + $0x30] sm:$0xff]   ;;  %4860 = vmatmul.mubr.msk.bf16.gmra.mxu0 %vm1016_vm6, %v5100_v3  ;;  %v5102_v59 = vld [vmem:[#allocation2 + $0x38] sm:$0xff]   ;;  %v576_v61 = vpop.permute.xlu0 %575 }
  0xac   : > { %846 = vst.msk [vmem:[#allocation2 + $0x48] sm:$0xf] %vm172_vm0, %v4346_v7  ;;  %847 = vst.msk [vmem:[#allocation2 + $0x4c] sm:$0xf] %vm172_vm0, %v4347_v27  ;;  %4897 = vmatprep.mubr.msk.bf16.mxu1 %vm1016_vm6, %v5101_v43  ;;  %v5103_v31 = vld [vmem:[#allocation2 + $0x38] sm:$0xff]   ;;  %4863 = vmatprep.mubr.msk.bf16.mxu0 %vm1016_vm6, %v5102_v59  ;;  %v665_v29 = vsel %vm635_vm7, %v452_v12, %v574_v28  ;;  %v668_v47 = vsel %vm635_vm7, %v453_v25, %v576_v61  ;;  %v5123_v59 = vld [vmem:[#allocation2 + $0x20] sm:$0xff]  }
  0xad   : > { %v5122_v43 = vld [vmem:[#allocation2 + $0x18] sm:$0xff]   ;;  %v5124_v61 = vld [vmem:[#allocation2 + $0x28] sm:$0xff]  }
  0xaf   : > { %v622_v40 = vpop.permute.xlu1 %621  ;;  %v624_v13 = vpop.permute.xlu0 %623 }
  0xb0   : > { %v704_v45 = vsel %vm684_vm8, %v665_v29, %v622_v40  ;;  %4898 = vmatmul.mubr.msk.bf16.gmra.mxu1 %vm1016_vm6, %v5103_v31  ;;  %v706_v38 = vsel %vm684_vm8, %v668_v47, %v624_v13  ;;  %v5125_v31 = vld [vmem:[#allocation2 + $0x30] sm:$0xff]   ;;  %v5126_v29 = vld [vmem:[#allocation2 + $0x38] sm:$0xff]  }
  0xb1   : > { %v4348_v50 = vcombine.low %v704_v45, %v704_v45  ;;  %v4349_v34 = vcombine.high %v704_v45, %v704_v45  ;;  %v4350_v63 = vcombine.low %v706_v38, %v706_v38  ;;  %v4351_v5 = vcombine.high %v706_v38, %v706_v38 }
  0xb2   : > { %v5104_v57 = vld [vmem:[#allocation2 + $0x40] sm:$0xff]  }
  0xb3   : > { %848 = vst.msk [vmem:[#allocation2 + $0x50] sm:$0xf] %vm172_vm0, %v4348_v50  ;;  %849 = vst.msk [vmem:[#allocation2 + $0x54] sm:$0xf] %vm172_vm0, %v4349_v34  ;;  %v578_v49 = vpop.permute.xlu1 %577  ;;  %v5105_v60 = vld [vmem:[#allocation2 + $0x40] sm:$0xff]   ;;  %4864 = vmatmul.mubr.msk.bf16.gmra.mxu0 %vm1016_vm6, %v5104_v57  ;;  %v5106_v12 = vld [vmem:[#allocation2 + $0x48] sm:$0xff]   ;;  %v580_v25 = vpop.permute.xlu0 %579 }
  0xb4   : > { %850 = vst.msk [vmem:[#allocation2 + $0x58] sm:$0xf] %vm172_vm0, %v4350_v63  ;;  %851 = vst.msk [vmem:[#allocation2 + $0x5c] sm:$0xf] %vm172_vm0, %v4351_v5  ;;  %4901 = vmatprep.mubr.msk.bf16.mxu1 %vm1016_vm6, %v5105_v60  ;;  %v5107_v15 = vld [vmem:[#allocation2 + $0x48] sm:$0xff]   ;;  %4867 = vmatprep.mubr.msk.bf16.mxu0 %vm1016_vm6, %v5106_v12  ;;  %v671_v36 = vsel %vm635_vm7, %v454_v44, %v578_v49  ;;  %v674_v8 = vsel %vm635_vm7, %v455_v42, %v580_v25  ;;  %v5127_v47 = vld [vmem:[#allocation2 + $0x40] sm:$0xff]  }
  0xb5   : > { %v5128_v40 = vld [vmem:[#allocation2 + $0x48] sm:$0xff]  }
  0xb6   : > { %v5136_v5 = vld [vmem:[#allocation2 + $0x88] sm:$0xff]  }
  0xb7   : > { %v626_v23 = vpop.permute.xlu1 %625  ;;  %v628_v30 = vpop.permute.xlu0 %627 }
  0xb8   : > { %v708_v51 = vsel %vm684_vm8, %v671_v36, %v626_v23  ;;  %4902 = vmatmul.mubr.msk.bf16.gmra.mxu1 %vm1016_vm6, %v5107_v15  ;;  %v710_v33 = vsel %vm684_vm8, %v674_v8, %v628_v30 }
  0xb9   : > { %v4352_v19 = vcombine.low %v708_v51, %v708_v51  ;;  %v4353_v39 = vcombine.high %v708_v51, %v708_v51  ;;  %v4354_v53 = vcombine.low %v710_v33, %v710_v33  ;;  %v4355_v10 = vcombine.high %v710_v33, %v710_v33 }
  0xba   : > { %v5108_v58 = vld [vmem:[#allocation2 + $0x50] sm:$0xff]  }
  0xbb   : > { %852 = vst.msk [vmem:[#allocation2 + $0x60] sm:$0xf] %vm172_vm0, %v4352_v19  ;;  %853 = vst.msk [vmem:[#allocation2 + $0x64] sm:$0xf] %vm172_vm0, %v4353_v39  ;;  %v582_v22 = vpop.permute.xlu1 %581  ;;  %v5109_v44 = vld [vmem:[#allocation2 + $0x50] sm:$0xff]   ;;  %4868 = vmatmul.mubr.msk.bf16.gmra.mxu0 %vm1016_vm6, %v5108_v58  ;;  %v5110_v52 = vld [vmem:[#allocation2 + $0x58] sm:$0xff]   ;;  %v584_v42 = vpop.permute.xlu0 %583 }
  0xbc   : > { %854 = vst.msk [vmem:[#allocation2 + $0x68] sm:$0xf] %vm172_vm0, %v4354_v53  ;;  %855 = vst.msk [vmem:[#allocation2 + $0x6c] sm:$0xf] %vm172_vm0, %v4355_v10  ;;  %4905 = vmatprep.mubr.msk.bf16.mxu1 %vm1016_vm6, %v5109_v44  ;;  %v5111_v4 = vld [vmem:[#allocation2 + $0x58] sm:$0xff]   ;;  %4871 = vmatprep.mubr.msk.bf16.mxu0 %vm1016_vm6, %v5110_v52  ;;  %v677_v18 = vsel %vm635_vm7, %v456_v0, %v582_v22  ;;  %v680_v41 = vsel %vm635_vm7, %v457_v21, %v584_v42  ;;  %v5129_v45 = vld [vmem:[#allocation2 + $0x50] sm:$0xff]  }
  0xbd   : > { %v5130_v50 = vld [vmem:[#allocation2 + $0x58] sm:$0xff]  }
  0xbf   : > { %v630_v17 = vpop.permute.xlu1 %629  ;;  %v632_v46 = vpop.permute.xlu0 %631 }
  0xc0   : > { %v712_v37 = vsel %vm684_vm8, %v677_v18, %v630_v17  ;;  %4906 = vmatmul.mubr.msk.bf16.gmra.mxu1 %vm1016_vm6, %v5111_v4  ;;  %v714_v62 = vsel %vm684_vm8, %v680_v41, %v632_v46 }
  0xc1   : > { %v4356_v6 = vcombine.low %v712_v37, %v712_v37  ;;  %v4357_v54 = vcombine.high %v712_v37, %v712_v37  ;;  %v4358_v26 = vcombine.low %v714_v62, %v714_v62  ;;  %v4359_v35 = vcombine.high %v714_v62, %v714_v62 }
  0xc2   : > { %v5112_v14 = vld [vmem:[#allocation2 + $0x60] sm:$0xff]  }
  0xc3   : > { %856 = vst.msk [vmem:[#allocation2 + $0x70] sm:$0xf] %vm172_vm0, %v4356_v6  ;;  %857 = vst.msk [vmem:[#allocation2 + $0x74] sm:$0xf] %vm172_vm0, %v4357_v54  ;;  %v586_v48 = vpop.permute.xlu1 %585  ;;  %v5113_v0 = vld [vmem:[#allocation2 + $0x60] sm:$0xff]   ;;  %4872 = vmatmul.mubr.msk.bf16.gmra.mxu0 %vm1016_vm6, %v5112_v14  ;;  %v5114_v9 = vld [vmem:[#allocation2 + $0x68] sm:$0xff]  }
  0xc4   : > { %858 = vst.msk [vmem:[#allocation2 + $0x78] sm:$0xf] %vm172_vm0, %v4358_v26  ;;  %859 = vst.msk [vmem:[#allocation2 + $0x7c] sm:$0xf] %vm172_vm0, %v4359_v35  ;;  %4909 = vmatprep.mubr.msk.bf16.mxu1 %vm1016_vm6, %v5113_v0  ;;  %v5115_v21 = vld [vmem:[#allocation2 + $0x68] sm:$0xff]   ;;  %4875 = vmatprep.mubr.msk.bf16.mxu0 %vm1016_vm6, %v5114_v9  ;;  %v683_v16 = vsel %vm635_vm7, %v458_v55, %v586_v48  ;;  %v5121_v55 = vld [vmem:[#allocation2 + $0x10] sm:$0xff]  }
  0xc5   : > { %v5131_v34 = vld [vmem:[#allocation2 + $0x60] sm:$0xff]   ;;  %v5132_v13 = vld [vmem:[#allocation2 + $0x68] sm:$0xff]  }
  0xc7   : > { %v634_v32 = vpop.permute.xlu1 %633 }
  0xc8   : > { %v716_v20 = vsel %vm684_vm8, %v683_v16, %v634_v32  ;;  %4910 = vmatmul.mubr.msk.bf16.gmra.mxu1 %vm1016_vm6, %v5115_v21 }
  0xc9   : > { %v4360_v11 = vcombine.low %v716_v20, %v716_v20  ;;  %v4361_v3 = vcombine.high %v716_v20, %v716_v20 }
  0xca   : > { %v5116_v7 = vld [vmem:[#allocation2 + $0x70] sm:$0xff]  }
  0xcb   : > { %860 = vst.msk [vmem:[#allocation2 + $0x80] sm:$0xf] %vm172_vm0, %v4360_v11  ;;  %861 = vst.msk [vmem:[#allocation2 + $0x84] sm:$0xf] %vm172_vm0, %v4361_v3  ;;  %v5117_v27 = vld [vmem:[#allocation2 + $0x70] sm:$0xff]   ;;  %4876 = vmatmul.mubr.msk.bf16.gmra.mxu0 %vm1016_vm6, %v5116_v7  ;;  %v5118_v28 = vld [vmem:[#allocation2 + $0x78] sm:$0xff]  }
  0xcc   : > { %4913 = vmatprep.mubr.msk.bf16.mxu1 %vm1016_vm6, %v5117_v27  ;;  %v5119_v56 = vld [vmem:[#allocation2 + $0x78] sm:$0xff]   ;;  %4879 = vmatprep.mubr.msk.bf16.mxu0 %vm1016_vm6, %v5118_v28  ;;  %v5133_v38 = vld [vmem:[#allocation2 + $0x70] sm:$0xff]  }
  0xcd   : > { %v5134_v57 = vld [vmem:[#allocation2 + $0x78] sm:$0xff]  }
  0xd0   : > { %4914 = vmatmul.mubr.msk.bf16.gmra.mxu1 %vm1016_vm6, %v5119_v56 }
  0xd2   : > { %v5120_v24 = vld [vmem:[#allocation2 + $0x80] sm:$0xff]  }
  0xd3   : > { %4880 = vmatmul.mubr.msk.bf16.gmra.mxu0 %vm1016_vm6, %v5120_v24  ;;  %v5135_v63 = vld [vmem:[#allocation2 + $0x80] sm:$0xff]  }
  0xd4   : > { %4919 = vmatprep.mubr.msk.bf16.mxu0 %vm1016_vm6, %v5121_v55 }
  0xdb   : > { %4920 = vmatmul.mubr.msk.bf16.vlgmr.msra.gmra.mxu0 %vm1016_vm6, %v5122_v43 }
  0xdc   : > { %4923 = vmatprep.mubr.msk.bf16.mxu0 %vm1016_vm6, %v5123_v59 }
  0xe3   : > { %4924 = vmatmul.mubr.msk.bf16.gmra.mxu0 %vm1016_vm6, %v5124_v61 }
  0xe4   : > { %4927 = vmatprep.mubr.msk.bf16.mxu0 %vm1016_vm6, %v5125_v31 }
  0xeb   : > { %4928 = vmatmul.mubr.msk.bf16.gmra.mxu0 %vm1016_vm6, %v5126_v29 }
  0xec   : > { %4931 = vmatprep.mubr.msk.bf16.mxu0 %vm1016_vm6, %v5127_v47 }
  0xf3   : > { %4932 = vmatmul.mubr.msk.bf16.gmra.mxu0 %vm1016_vm6, %v5128_v40 }
  0xf4   : > { %4935 = vmatprep.mubr.msk.bf16.mxu0 %vm1016_vm6, %v5129_v45 }
  0xfb   : > { %4936 = vmatmul.mubr.msk.bf16.gmra.mxu0 %vm1016_vm6, %v5130_v50 }
  0xfc   : > { %4939 = vmatprep.mubr.msk.bf16.mxu0 %vm1016_vm6, %v5131_v34 }
 0x103   : > { %4940 = vmatmul.mubr.msk.bf16.gmra.mxu0 %vm1016_vm6, %v5132_v13 }
 0x104   : > { %4943 = vmatprep.mubr.msk.bf16.mxu0 %vm1016_vm6, %v5133_v38 }
 0x10b   : > { %4944 = vmatmul.mubr.msk.bf16.gmra.mxu0 %vm1016_vm6, %v5134_v57 }
 0x10c   : > { %4947 = vmatprep.mubr.msk.bf16.mxu0 %vm1016_vm6, %v5135_v63 }
 0x113   : > { %4948 = vmatmul.mubr.msk.bf16.gmra.mxu0 %vm1016_vm6, %v5136_v5 }
 0x158   : > { %v4887_v49 = vpop.f32.mrf.mxu1 }
 0x15a   : > { %v1400_v25 = vpop.f32.mrf.mxu1 }
 0x15b   : > { %v4853_v60 = vpop.f32.mrf.mxu0 }
 0x15c   : > { %v4888_v8 = vpop.f32.mrf.mxu1  ;;  %v1409_v47 = vadd.f32 %v4887_v49, %v4853_v60 }
 0x15d   : > { %v1103_v12 = vpop.f32.mrf.mxu0 }
 0x15e   : > { %v1403_v19 = vpop.f32.mrf.mxu1  ;;  %v1401_v31 = vadd.f32 %v1400_v25, %v1103_v12 }
 0x15f   : > { %v4854_v15 = vpop.f32.mrf.mxu0 }
 0x160   : > { %v4891_v33 = vpop.f32.mrf.mxu1  ;;  %v1412_v34 = vadd.f32 %v4888_v8, %v4854_v15 }
 0x161   : > { %v1106_v36 = vpop.f32.mrf.mxu0 }
 0x162   : > { %v1416_v10 = vpop.f32.mrf.mxu1  ;;  %v1404_v13 = vadd.f32 %v1403_v19, %v1106_v36 }
 0x163   : > { %v6012_v23 = vpop.f32.mrf.mxu0 }
 0x164   : > { %v4892_v52 = vpop.f32.mrf.mxu1  ;;  %v1425_v19 = vadd.f32 %v4891_v33, %v6012_v23 }
 0x165   : > { %v1119_v51 = vpop.f32.mrf.mxu0 }
 0x166   : > { %v1419_v18 = vpop.f32.mrf.mxu1  ;;  %v1417_v49 = vadd.f32 %v1416_v10, %v1119_v51 }
 0x167   : > { %v6014_v39 = vpop.f32.mrf.mxu0 }
 0x168   : > { %v6034_v37 = vpop.f32.mrf.mxu1 }
 0x169   : > { %v6016_v30 = vpop.f32.mrf.mxu0 }
 0x16a   : > { %v6040_v46 = vpop.f32.mrf.mxu1  ;;  %v1420_v23 = vadd.f32 %v1419_v18, %v6016_v30 }
 0x16b   : > { %v6018_v58 = vpop.f32.mrf.mxu0 }
 0x16c   : > { %v6046_v26 = vpop.f32.mrf.mxu1 }
 0x16d   : > { %v6020_v53 = vpop.f32.mrf.mxu0 }
 0x16e   : > { %v6052_v0 = vpop.f32.mrf.mxu1 }
 0x16f   : > { %v6022_v22 = vpop.f32.mrf.mxu0 }
 0x170   : > { %v6058_v16 = vpop.f32.mrf.mxu1 }
 0x171   : > { %v6024_v44 = vpop.f32.mrf.mxu0 }
 0x172   : > { %v6064_v11 = vpop.f32.mrf.mxu1 }
 0x173   : > { %v6026_v42 = vpop.f32.mrf.mxu0 }
 0x174   : > { %v6070_v27 = vpop.f32.mrf.mxu1 }
 0x175   : > { %v6028_v4 = vpop.f32.mrf.mxu0 }
 0x176   : > { %v6076_v24 = vpop.f32.mrf.mxu1 }
 0x177   : > { %v6030_v41 = vpop.f32.mrf.mxu0 }
 0x178   : > { %v6082_v59 = vpop.f32.mrf.mxu1 }
 0x179   : > { %v6032_v17 = vpop.f32.mrf.mxu0 }
 0x17a   : > { %v6084_v40 = vpop.f32.mrf.mxu1 }
 0x17b   : > { %v6036_v6 = vpop.f32.mrf.mxu0 }
 0x17c   : > { %v6090_v63 = vpop.f32.mrf.mxu1 }
 0x17d   : > { %v6038_v54 = vpop.f32.mrf.mxu0 }
 0x17e   : > { %v6109_v10 = vpop.f32.mrf.mxu1 }
 0x17f   : > { %v6042_v62 = vpop.f32.mrf.mxu0 }
 0x181   : > { %v6044_v14 = vpop.f32.mrf.mxu0 }
 0x183   : > { %v6048_v35 = vpop.f32.mrf.mxu0 }
 0x185   : > { %v6050_v48 = vpop.f32.mrf.mxu0 }
 0x187   : > { %v6054_v9 = vpop.f32.mrf.mxu0 }
 0x189   : > { %v6056_v21 = vpop.f32.mrf.mxu0 }
 0x18b   : > { %v6060_v32 = vpop.f32.mrf.mxu0 }
 0x18d   : > { %v6062_v20 = vpop.f32.mrf.mxu0 }
 0x18f   : > { %v6066_v3 = vpop.f32.mrf.mxu0 }
 0x191   : > { %v6068_v7 = vpop.f32.mrf.mxu0 }
 0x193   : > { %v6072_v28 = vpop.f32.mrf.mxu0 }
 0x195   : > { %v6074_v56 = vpop.f32.mrf.mxu0 }
 0x197   : > { %v6078_v55 = vpop.f32.mrf.mxu0 }
 0x199   : > { %v6080_v43 = vpop.f32.mrf.mxu0 }
 0x19b   : > { %v4921_v61 = vpop.f32.mrf.mxu0 }
 0x19c   : > { %v6088_v38 = vadd.f32 %v4921_v61, %v1409_v47 }
 0x19d   : > { %v1733_v29 = vpop.f32.mrf.mxu0 }
 0x19e   : > { %v6086_v45 = vadd.f32 %v1733_v29, %v1401_v31  ;;  %7990 = vst [vmem:[#allocation5_spill] sm:$0xff] %v6088_v38  ;;  %v1964_v25 = vmul.f32 %v6088_v38, %v6088_v38  ;;  %v1895_v61 = vsel %vm635_vm7, %v6088_v38, 0.0 }
 0x19f   : > { %v4922_v50 = vpop.f32.mrf.mxu0 }
 0x1a0   : > { %v1962_v5 = vmul.f32 %v6086_v45, %v6086_v45  ;;  %v6094_v2 = vadd.f32 %v4922_v50, %v1412_v34  ;;  %v1892_v15 = vsel %vm635_vm7, %v6086_v45, 0.0 }
 0x1a1   : > { %v1736_v57 = vpop.f32.mrf.mxu0 }
 0x1a2   : > { %v6096_v12 = vadd.f32 %v1736_v57, %v1404_v13  ;;  %v1994_v29 = vsel %vm635_vm7, %v1962_v5, 0.0  ;;  %v1965_v47 = vmul.f32 %v6094_v2, %v6094_v2  ;;  %v1428_v13 = vadd.f32 %v4892_v52, %v6014_v39 }
 0x1a3   : > { %v4925_v60 = vpop.f32.mrf.mxu0 }
 0x1a4   : > { %7991 = vst [vmem:[#allocation6_spill] sm:$0xff] %v6096_v12  ;;  %v1893_v36 = vsel %vm635_vm7, %v6096_v12, 0.0  ;;  %v1963_v8 = vmul.f32 %v6096_v12, %v6096_v12  ;;  %v6122_v5 = vadd.f32 %v4925_v60, %v1425_v19  ;;  %v6126_v12 = vpop.f32.mrf.mxu1  ;;  %v1999_v39 = vsel %vm635_vm7, %v1965_v47, 0.0 }
 0x1a5   : > { %v1894_v31 = vadd.f32 %v1893_v36, %v1892_v15  ;;  %v1749_v51 = vpop.f32.mrf.mxu0  ;;  %v1997_v15 = vsel %vm635_vm7, %v1964_v25, 0.0  ;;  %v1897_v36 = vsel %vm635_vm7, %v6094_v2, 0.0  ;;  %v1433_v60 = vadd.f32 %v6040_v46, %v6020_v53 }
 0x1a6   : > { %v1995_v50 = vsel %vm635_vm7, %v1963_v8, 0.0  ;;  %v6115_v34 = vadd.f32 %v1749_v51, %v1417_v49  ;;  %v6146_v46 = vpop.f32.mrf.mxu1 }
 0x1a7   : > { %v1896_v33 = vadd.f32 %v1895_v61, %v1894_v31  ;;  %v1996_v57 = vadd.f32 %v1995_v50, %v1994_v29  ;;  %v4926_v1 = vpop.f32.mrf.mxu0  ;;  %v1968_v31 = vmul.f32 %v6122_v5, %v6122_v5  ;;  %v1441_v50 = vadd.f32 %v6034_v37, %v6018_v58 }
 0x1a8   : > { %v1966_v38 = vmul.f32 %v6115_v34, %v6115_v34  ;;  %v1899_v30 = vsel %vm635_vm7, %v6115_v34, 0.0  ;;  %v6131_v52 = vadd.f32 %v4926_v1, %v1428_v13  ;;  %v1436_v58 = vadd.f32 %v6052_v0, %v6024_v44 }
 0x1a9   : > { %v1998_v8 = vadd.f32 %v1997_v15, %v1996_v57  ;;  %v1898_v49 = vadd.f32 %v1897_v36, %v1896_v33  ;;  %v1752_v51 = vpop.f32.mrf.mxu0  ;;  %v1903_v33 = vsel %vm635_vm7, %v6122_v5, 0.0  ;;  %v1444_v36 = vadd.f32 %v6046_v26, %v6022_v22  ;;  %v6166_v22 = vpop.f32.mrf.mxu1 }
 0x1aa   : > { %v6133_v18 = vadd.f32 %v1752_v51, %v1420_v23  ;;  %v2001_v29 = vsel %vm635_vm7, %v1966_v38, 0.0  ;;  %v1969_v38 = vmul.f32 %v6131_v52, %v6131_v52  ;;  %v2005_v51 = vsel %vm635_vm7, %v1968_v31, 0.0 }
 0x1ab   : > { %v1900_v25 = vadd.f32 %v1899_v30, %v1898_v49  ;;  %v2000_v19 = vadd.f32 %v1999_v39, %v1998_v8  ;;  %v4929_v61 = vpop.f32.mrf.mxu0  ;;  %v1905_v39 = vsel %vm635_vm7, %v6131_v52, 0.0 }
 0x1ac   : > { %v1901_v47 = vsel %vm635_vm7, %v6133_v18, 0.0  ;;  %v1967_v1 = vmul.f32 %v6133_v18, %v6133_v18  ;;  %v6162_v30 = vadd.f32 %v4929_v61, %v1441_v50  ;;  %v2007_v44 = vsel %vm635_vm7, %v1969_v38, 0.0 }
 0x1ad   : > { %v2002_v13 = vadd.f32 %v2001_v29, %v2000_v19  ;;  %v1902_v23 = vadd.f32 %v1901_v47, %v1900_v25  ;;  %v1765_v53 = vpop.f32.mrf.mxu0  ;;  %v1449_v61 = vadd.f32 %v6064_v11, %v6028_v4  ;;  %v1457_v38 = vadd.f32 %v6058_v16, %v6026_v42  ;;  %v6186_v11 = vpop.f32.mrf.mxu1 }
 0x1ae   : > { %v2003_v57 = vsel %vm635_vm7, %v1967_v1, 0.0  ;;  %v6153_v15 = vadd.f32 %v1765_v53, %v1433_v60  ;;  %v1452_v42 = vadd.f32 %v6076_v24, %v6032_v17 }
 0x1af   : > { %v1904_v37 = vadd.f32 %v1903_v33, %v1902_v23  ;;  %v2004_v8 = vadd.f32 %v2003_v57, %v2002_v13  ;;  %v4930_v49 = vpop.f32.mrf.mxu0  ;;  %v1972_v13 = vmul.f32 %v6162_v30, %v6162_v30 }
 0x1b0   : > { %v1970_v60 = vmul.f32 %v6153_v15, %v6153_v15  ;;  %v1907_v26 = vsel %vm635_vm7, %v6153_v15, 0.0  ;;  %v6171_v0 = vadd.f32 %v4930_v49, %v1444_v36 }
 0x1b1   : > { %v2006_v25 = vadd.f32 %v2005_v51, %v2004_v8  ;;  %v1906_v19 = vadd.f32 %v1905_v39, %v1904_v37  ;;  %v1768_v29 = vpop.f32.mrf.mxu0  ;;  %v1460_v51 = vadd.f32 %v6070_v27, %v6030_v41  ;;  %v6206_v41 = vpop.f32.mrf.mxu1 }
 0x1b2   : > { %v6173_v31 = vadd.f32 %v1768_v29, %v1436_v58  ;;  %v2009_v23 = vsel %vm635_vm7, %v1970_v60, 0.0  ;;  %v1911_v58 = vsel %vm635_vm7, %v6162_v30, 0.0  ;;  %v1973_v37 = vmul.f32 %v6171_v0, %v6171_v0 }
 0x1b3   : > { %v1908_v47 = vadd.f32 %v1907_v26, %v1906_v19  ;;  %v2008_v1 = vadd.f32 %v2007_v44, %v2006_v25  ;;  %v4933_v50 = vpop.f32.mrf.mxu0  ;;  %v2013_v25 = vsel %vm635_vm7, %v1972_v13, 0.0  ;;  %v1913_v19 = vsel %vm635_vm7, %v6171_v0, 0.0 }
 0x1b4   : > { %v1909_v53 = vsel %vm635_vm7, %v6173_v31, 0.0  ;;  %v1971_v33 = vmul.f32 %v6173_v31, %v6173_v31  ;;  %v6202_v29 = vadd.f32 %v4933_v50, %v1457_v38  ;;  %v2015_v17 = vsel %vm635_vm7, %v1973_v37, 0.0 }
 0x1b5   : > { %v2010_v57 = vadd.f32 %v2009_v23, %v2008_v1  ;;  %v1910_v36 = vadd.f32 %v1909_v53, %v1908_v47  ;;  %v1781_v4 = vpop.f32.mrf.mxu0  ;;  %v1465_v50 = vadd.f32 %v6084_v40, %v6038_v54  ;;  %v1496_v40 = vpop.f32.mrf.mxu1 }
 0x1b6   : > { %v2011_v8 = vsel %vm635_vm7, %v1971_v33, 0.0  ;;  %v6193_v49 = vadd.f32 %v1781_v4, %v1449_v61  ;;  %v1976_v33 = vmul.f32 %v6202_v29, %v6202_v29  ;;  %v1473_v4 = vadd.f32 %v6082_v59, %v6036_v6 }
 0x1b7   : > { %v1912_v16 = vadd.f32 %v1911_v58, %v1910_v36  ;;  %v2012_v39 = vadd.f32 %v2011_v8, %v2010_v57  ;;  %v4934_v60 = vpop.f32.mrf.mxu0  ;;  %v1919_v8 = vsel %vm635_vm7, %v6202_v29, 0.0  ;;  %v1468_v6 = vadd.f32 %v6109_v10, %v6044_v14 }
 0x1b8   : > { %v1974_v44 = vmul.f32 %v6193_v49, %v6193_v49  ;;  %v1915_v27 = vsel %vm635_vm7, %v6193_v49, 0.0  ;;  %v6211_v24 = vadd.f32 %v4934_v60, %v1460_v51 }
 0x1b9   : > { %v2014_v26 = vadd.f32 %v2013_v25, %v2012_v39  ;;  %v1914_v61 = vadd.f32 %v1913_v19, %v1912_v16  ;;  %v1784_v47 = vpop.f32.mrf.mxu0  ;;  %v1476_v39 = vadd.f32 %v6090_v63, %v6042_v62  ;;  %v2021_v19 = vsel %vm635_vm7, %v1976_v33, 0.0  ;;  %v4912_v62 = vpop.f32.mrf.mxu1 }
 0x1ba   : > { %v6213_v1 = vadd.f32 %v1784_v47, %v1452_v42  ;;  %v2017_v38 = vsel %vm635_vm7, %v1974_v44, 0.0  ;;  %v1977_v51 = vmul.f32 %v6211_v24, %v6211_v24  ;;  %v1921_v44 = vsel %vm635_vm7, %v6211_v24, 0.0 }
 0x1bb   : > { %v1916_v13 = vadd.f32 %v1915_v27, %v1914_v61  ;;  %v2016_v23 = vadd.f32 %v2015_v17, %v2014_v26  ;;  %v4937_v53 = vpop.f32.mrf.mxu0 }
 0x1bc   : > { %v1917_v57 = vsel %vm635_vm7, %v6213_v1, 0.0  ;;  %v1975_v36 = vmul.f32 %v6213_v1, %v6213_v1  ;;  %v6240_v26 = vadd.f32 %v4937_v53, %v1473_v4  ;;  %v2023_v63 = vsel %vm635_vm7, %v1977_v51, 0.0 }
 0x1bd   : > { %v2018_v58 = vadd.f32 %v2017_v38, %v2016_v23  ;;  %v1918_v37 = vadd.f32 %v1917_v57, %v1916_v13  ;;  %v1797_v54 = vpop.f32.mrf.mxu0  ;;  %v1481_v13 = vadd.f32 %v6146_v46, %v6050_v48  ;;  %v1499_v46 = vpop.f32.mrf.mxu1 }
 0x1be   : > { %v2019_v42 = vsel %vm635_vm7, %v1975_v36, 0.0  ;;  %v6231_v16 = vadd.f32 %v1797_v54, %v1465_v50  ;;  %v1980_v38 = vmul.f32 %v6240_v26, %v6240_v26 }
 0x1bf   : > { %v1920_v59 = vadd.f32 %v1919_v8, %v1918_v37  ;;  %v2020_v60 = vadd.f32 %v2019_v42, %v2018_v58  ;;  %v4938_v25 = vpop.f32.mrf.mxu0  ;;  %v1489_v58 = vadd.f32 %v6126_v12, %v6048_v35  ;;  %v1927_v8 = vsel %vm635_vm7, %v6240_v26, 0.0 }
 0x1c0   : > { %v1978_v61 = vmul.f32 %v6231_v16, %v6231_v16  ;;  %v1923_v14 = vsel %vm635_vm7, %v6231_v16, 0.0  ;;  %v6247_v10 = vadd.f32 %v4938_v25, %v1476_v39  ;;  %v1484_v35 = vadd.f32 %v6186_v11, %v6056_v21 }
 0x1c1   : > { %v2022_v47 = vadd.f32 %v2021_v19, %v2020_v60  ;;  %v1922_v17 = vadd.f32 %v1921_v44, %v1920_v59  ;;  %v1800_v27 = vpop.f32.mrf.mxu0  ;;  %v2029_v25 = vsel %vm635_vm7, %v1980_v38, 0.0 }
 0x1c2   : > { %v6249_v50 = vadd.f32 %v1800_v27, %v1468_v6  ;;  %v2025_v57 = vsel %vm635_vm7, %v1978_v61, 0.0  ;;  %v1981_v51 = vmul.f32 %v6247_v10, %v6247_v10  ;;  %v1492_v6 = vadd.f32 %v6166_v22, %v6054_v9  ;;  %v4915_v9 = vpop.f32.mrf.mxu1 }
 0x1c3   : > { %v1924_v23 = vadd.f32 %v1923_v14, %v1922_v17  ;;  %v2024_v53 = vadd.f32 %v2023_v63, %v2022_v47  ;;  %v4941_v33 = vpop.f32.mrf.mxu0  ;;  %v1929_v19 = vsel %vm635_vm7, %v6247_v10, 0.0  ;;  %v1497_v14 = vadd.f32 %v1496_v40, %v6062_v20 }
 0x1c4   : > { %v1925_v36 = vsel %vm635_vm7, %v6249_v50, 0.0  ;;  %v1979_v4 = vmul.f32 %v6249_v50, %v6249_v50  ;;  %v6276_v44 = vadd.f32 %v4941_v33, %v1489_v58  ;;  %v2031_v22 = vsel %vm635_vm7, %v1981_v51, 0.0  ;;  %v1512_v40 = vpop.f32.mrf.mxu1 }
 0x1c5   : > { %v2026_v37 = vadd.f32 %v2025_v57, %v2024_v53  ;;  %v1926_v54 = vadd.f32 %v1925_v36, %v1924_v23  ;;  %v1813_v48 = vpop.f32.mrf.mxu0 }
 0x1c6   : > { %v2027_v42 = vsel %vm635_vm7, %v1979_v4, 0.0  ;;  %v6267_v39 = vadd.f32 %v1813_v48, %v1481_v13  ;;  %v1984_v33 = vmul.f32 %v6276_v44, %v6276_v44  ;;  %v1505_v4 = vadd.f32 %v6206_v41, %v6060_v32 }
 0x1c7   : > { %v1928_v12 = vadd.f32 %v1927_v8, %v1926_v54  ;;  %v2028_v59 = vadd.f32 %v2027_v42, %v2026_v37  ;;  %v4942_v60 = vpop.f32.mrf.mxu0  ;;  %v1935_v54 = vsel %vm635_vm7, %v6276_v44, 0.0  ;;  %v1508_v42 = vadd.f32 %v4912_v62, %v6066_v3 }
 0x1c8   : > { %v1982_v61 = vmul.f32 %v6267_v39, %v6267_v39  ;;  %v1931_v21 = vsel %vm635_vm7, %v6267_v39, 0.0  ;;  %v6283_v11 = vadd.f32 %v4942_v60, %v1492_v6  ;;  %v1500_v6 = vadd.f32 %v1499_v46, %v6068_v7 }
 0x1c9   : > { %v2030_v47 = vadd.f32 %v2029_v25, %v2028_v59  ;;  %v1930_v17 = vadd.f32 %v1929_v19, %v1928_v12  ;;  %v1816_v27 = vpop.f32.mrf.mxu0  ;;  %v2037_v12 = vsel %vm635_vm7, %v1984_v33, 0.0 }
 0x1ca   : > { %v6285_v63 = vadd.f32 %v1816_v27, %v1484_v35  ;;  %v2033_v38 = vsel %vm635_vm7, %v1982_v61, 0.0  ;;  %v1985_v48 = vmul.f32 %v6283_v11, %v6283_v11  ;;  %v1937_v59 = vsel %vm635_vm7, %v6283_v11, 0.0 }
 0x1cb   : > { %v1932_v13 = vadd.f32 %v1931_v21, %v1930_v17  ;;  %v2032_v23 = vadd.f32 %v2031_v22, %v2030_v47  ;;  %v4945_v53 = vpop.f32.mrf.mxu0  ;;  %v4916_v17 = vpop.f32.mrf.mxu1  ;;  %v1513_v27 = vadd.f32 %v1512_v40, %v6074_v56 }
 0x1cc   : > { %v1933_v57 = vsel %vm635_vm7, %v6285_v63, 0.0  ;;  %v1983_v36 = vmul.f32 %v6285_v63, %v6285_v63  ;;  %v6309_v60 = vadd.f32 %v4945_v53, %v1505_v4  ;;  %v2039_v3 = vsel %vm635_vm7, %v1985_v48, 0.0 }
 0x1cd   : > { %v2034_v58 = vadd.f32 %v2033_v38, %v2032_v23  ;;  %v1934_v37 = vadd.f32 %v1933_v57, %v1932_v13  ;;  %v1829_v20 = vpop.f32.mrf.mxu0  ;;  %v1521_v38 = vadd.f32 %v4915_v9, %v6072_v28  ;;  %v1515_v56 = vpop.f32.mrf.mxu1  ;;  %v1524_v28 = vadd.f32 %v4916_v17, %v6078_v55 }
 0x1ce   : > { %v2035_v8 = vsel %vm635_vm7, %v1983_v36, 0.0  ;;  %v6302_v51 = vadd.f32 %v1829_v20, %v1497_v14  ;;  %v1988_v13 = vmul.f32 %v6309_v60, %v6309_v60  ;;  %v1516_v9 = vadd.f32 %v1515_v56, %v6080_v43 }
 0x1cf   : > { %v1936_v35 = vadd.f32 %v1935_v54, %v1934_v37  ;;  %v2036_v32 = vadd.f32 %v2035_v8, %v2034_v58  ;;  %v4946_v41 = vpop.f32.mrf.mxu0  ;;  %v1943_v58 = vsel %vm635_vm7, %v6309_v60, 0.0  ;;  %v5137_v54 = vld [vmem:[%s7974_s2 + $0x8] sm:$0x3f]  }
 0x1d0   : > { %v1986_v25 = vmul.f32 %v6302_v51, %v6302_v51  ;;  %v1939_v7 = vsel %vm635_vm7, %v6302_v51, 0.0  ;;  %v6316_v62 = vadd.f32 %v4946_v41, %v1508_v42  ;;  %5056 = vmatprep.subr.msk.bf16.mxu1 %vm1065_vm5, %v5137_v54  ;;  %v2928_v43 = vsel %vm1065_vm5, %v5137_v54, 0 }
 0x1d1   : > { %v2038_v19 = vadd.f32 %v2037_v12, %v2036_v32  ;;  %v1938_v61 = vadd.f32 %v1937_v59, %v1936_v35  ;;  %v1832_v47 = vpop.f32.mrf.mxu0  ;;  %4952 = vmatpush3.bf16.msra.mxu1 %v2928_v43 }
 0x1d2   : > { %v6318_v46 = vadd.f32 %v1832_v47, %v1500_v6  ;;  %v2041_v23 = vsel %vm635_vm7, %v1986_v25, 0.0  ;;  %v1989_v37 = vmul.f32 %v6316_v62, %v6316_v62  ;;  %v2045_v6 = vsel %vm635_vm7, %v1988_v13, 0.0 }
 0x1d3   : > { %v1940_v22 = vadd.f32 %v1939_v7, %v1938_v61  ;;  %v2040_v21 = vadd.f32 %v2039_v3, %v2038_v19  ;;  %v4949_v14 = vpop.f32.mrf.mxu0  ;;  %v1945_v35 = vsel %vm635_vm7, %v6316_v62, 0.0 }
 0x1d4   : > { %v1941_v53 = vsel %vm635_vm7, %v6318_v46, 0.0  ;;  %v1987_v33 = vmul.f32 %v6318_v46, %v6318_v46  ;;  %v6344_v32 = vadd.f32 %v4949_v14, %v1521_v38  ;;  %v2047_v25 = vsel %vm635_vm7, %v1989_v37, 0.0 }
 0x1d5   : > { %v2042_v57 = vadd.f32 %v2041_v23, %v2040_v21  ;;  %v1942_v36 = vadd.f32 %v1941_v53, %v1940_v22  ;;  %v1845_v4 = vpop.f32.mrf.mxu0 }
 0x1d6   : > { %v2043_v20 = vsel %vm635_vm7, %v1987_v33, 0.0  ;;  %v6334_v40 = vadd.f32 %v1845_v4, %v1513_v27  ;;  %v1992_v7 = vmul.f32 %v6344_v32, %v6344_v32  ;;  %v1951_v23 = vsel %vm635_vm7, %v6344_v32, 0.0 }
 0x1d7   : > { %v1944_v48 = vadd.f32 %v1943_v58, %v1942_v36  ;;  %v2044_v8 = vadd.f32 %v2043_v20, %v2042_v57  ;;  %v4950_v42 = vpop.f32.mrf.mxu0 }
 0x1d8   : > { %v1990_v41 = vmul.f32 %v6334_v40, %v6334_v40  ;;  %v1947_v19 = vsel %vm635_vm7, %v6334_v40, 0.0  ;;  %v6353_v61 = vadd.f32 %v4950_v42, %v1524_v28  ;;  %v2053_v36 = vsel %vm635_vm7, %v1992_v7, 0.0 }
 0x1d9   : > { %v2046_v12 = vadd.f32 %v2045_v6, %v2044_v8  ;;  %v1946_v59 = vadd.f32 %v1945_v35, %v1944_v48  ;;  %v1848_v55 = vpop.f32.mrf.mxu0 }
 0x1da   : > { %v6355_v47 = vadd.f32 %v1848_v55, %v1516_v9  ;;  %v2049_v27 = vsel %vm635_vm7, %v1990_v41, 0.0  ;;  %v1993_v53 = vmul.f32 %v6353_v61, %v6353_v61  ;;  %v1953_v4 = vsel %vm635_vm7, %v6353_v61, 0.0 }
 0x1db   : > { %v1948_v17 = vadd.f32 %v1947_v19, %v1946_v59  ;;  %v2048_v3 = vadd.f32 %v2047_v25, %v2046_v12 }
 0x1dc   : > { %v1949_v22 = vsel %vm635_vm7, %v6355_v47, 0.0  ;;  %v1991_v21 = vmul.f32 %v6355_v47, %v6355_v47  ;;  %v2055_v37 = vsel %vm635_vm7, %v1993_v53, 0.0 }
 0x1dd   : > { %v2050_v14 = vadd.f32 %v2049_v27, %v2048_v3  ;;  %v1950_v13 = vadd.f32 %v1949_v22, %v1948_v17 }
 0x1de   : > { %v2051_v33 = vsel %vm635_vm7, %v1991_v21, 0.0 }
 0x1df   : > { %v1952_v38 = vadd.f32 %v1951_v23, %v1950_v13  ;;  %v2052_v57 = vadd.f32 %v2051_v33, %v2050_v14 }
 0x1e1   : > { %v1954_v56 = vadd.f32 %v1953_v4, %v1952_v38  ;;  %v2054_v58 = vadd.f32 %v2053_v36, %v2052_v57 }
 0x1e3   : > { %v1955_v20 = vrot.slane %v1954_v56, 4  ;;  %v2056_v54 = vadd.f32 %v2055_v37, %v2054_v58 }
 0x1e5   : > { %v1956_v28 = vadd.f32 %v1955_v20, %v1954_v56  ;;  %v2057_v9 = vrot.slane %v2056_v54, 4 }
 0x1e7   : > { %v1957_v48 = vrot.slane %v1956_v28, 2  ;;  %v2058_v8 = vadd.f32 %v2057_v9, %v2056_v54 }
 0x1e9   : > { %v1958_v42 = vadd.f32 %v1957_v48, %v1956_v28  ;;  %v2059_v6 = vrot.slane %v2058_v8, 2 }
 0x1eb   : > { %v1959_v35 = vrot.slane %v1958_v42, 1  ;;  %v2060_v41 = vadd.f32 %v2059_v6, %v2058_v8 }
 0x1ed   : > { %v1960_v12 = vadd.f32 %v1959_v35, %v1958_v42  ;;  %v2061_v59 = vrot.slane %v2060_v41, 1 }
 0x1ef   : > { %v6373_v55 = vmul.f32 0.00390625, %v1960_v12  ;;  %v2062_v43 = vadd.f32 %v2061_v59, %v2060_v41 }
 0x1f1   : > { %v2063_v25 = vmul.f32 0.00390625, %v2062_v43  ;;  %v2064_v19 = vmul.f32 %v6373_v55, %v6373_v55  ;;  %v2096_v17 = vsub.f32 %v6355_v47, %v6373_v55  ;;  %v2076_v7 = vsub.f32 %v6173_v31, %v6373_v55 }
 0x1f2   : > { %v2079_v22 = vsub.f32 %v6193_v49, %v6373_v55  ;;  %v2080_v21 = vsub.f32 %v6213_v1, %v6373_v55  ;;  %v2081_v14 = vsub.f32 %v6202_v29, %v6373_v55  ;;  %v2082_v13 = vsub.f32 %v6211_v24, %v6373_v55 }
 0x1f3   : > { %v2065_v3 = vsub.f32 %v2063_v25, %v2064_v19  ;;  %v2083_v47 = vsub.f32 %v6231_v16, %v6373_v55  ;;  %v2084_v23 = vsub.f32 %v6249_v50, %v6373_v55  ;;  %v2085_v31 = vsub.f32 %v6240_v26, %v6373_v55 }
 0x1f4   : > { %v2086_v49 = vsub.f32 %v6247_v10, %v6373_v55  ;;  %v2087_v1 = vsub.f32 %v6267_v39, %v6373_v55  ;;  %v2088_v29 = vsub.f32 %v6285_v63, %v6373_v55  ;;  %v2089_v24 = vsub.f32 %v6276_v44, %v6373_v55 }
 0x1f5   : > { %v2066_v27 = vmax.f32 %v2065_v3, 0.0  ;;  %v2090_v16 = vsub.f32 %v6283_v11, %v6373_v55  ;;  %v2091_v50 = vsub.f32 %v6302_v51, %v6373_v55  ;;  %v2092_v26 = vsub.f32 %v6318_v46, %v6373_v55  ;;  %v7992_v46 = vld [vmem:[#allocation6_spill] sm:$0xff] }
 0x1f6   : > { %v2093_v10 = vsub.f32 %v6309_v60, %v6373_v55  ;;  %v2094_v39 = vsub.f32 %v6316_v62, %v6373_v55  ;;  %v2095_v63 = vsub.f32 %v6334_v40, %v6373_v55  ;;  %v2097_v44 = vsub.f32 %v6344_v32, %v6373_v55  ;;  %v7993_v60 = vld [vmem:[#allocation5_spill] sm:$0xff] }
 0x1f7   : > { %v2099_v53 = vadd.f32 1e-05, %v2066_v27  ;;  %v2098_v11 = vsub.f32 %v6353_v61, %v6373_v55  ;;  %v2067_v51 = vsub.f32 %v6086_v45, %v6373_v55  ;;  %v2068_v33 = vsub.f32 %v7992_v46, %v6373_v55 }
 0x1f8   : > { %v2069_v38 = vsub.f32 %v7993_v60, %v6373_v55  ;;  %v2070_v62 = vsub.f32 %v6094_v2, %v6373_v55  ;;  %v2071_v40 = vsub.f32 %v6115_v34, %v6373_v55  ;;  %v2072_v32 = vsub.f32 %v6133_v18, %v6373_v55 }
 0x1f9   : > { %5204 = vrsqrt.f32 %v2099_v53  ;;  %v2073_v61 = vsub.f32 %v6122_v5, %v6373_v55  ;;  %v2074_v45 = vsub.f32 %v6131_v52, %v6373_v55  ;;  %v2075_v36 = vsub.f32 %v6153_v15, %v6373_v55 }
 0x1fa   : > { %v2077_v4 = vsub.f32 %v6162_v30, %v6373_v55  ;;  %v2078_v2 = vsub.f32 %v6171_v0, %v6373_v55 }
 0x206   : > { %v5205_v57 = vpop.eup %5204 }
 0x207   : > { %v2130_v34 = vmul.f32 %v5205_v57, %v2096_v17  ;;  %v2103_v56 = vmul.f32 %v5205_v57, %v2069_v38  ;;  %v2104_v58 = vmul.f32 %v5205_v57, %v2070_v62  ;;  %v2101_v18 = vmul.f32 %v5205_v57, %v2067_v51 }
 0x208   : > { %v2102_v37 = vmul.f32 %v5205_v57, %v2068_v33  ;;  %v2105_v20 = vmul.f32 %v5205_v57, %v2071_v40  ;;  %v2106_v5 = vmul.f32 %v5205_v57, %v2072_v32  ;;  %v2107_v54 = vmul.f32 %v5205_v57, %v2073_v61 }
 0x209   : > { %v6441_v28 = vmax.f32 %v2130_v34, 0.0  ;;  %v6443_v52 = vmax.f32 %v2103_v56, 0.0  ;;  %v6445_v9 = vmax.f32 %v2104_v58, 0.0  ;;  %v2108_v15 = vmul.f32 %v5205_v57, %v2074_v45 }
 0x20a   : > { %v2109_v48 = vmul.f32 %v5205_v57, %v2075_v36  ;;  %v2110_v30 = vmul.f32 %v5205_v57, %v2076_v7  ;;  %v2111_v8 = vmul.f32 %v5205_v57, %v2077_v4  ;;  %v2112_v42 = vmul.f32 %v5205_v57, %v2078_v2 }
 0x20b   : > { %v2374_v0 = vpack.c.bf16 %v6445_v9, %v6443_v52  ;;  %v2113_v6 = vmul.f32 %v5205_v57, %v2079_v22  ;;  %v2114_v35 = vmul.f32 %v5205_v57, %v2080_v21  ;;  %v2115_v41 = vmul.f32 %v5205_v57, %v2081_v14 }
 0x20c   : > { %v2116_v12 = vmul.f32 %v5205_v57, %v2082_v13  ;;  %v2117_v59 = vmul.f32 %v5205_v57, %v2083_v47  ;;  %v2118_v55 = vmul.f32 %v5205_v57, %v2084_v23  ;;  %v2119_v43 = vmul.f32 %v5205_v57, %v2085_v31 }
 0x20d   : > { %2423 = vrot.lane.b32.xlu1 %v2374_v0, %s5217_s18  ;;  %v2120_v25 = vmul.f32 %v5205_v57, %v2086_v49  ;;  %v2121_v19 = vmul.f32 %v5205_v57, %v2087_v1  ;;  %v2122_v17 = vmul.f32 %v5205_v57, %v2088_v29  ;;  %v2123_v3 = vmul.f32 %v5205_v57, %v2089_v24 }
 0x20e   : > { %v2124_v27 = vmul.f32 %v5205_v57, %v2090_v16  ;;  %v2125_v7 = vmul.f32 %v5205_v57, %v2091_v50  ;;  %v2126_v53 = vmul.f32 %v5205_v57, %v2092_v26  ;;  %v2127_v51 = vmul.f32 %v5205_v57, %v2093_v10 }
 0x20f   : > { %v2128_v46 = vmul.f32 %v5205_v57, %v2094_v39  ;;  %v2129_v33 = vmul.f32 %v5205_v57, %v2095_v63  ;;  %v2131_v60 = vmul.f32 %v5205_v57, %v2097_v44  ;;  %v2132_v22 = vmul.f32 %v5205_v57, %v2098_v11 }
 0x210   : > { %v6450_v21 = vmax.f32 %v2101_v18, 0.0  ;;  %v6452_v14 = vmax.f32 %v2102_v37, 0.0  ;;  %v6454_v13 = vmax.f32 %v2105_v20, 0.0  ;;  %v6456_v47 = vmax.f32 %v2106_v5, 0.0 }
 0x211   : > { %v6458_v23 = vmax.f32 %v2107_v54, 0.0  ;;  %v6460_v31 = vmax.f32 %v2108_v15, 0.0  ;;  %v6462_v49 = vmax.f32 %v2109_v48, 0.0  ;;  %v6464_v1 = vmax.f32 %v2110_v30, 0.0 }
 0x212   : > { %v2373_v29 = vpack.c.bf16 %v6452_v14, %v6450_v21  ;;  %v6468_v24 = vmax.f32 %v2111_v8, 0.0  ;;  %v6470_v16 = vmax.f32 %v2112_v42, 0.0  ;;  %v6472_v50 = vmax.f32 %v2113_v6, 0.0 }
 0x213   : > { %v6474_v26 = vmax.f32 %v2114_v35, 0.0  ;;  %v6476_v10 = vmax.f32 %v2115_v41, 0.0  ;;  %v6478_v39 = vmax.f32 %v2116_v12, 0.0  ;;  %v6480_v63 = vmax.f32 %v2117_v59, 0.0 }
 0x214   : > { %2421 = vrot.lane.b32.xlu0 %v2373_v29, %s5217_s18  ;;  %v6483_v44 = vmax.f32 %v2118_v55, 0.0  ;;  %v6485_v11 = vmax.f32 %v2119_v43, 0.0  ;;  %v6487_v38 = vmax.f32 %v2120_v25, 0.0  ;;  %v6489_v62 = vmax.f32 %v2121_v19, 0.0 }
 0x215   : > { %v6491_v40 = vmax.f32 %v2122_v17, 0.0  ;;  %v6493_v32 = vmax.f32 %v2123_v3, 0.0  ;;  %v6495_v61 = vmax.f32 %v2124_v27, 0.0  ;;  %v6497_v57 = vmax.f32 %v2125_v7, 0.0  ;;  %v6546_v7 = vld [vmem:[%s7974_s2] sm:$0x3f]  }
 0x216   : > { %v6499_v45 = vmax.f32 %v2126_v53, 0.0  ;;  %v6501_v36 = vmax.f32 %v2127_v51, 0.0  ;;  %v6503_v4 = vmax.f32 %v2128_v46, 0.0  ;;  %v6505_v2 = vmax.f32 %v2129_v33, 0.0  ;;  %5057 = vmatprep.subr.msk.bf16.mxu0 %vm1065_vm5, %v6546_v7 }
 0x217   : > { %v6507_v34 = vmax.f32 %v2131_v60, 0.0  ;;  %v6509_v56 = vmax.f32 %v2132_v22, 0.0  ;;  %v2262_v58 = vrot.slane %v6443_v52, 1  ;;  %v2278_v18 = vrot.slane %v6445_v9, 1  ;;  %v5139_v60 = vld [vmem:[#allocation2] sm:$0xff]  }
 0x218   : > { %v2261_v37 = vrot.slane %v6450_v21, 1  ;;  %v2277_v20 = vrot.slane %v6452_v14, 1  ;;  %v2376_v5 = vpack.c.bf16 %v6460_v31, %v6458_v23  ;;  %v2375_v54 = vpack.c.bf16 %v6456_v47, %v6454_v13  ;;  %4987 = vmatprep.mubr.msk.bf16.mxu0 %vm1016_vm6, %v5139_v60 }
 0x219   : > { %v2294_v48 = vsel %vm378_vm1, %v2262_v58, %v2278_v18  ;;  %v2310_v30 = vsel %vm378_vm1, %v2278_v18, %v2262_v58  ;;  %v2264_v8 = vrot.slane %v6458_v23, 1  ;;  %v2280_v42 = vrot.slane %v6460_v31, 1 }
 0x21a   : > { %v2328_v6 = vsel %vm345_vm2, 0.0, %v2310_v30  ;;  %v2293_v35 = vsel %vm378_vm1, %v2261_v37, %v2277_v20  ;;  %v2309_v41 = vsel %vm378_vm1, %v2277_v20, %v2261_v37  ;;  %v2263_v12 = vrot.slane %v6454_v13, 1  ;;  %v6565_v37 = vld [vmem:[%s7974_s2 + $0x10] sm:$0x3f]  }
 0x21b   : > { %v2390_v59 = vpack.c.bf16 %v2328_v6, %v2294_v48  ;;  %v2326_v55 = vsel %vm345_vm2, 0.0, %v2309_v41  ;;  %v2296_v43 = vsel %vm378_vm1, %v2264_v8, %v2280_v42  ;;  %v2312_v25 = vsel %vm378_vm1, %v2280_v42, %v2264_v8  ;;  %5058 = vmatprep.subr.msk.bf16.mxu1 %vm1065_vm5, %v6565_v37 }
 0x21c   : > { %v2389_v19 = vpack.c.bf16 %v2326_v55, %v2293_v35  ;;  %v2332_v17 = vsel %vm345_vm2, 0.0, %v2312_v25  ;;  %v2279_v3 = vrot.slane %v6456_v47, 1  ;;  %v2378_v27 = vpack.c.bf16 %v6470_v16, %v6468_v24 }
 0x21d   : > { %2471 = vrot.lane.b32.xlu1 %v2390_v59, %s5218_s19  ;;  %v2392_v53 = vpack.c.bf16 %v2332_v17, %v2296_v43  ;;  %v2377_v51 = vpack.c.bf16 %v6464_v1, %v6462_v49  ;;  %v2266_v46 = vrot.slane %v6468_v24, 1  ;;  %v2282_v33 = vrot.slane %v6470_v16, 1 }
 0x21e   : > { %2469 = vrot.lane.b32.xlu0 %v2389_v19, %s5218_s19  ;;  %v2295_v22 = vsel %vm378_vm1, %v2263_v12, %v2279_v3  ;;  %v2311_v29 = vsel %vm378_vm1, %v2279_v3, %v2263_v12  ;;  %v2265_v58 = vrot.slane %v6462_v49, 1  ;;  %v2281_v18 = vrot.slane %v6464_v1, 1 }
 0x21f   : > { %v2330_v20 = vsel %vm345_vm2, 0.0, %v2311_v29  ;;  %v6571_v48 = vsel %vm378_vm1, %v2266_v46, %v2282_v33  ;;  %v2314_v30 = vsel %vm378_vm1, %v2282_v33, %v2266_v46  ;;  %v2380_v8 = vpack.c.bf16 %v6478_v39, %v6476_v10 }
 0x220   : > { %v2391_v42 = vpack.c.bf16 %v2330_v20, %v2295_v22  ;;  %v2336_v6 = vsel %vm345_vm2, 0.0, %v2314_v30  ;;  %v2297_v35 = vsel %vm378_vm1, %v2265_v58, %v2281_v18  ;;  %v2313_v41 = vsel %vm378_vm1, %v2281_v18, %v2265_v58 }
 0x221   : > { %2427 = vrot.lane.b32.xlu1 %v2376_v5, %s5217_s18  ;;  %v2394_v12 = vpack.c.bf16 %v2336_v6, %v6571_v48  ;;  %v2334_v59 = vsel %vm345_vm2, 0.0, %v2313_v41  ;;  %v2379_v55 = vpack.c.bf16 %v6474_v26, %v6472_v50  ;;  %v2268_v43 = vrot.slane %v6476_v10, 1 }
 0x222   : > { %2425 = vrot.lane.b32.xlu0 %v2375_v54, %s5217_s18  ;;  %v2393_v25 = vpack.c.bf16 %v2334_v59, %v2297_v35  ;;  %v2284_v19 = vrot.slane %v6478_v39, 1  ;;  %v2267_v17 = vrot.slane %v6472_v50, 1  ;;  %v2283_v3 = vrot.slane %v6474_v26, 1 }
 0x223   : > { %v2270_v33 = vrot.slane %v6485_v11, 1  ;;  %v2286_v60 = vrot.slane %v6487_v38, 1  ;;  %v2269_v41 = vrot.slane %v6480_v63, 1  ;;  %v2276_v46 = vrot.slane %v6507_v34, 1 }
 0x224   : > { %v6605_v54 = vsel %vm378_vm1, %v2268_v43, %v2284_v19  ;;  %v2316_v22 = vsel %vm378_vm1, %v2284_v19, %v2268_v43  ;;  %v6611_v29 = vsel %vm378_vm1, %v2267_v17, %v2283_v3  ;;  %v2315_v58 = vsel %vm378_vm1, %v2283_v3, %v2267_v17 }
 0x225   : > { %2475 = vrot.lane.b32.xlu1 %v2392_v53, %s5218_s19  ;;  %v6618_v18 = vsel %vm345_vm2, 0.0, %v2316_v22  ;;  %v6622_v20 = vsel %vm345_vm2, 0.0, %v2315_v58  ;;  %v6626_v48 = vsel %vm378_vm1, %v2270_v33, %v2286_v60  ;;  %v2318_v30 = vsel %vm378_vm1, %v2286_v60, %v2270_v33 }
 0x226   : > { %2473 = vrot.lane.b32.xlu0 %v2391_v42, %s5218_s19  ;;  %v6637_v35 = vsel %vm345_vm2, 0.0, %v2318_v30  ;;  %v2285_v43 = vrot.slane %v6483_v44, 1  ;;  %v2272_v17 = vrot.slane %v6493_v32, 1  ;;  %v2288_v3 = vrot.slane %v6495_v61, 1 }
 0x227   : > { %v2271_v33 = vrot.slane %v6489_v62, 1  ;;  %v2287_v60 = vrot.slane %v6491_v40, 1  ;;  %v2274_v19 = vrot.slane %v6501_v36, 1  ;;  %v2168_v53 = vrot.slane %v6458_v23, 7 }
 0x228   : > { %v6654_v22 = vsel %vm378_vm1, %v2269_v41, %v2285_v43  ;;  %v2317_v58 = vsel %vm378_vm1, %v2285_v43, %v2269_v41  ;;  %v2320_v59 = vsel %vm378_vm1, %v2288_v3, %v2272_v17  ;;  %v2273_v43 = vrot.slane %v6497_v57, 1 }
 0x229   : > { %2431 = vrot.lane.b32.xlu1 %v2378_v27, %s5217_s18  ;;  %v6665_v42 = vsel %vm345_vm2, 0.0, %v2317_v58  ;;  %v6669_v27 = vsel %vm378_vm1, %v2272_v17, %v2288_v3  ;;  %v6675_v41 = vsel %vm378_vm1, %v2271_v33, %v2287_v60  ;;  %v2319_v58 = vsel %vm378_vm1, %v2287_v60, %v2271_v33 }
 0x22a   : > { %2429 = vrot.lane.b32.xlu0 %v2377_v51, %s5217_s18  ;;  %v6681_v51 = vsel %vm345_vm2, 0.0, %v2320_v59  ;;  %v6690_v17 = vsel %vm345_vm2, 0.0, %v2319_v58  ;;  %v2290_v3 = vrot.slane %v6503_v4, 1  ;;  %v2289_v33 = vrot.slane %v6499_v45, 1 }
 0x22b   : > { %v2292_v59 = vrot.slane %v6509_v56, 1  ;;  %v2275_v60 = vrot.slane %v6505_v2, 1  ;;  %v7996_v23 = vpack.c.bf16 %v6618_v18, %v6605_v54  ;;  %v8011_v15 = vpack.c.bf16 %v6441_v28, %v6505_v2 }
 0x22c   : > { %v6705_v58 = vsel %vm378_vm1, %v2274_v19, %v2290_v3  ;;  %v6717_v30 = vsel %vm378_vm1, %v2273_v43, %v2289_v33 }
 0x22d   : > { %2479 = vrot.lane.b32.xlu1 %v2394_v12, %s5218_s19  ;;  %v2322_v12 = vsel %vm378_vm1, %v2290_v3, %v2274_v19  ;;  %v2324_v6 = vsel %vm378_vm1, %v2292_v59, %v2276_v46  ;;  %v2182_v19 = vrot.slane %v6445_v9, 7 }
 0x22e   : > { %2477 = vrot.lane.b32.xlu0 %v2393_v25, %s5218_s19  ;;  %v6713_v5 = vsel %vm345_vm2, 0.0, %v2322_v12  ;;  %v2321_v25 = vsel %vm378_vm1, %v2289_v33, %v2273_v43  ;;  %v6730_v12 = vsel %vm378_vm1, %v2276_v46, %v2292_v59  ;;  %v6742_v33 = vsel %vm345_vm2, 0.0, %v2324_v6 }
 0x22f   : > { %v6726_v3 = vsel %vm345_vm2, 0.0, %v2321_v25  ;;  %v2291_v25 = vrot.slane %v6441_v28, 1  ;;  %v2181_v59 = vrot.slane %v6452_v14, 7  ;;  %v2165_v43 = vrot.slane %v6450_v21, 7 }
 0x231   : > { %2435 = vrot.lane.b32.xlu1 %v2380_v8, %s5217_s18  ;;  %v2166_v8 = vrot.slane %v6443_v52, 7  ;;  %v6757_v6 = vsel %vm378_vm1, %v2275_v60, %v2291_v25  ;;  %v2323_v9 = vsel %vm378_vm1, %v2291_v25, %v2275_v60  ;;  %v6775_v14 = vsel %vm279_vm3, %v2165_v43, %v2181_v59 }
 0x232   : > { %2433 = vrot.lane.b32.xlu0 %v2379_v55, %s5217_s18  ;;  %v2184_v55 = vrot.slane %v6460_v31, 7  ;;  %v6765_v46 = vsel %vm345_vm2, 0.0, %v2323_v9  ;;  %v2213_v60 = vsel %vm279_vm3, %v2181_v59, %v2165_v43  ;;  %v7997_v25 = vpack.c.bf16 %v6622_v20, %v6611_v29 }
 0x233   : > { %v6769_v52 = vsel %vm279_vm3, %v2166_v8, %v2182_v19  ;;  %v2214_v21 = vsel %vm279_vm3, %v2182_v19, %v2166_v8  ;;  %v2403_v31 = vpack.c.bf16 %v6765_v46, %v6757_v6  ;;  %v6801_v18 = vsel %vm245_vm4, 0.0, %v2213_v60 }
 0x234   : > { %v6785_v0 = vsel %vm245_vm4, 0.0, %v2214_v21  ;;  %v6791_v19 = vsel %vm279_vm3, %v2168_v53, %v2184_v55  ;;  %v2216_v8 = vsel %vm279_vm3, %v2184_v55, %v2168_v53  ;;  %v2167_v43 = vrot.slane %v6454_v13, 7 }
 0x235   : > { %2483 = vrot.lane.b32.xlu1 %v7996_v23, %s5218_s19  ;;  %v2358_v54 = vpack.c.bf16 %v6769_v52, %v6785_v0  ;;  %v2357_v59 = vpack.c.bf16 %v6775_v14, %v6801_v18  ;;  %v6810_v9 = vsel %vm245_vm4, 0.0, %v2216_v8  ;;  %v2183_v29 = vrot.slane %v6456_v47, 7 }
 0x236   : > { %2481 = vrot.lane.b32.xlu0 %v7997_v25, %s5218_s19  ;;  %v3225_v20 = vsel %vm1065_vm5, %v6546_v7, 0  ;;  %v2360_v21 = vpack.c.bf16 %v6791_v19, %v6810_v9  ;;  %v2170_v53 = vrot.slane %v6468_v24, 7  ;;  %v2186_v13 = vrot.slane %v6470_v16, 7 }
 0x237   : > { %4986 = vmatpush3.bf16.msra.mxu0 %v3225_v20  ;;  %v2169_v55 = vrot.slane %v6462_v49, 7  ;;  %v7998_v23 = vpack.c.bf16 %v6487_v38, %v6485_v11  ;;  %v6826_v47 = vsel %vm279_vm3, %v2167_v43, %v2183_v29  ;;  %v2215_v7 = vsel %vm279_vm3, %v2183_v29, %v2167_v43 }
 0x238   : > { %v2185_v60 = vrot.slane %v6464_v1, 7  ;;  %v7999_v24 = vpack.c.bf16 %v6483_v44, %v6480_v63  ;;  %v6837_v49 = vsel %vm245_vm4, 0.0, %v2215_v7  ;;  %v6841_v16 = vsel %vm279_vm3, %v2170_v53, %v2186_v13 }
 0x239   : > { %2439 = vrot.lane.b32.xlu1 %v7998_v23, %s5217_s18  ;;  %v2218_v25 = vsel %vm279_vm3, %v2186_v13, %v2170_v53  ;;  %v2172_v8 = vrot.slane %v6476_v10, 7  ;;  %v2359_v1 = vpack.c.bf16 %v6826_v47, %v6837_v49  ;;  %v2188_v53 = vrot.slane %v6478_v39, 7 }
 0x23a   : > { %2437 = vrot.lane.b32.xlu0 %v7999_v24, %s5217_s18  ;;  %v6850_v43 = vsel %vm245_vm4, 0.0, %v2218_v25  ;;  %v6854_v29 = vsel %vm279_vm3, %v2169_v55, %v2185_v60  ;;  %v2217_v20 = vsel %vm279_vm3, %v2185_v60, %v2169_v55  ;;  %v2171_v13 = vrot.slane %v6472_v50, 7 }
 0x23b   : > { %v2362_v23 = vpack.c.bf16 %v6841_v16, %v6850_v43  ;;  %v6862_v10 = vsel %vm245_vm4, 0.0, %v2217_v20  ;;  %v8000_v7 = vpack.c.bf16 %v6637_v35, %v6626_v48  ;;  %v2187_v55 = vrot.slane %v6474_v26, 7 }
 0x23c   : > { %v2361_v24 = vpack.c.bf16 %v6854_v29, %v6862_v10  ;;  %v2174_v60 = vrot.slane %v6485_v11, 7  ;;  %v2190_v25 = vrot.slane %v6487_v38, 7  ;;  %v8001_v39 = vpack.c.bf16 %v6665_v42, %v6654_v22 }
 0x23d   : > { %2487 = vrot.lane.b32.xlu1 %v8000_v7, %s5218_s19  ;;  %v6881_v50 = vsel %vm279_vm3, %v2172_v8, %v2188_v53  ;;  %v2220_v48 = vsel %vm279_vm3, %v2188_v53, %v2172_v8  ;;  %v2173_v35 = vrot.slane %v6480_v63, 7  ;;  %v2189_v26 = vrot.slane %v6483_v44, 7 }
 0x23e   : > { %2485 = vrot.lane.b32.xlu0 %v8001_v39, %s5218_s19  ;;  %v6889_v11 = vsel %vm245_vm4, 0.0, %v2220_v48  ;;  %v6893_v38 = vsel %vm279_vm3, %v2171_v13, %v2187_v55  ;;  %v2219_v42 = vsel %vm279_vm3, %v2187_v55, %v2171_v13  ;;  %v6899_v22 = vsel %vm279_vm3, %v2174_v60, %v2190_v25 }
 0x23f   : > { %v2364_v63 = vpack.c.bf16 %v6881_v50, %v6889_v11  ;;  %v6905_v44 = vsel %vm245_vm4, 0.0, %v2219_v42  ;;  %v2222_v8 = vsel %vm279_vm3, %v2190_v25, %v2174_v60  ;;  %v6911_v20 = vsel %vm279_vm3, %v2173_v35, %v2189_v26 }
 0x240   : > { %v8002_v53 = vpack.c.bf16 %v6495_v61, %v6493_v32  ;;  %v2363_v13 = vpack.c.bf16 %v6893_v38, %v6905_v44  ;;  %v6921_v7 = vsel %vm245_vm4, 0.0, %v2222_v8  ;;  %v2221_v55 = vsel %vm279_vm3, %v2189_v26, %v2173_v35 }
 0x241   : > { %v2176_v60 = vrot.slane %v6493_v32, 7  ;;  %v8003_v25 = vpack.c.bf16 %v6491_v40, %v6489_v62  ;;  %v6934_v48 = vsel %vm245_vm4, 0.0, %v2221_v55  ;;  %v2192_v42 = vrot.slane %v6495_v61, 7 }
 0x242   : > { %2443 = vrot.lane.b32.xlu1 %v8002_v53, %s5217_s18  ;;  %v2175_v8 = vrot.slane %v6489_v62, 7  ;;  %v2191_v32 = vrot.slane %v6491_v40, 7  ;;  %v2178_v26 = vrot.slane %v6501_v36, 7  ;;  %v2194_v53 = vrot.slane %v6503_v4, 7 }
 0x243   : > { %2441 = vrot.lane.b32.xlu0 %v8003_v25, %s5217_s18  ;;  %v6945_v25 = vsel %vm279_vm3, %v2176_v60, %v2192_v42  ;;  %v2224_v55 = vsel %vm279_vm3, %v2192_v42, %v2176_v60  ;;  %v2177_v61 = vrot.slane %v6497_v57, 7  ;;  %v2193_v62 = vrot.slane %v6499_v45, 7 }
 0x244   : > { %v8004_v35 = vpack.c.bf16 %v6681_v51, %v6669_v27  ;;  %v6957_v40 = vsel %vm245_vm4, 0.0, %v2224_v55  ;;  %v6961_v39 = vsel %vm279_vm3, %v2175_v8, %v2191_v32  ;;  %v2223_v60 = vsel %vm279_vm3, %v2191_v32, %v2175_v8 }
 0x245   : > { %v6967_v42 = vsel %vm279_vm3, %v2178_v26, %v2194_v53  ;;  %v8005_v27 = vpack.c.bf16 %v6690_v17, %v6675_v41  ;;  %v2226_v55 = vsel %vm279_vm3, %v2194_v53, %v2178_v26  ;;  %v6983_v8 = vsel %vm279_vm3, %v2177_v61, %v2193_v62 }
 0x246   : > { %2491 = vrot.lane.b32.xlu1 %v8004_v35, %s5218_s19  ;;  %v6977_v35 = vsel %vm245_vm4, 0.0, %v2223_v60  ;;  %v6989_v41 = vsel %vm245_vm4, 0.0, %v2226_v55  ;;  %v2225_v17 = vsel %vm279_vm3, %v2193_v62, %v2177_v61  ;;  %v2180_v60 = vrot.slane %v6507_v34, 7 }
 0x247   : > { %2489 = vrot.lane.b32.xlu0 %v8005_v27, %s5218_s19  ;;  %v6998_v26 = vsel %vm245_vm4, 0.0, %v2225_v17  ;;  %v2196_v53 = vrot.slane %v6509_v56, 7  ;;  %v2179_v32 = vrot.slane %v6505_v2, 7  ;;  %v8006_v55 = vpack.c.bf16 %v6503_v4, %v6501_v36 }
 0x248   : > { %v2369_v61 = vpack.c.bf16 %v6983_v8, %v6998_v26  ;;  %v2195_v62 = vrot.slane %v6441_v28, 7  ;;  %v8007_v27 = vpack.c.bf16 %v6499_v45, %v6497_v57  ;;  %v3557_v49 = vsel %vm1065_vm5, %v6565_v37, 0 }
 0x249   : > { %v7015_v17 = vsel %vm279_vm3, %v2180_v60, %v2196_v53  ;;  %v2228_v51 = vsel %vm279_vm3, %v2196_v53, %v2180_v60  ;;  %v8008_v60 = vpack.c.bf16 %v6713_v5, %v6705_v58  ;;  %v8012_v5 = vpack.c.bf16 %v6742_v33, %v6730_v12 }
 0x24a   : > { %2447 = vrot.lane.b32.xlu1 %v8006_v55, %s5217_s18  ;;  %v7021_v36 = vsel %vm245_vm4, 0.0, %v2228_v51  ;;  %v7025_v4 = vsel %vm279_vm3, %v2179_v32, %v2195_v62  ;;  %v2227_v55 = vsel %vm279_vm3, %v2195_v62, %v2179_v32  ;;  %v8010_v32 = vpack.c.bf16 %v6509_v56, %v6507_v34 }
 0x24b   : > { %2445 = vrot.lane.b32.xlu0 %v8007_v27, %s5217_s18  ;;  %v2372_v57 = vpack.c.bf16 %v7015_v17, %v7021_v36  ;;  %v7033_v45 = vsel %vm245_vm4, 0.0, %v2227_v55  ;;  %v8009_v27 = vpack.c.bf16 %v6726_v3, %v6717_v30 }
 0x24c   : > { %v2371_v51 = vpack.c.bf16 %v7025_v4, %v7033_v45 }
 0x24e   : > { %2495 = vrot.lane.b32.xlu1 %v8008_v60, %s5218_s19 }
 0x24f   : > { %2493 = vrot.lane.b32.xlu0 %v8009_v27, %s5218_s19 }
 0x252   : > { %2451 = vrot.lane.b32.xlu1 %v8010_v32, %s5217_s18 }
 0x253   : > { %2449 = vrot.lane.b32.xlu0 %v8011_v15, %s5217_s18 }
 0x256   : > { %2499 = vrot.lane.b32.xlu1 %v8012_v5, %s5218_s19 }
 0x257   : > { %2497 = vrot.lane.b32.xlu0 %v2403_v31, %s5218_s19 }
 0x27f   : > { %v2424_v30 = vpop.permute.xlu1 %2423 }
 0x280   : > { %v2506_v34 = vsel %vm635_vm7, %v2358_v54, %v2424_v30 }
 0x286   : > { %v2422_v58 = vpop.permute.xlu0 %2421 }
 0x287   : > { %v2503_v28 = vsel %vm635_vm7, %v2357_v59, %v2422_v58 }
 0x28f   : > { %v2472_v56 = vpop.permute.xlu1 %2471 }
 0x290   : > { %v2552_v2 = vsel %vm684_vm8, %v2506_v34, %v2472_v56  ;;  %v2470_v3 = vpop.permute.xlu0 %2469 }
 0x291   : > { %v4467_v12 = vcombine.low %v2552_v2, %v2552_v2  ;;  %v4468_v33 = vcombine.high %v2552_v2, %v2552_v2  ;;  %v2550_v46 = vsel %vm684_vm8, %v2503_v28, %v2470_v3 }
 0x292   : > { %v4465_v6 = vcombine.low %v2550_v46, %v2550_v46  ;;  %v4466_v31 = vcombine.high %v2550_v46, %v2550_v46 }
 0x293   : > { %2695 = vst.msk [vmem:[#allocation2 + $0x10] sm:$0xf] %vm172_vm0, %v4467_v12  ;;  %2696 = vst.msk [vmem:[#allocation2 + $0x14] sm:$0xf] %vm172_vm0, %v4468_v33  ;;  %v2428_v52 = vpop.permute.xlu1 %2427 }
 0x294   : > { %2693 = vst.msk [vmem:[#allocation2 + $0x8] sm:$0xf] %vm172_vm0, %v4465_v6  ;;  %2694 = vst.msk [vmem:[#allocation2 + $0xc] sm:$0xf] %vm172_vm0, %v4466_v31  ;;  %v2426_v14 = vpop.permute.xlu0 %2425  ;;  %v2512_v0 = vsel %vm635_vm7, %v2360_v21, %v2428_v52 }
 0x295   : > { %v2509_v18 = vsel %vm635_vm7, %v2359_v1, %v2426_v14 }
 0x297   : > { %v2476_v54 = vpop.permute.xlu1 %2475 }
 0x298   : > { %v2556_v59 = vsel %vm684_vm8, %v2512_v0, %v2476_v54  ;;  %v2474_v53 = vpop.permute.xlu0 %2473 }
 0x299   : > { %v4471_v62 = vcombine.low %v2556_v59, %v2556_v59  ;;  %v4472_v55 = vcombine.high %v2556_v59, %v2556_v59  ;;  %v2554_v60 = vsel %vm684_vm8, %v2509_v18, %v2474_v53  ;;  %v8013_v53 = vpack.c.bf16 %v6899_v22, %v6921_v7 }
 0x29a   : > { %v4469_v27 = vcombine.low %v2554_v60, %v2554_v60  ;;  %v4470_v32 = vcombine.high %v2554_v60, %v2554_v60  ;;  %v5143_v15 = vld [vmem:[#allocation2 + $0x10] sm:$0xff]   ;;  %v8014_v60 = vpack.c.bf16 %v6911_v20, %v6934_v48 }
 0x29b   : > { %2699 = vst.msk [vmem:[#allocation2 + $0x20] sm:$0xf] %vm172_vm0, %v4471_v62  ;;  %2700 = vst.msk [vmem:[#allocation2 + $0x24] sm:$0xf] %vm172_vm0, %v4472_v55  ;;  %v2432_v19 = vpop.permute.xlu1 %2431  ;;  %v5140_v9 = vld [vmem:[#allocation2 + $0x8] sm:$0xff]   ;;  %v5144_v1 = vld [vmem:[#allocation2 + $0x10] sm:$0xff]  }
 0x29c   : > { %2697 = vst.msk [vmem:[#allocation2 + $0x18] sm:$0xf] %vm172_vm0, %v4469_v27  ;;  %2698 = vst.msk [vmem:[#allocation2 + $0x1c] sm:$0xf] %vm172_vm0, %v4470_v32  ;;  %v2430_v21 = vpop.permute.xlu0 %2429  ;;  %v5141_v47 = vld [vmem:[#allocation2 + $0x8] sm:$0xff]   ;;  %4953 = vmatprep.mubr.msk.bf16.mxu1 %vm1016_vm6, %v5140_v9  ;;  %v2518_v5 = vsel %vm635_vm7, %v2362_v23, %v2432_v19 }
 0x29d   : > { %4988 = vmatmul.mubr.msk.bf16.vlgmr.msra.gmra.mxu0 %vm1016_vm6, %v5141_v47  ;;  %4954 = vmatmul.mubr.msk.bf16.vlgmr.msra.gmra.mxu1 %vm1016_vm6, %v5143_v15  ;;  %v2515_v37 = vsel %vm635_vm7, %v2361_v24, %v2430_v21 }
 0x29e   : > { %4991 = vmatprep.mubr.msk.bf16.mxu0 %vm1016_vm6, %v5144_v1  ;;  %5020 = vmatpush3.bf16.msra.mxu1 %v3557_v49 }
 0x29f   : > { %v2480_v30 = vpop.permute.xlu1 %2479 }
 0x2a0   : > { %v2560_v58 = vsel %vm684_vm8, %v2518_v5, %v2480_v30  ;;  %v2478_v34 = vpop.permute.xlu0 %2477  ;;  %v8015_v30 = vpack.c.bf16 %v6945_v25, %v6957_v40 }
 0x2a1   : > { %v4475_v56 = vcombine.low %v2560_v58, %v2560_v58  ;;  %v4476_v28 = vcombine.high %v2560_v58, %v2560_v58  ;;  %v2558_v2 = vsel %vm684_vm8, %v2515_v37, %v2478_v34  ;;  %v8016_v34 = vpack.c.bf16 %v6961_v39, %v6977_v35 }
 0x2a2   : > { %v4473_v3 = vcombine.low %v2558_v2, %v2558_v2  ;;  %v4474_v16 = vcombine.high %v2558_v2, %v2558_v2  ;;  %v5147_v43 = vld [vmem:[#allocation2 + $0x20] sm:$0xff]  }
 0x2a3   : > { %2703 = vst.msk [vmem:[#allocation2 + $0x30] sm:$0xf] %vm172_vm0, %v4475_v56  ;;  %2704 = vst.msk [vmem:[#allocation2 + $0x34] sm:$0xf] %vm172_vm0, %v4476_v28  ;;  %v2436_v23 = vpop.permute.xlu1 %2435  ;;  %v5145_v12 = vld [vmem:[#allocation2 + $0x18] sm:$0xff]   ;;  %v5148_v24 = vld [vmem:[#allocation2 + $0x20] sm:$0xff]  }
 0x2a4   : > { %2701 = vst.msk [vmem:[#allocation2 + $0x28] sm:$0xf] %vm172_vm0, %v4473_v3  ;;  %2702 = vst.msk [vmem:[#allocation2 + $0x2c] sm:$0xf] %vm172_vm0, %v4474_v16  ;;  %v2434_v29 = vpop.permute.xlu0 %2433  ;;  %v5146_v10 = vld [vmem:[#allocation2 + $0x18] sm:$0xff]   ;;  %4957 = vmatprep.mubr.msk.bf16.mxu1 %vm1016_vm6, %v5145_v12  ;;  %v2524_v33 = vsel %vm635_vm7, %v2364_v63, %v2436_v23 }
 0x2a5   : > { %4992 = vmatmul.mubr.msk.bf16.gmra.mxu0 %vm1016_vm6, %v5146_v10  ;;  %4958 = vmatmul.mubr.msk.bf16.gmra.mxu1 %vm1016_vm6, %v5147_v43  ;;  %v2521_v6 = vsel %vm635_vm7, %v2363_v13, %v2434_v29 }
 0x2a6   : > { %4995 = vmatprep.mubr.msk.bf16.mxu0 %vm1016_vm6, %v5148_v24  ;;  %v8017_v24 = vpack.c.bf16 %v6967_v42, %v6989_v41 }
 0x2a7   : > { %v2484_v46 = vpop.permute.xlu1 %2483 }
 0x2a8   : > { %v2564_v31 = vsel %vm684_vm8, %v2524_v33, %v2484_v46  ;;  %v2482_v52 = vpop.permute.xlu0 %2481 }
 0x2a9   : > { %v4479_v14 = vcombine.low %v2564_v31, %v2564_v31  ;;  %v4480_v0 = vcombine.high %v2564_v31, %v2564_v31  ;;  %v2562_v54 = vsel %vm684_vm8, %v2521_v6, %v2482_v52 }
 0x2aa   : > { %v4477_v18 = vcombine.low %v2562_v54, %v2562_v54  ;;  %v4478_v59 = vcombine.high %v2562_v54, %v2562_v54  ;;  %v5151_v50 = vld [vmem:[#allocation2 + $0x30] sm:$0xff]  }
 0x2ab   : > { %2707 = vst.msk [vmem:[#allocation2 + $0x40] sm:$0xf] %vm172_vm0, %v4479_v14  ;;  %2708 = vst.msk [vmem:[#allocation2 + $0x44] sm:$0xf] %vm172_vm0, %v4480_v0  ;;  %v2440_v11 = vpop.permute.xlu1 %2439  ;;  %v5149_v63 = vld [vmem:[#allocation2 + $0x28] sm:$0xff]   ;;  %v5152_v13 = vld [vmem:[#allocation2 + $0x30] sm:$0xff]  }
 0x2ac   : > { %2705 = vst.msk [vmem:[#allocation2 + $0x38] sm:$0xf] %vm172_vm0, %v4477_v18  ;;  %2706 = vst.msk [vmem:[#allocation2 + $0x3c] sm:$0xf] %vm172_vm0, %v4478_v59  ;;  %v2438_v38 = vpop.permute.xlu0 %2437  ;;  %v5150_v44 = vld [vmem:[#allocation2 + $0x28] sm:$0xff]   ;;  %4961 = vmatprep.mubr.msk.bf16.mxu1 %vm1016_vm6, %v5149_v63  ;;  %v2530_v62 = vsel %vm635_vm7, %v8013_v53, %v2440_v11 }
 0x2ad   : > { %4996 = vmatmul.mubr.msk.bf16.gmra.mxu0 %vm1016_vm6, %v5150_v44  ;;  %4962 = vmatmul.mubr.msk.bf16.gmra.mxu1 %vm1016_vm6, %v5151_v50  ;;  %v2527_v27 = vsel %vm635_vm7, %v8014_v60, %v2438_v38 }
 0x2ae   : > { %4999 = vmatprep.mubr.msk.bf16.mxu0 %vm1016_vm6, %v5152_v13 }
 0x2af   : > { %v2488_v55 = vpop.permute.xlu1 %2487 }
 0x2b0   : > { %v2568_v32 = vsel %vm684_vm8, %v2530_v62, %v2488_v55  ;;  %v2486_v15 = vpop.permute.xlu0 %2485 }
 0x2b1   : > { %v4483_v19 = vcombine.low %v2568_v32, %v2568_v32  ;;  %v4484_v9 = vcombine.high %v2568_v32, %v2568_v32  ;;  %v2566_v21 = vsel %vm684_vm8, %v2527_v27, %v2486_v15  ;;  %v5172_v15 = vld [vmem:[#allocation2 + $0x10] sm:$0xff]  }
 0x2b2   : > { %v4481_v47 = vcombine.low %v2566_v21, %v2566_v21  ;;  %v4482_v49 = vcombine.high %v2566_v21, %v2566_v21  ;;  %v5155_v22 = vld [vmem:[#allocation2 + $0x40] sm:$0xff]   ;;  %v5175_v21 = vld [vmem:[#allocation2 + $0x28] sm:$0xff]  }
 0x2b3   : > { %2711 = vst.msk [vmem:[#allocation2 + $0x50] sm:$0xf] %vm172_vm0, %v4483_v19  ;;  %2712 = vst.msk [vmem:[#allocation2 + $0x54] sm:$0xf] %vm172_vm0, %v4484_v9  ;;  %v5153_v1 = vld [vmem:[#allocation2 + $0x38] sm:$0xff]   ;;  %v5156_v5 = vld [vmem:[#allocation2 + $0x40] sm:$0xff]  }
 0x2b4   : > { %v2444_v7 = vpop.permute.xlu1 %2443  ;;  %2709 = vst.msk [vmem:[#allocation2 + $0x48] sm:$0xf] %vm172_vm0, %v4481_v47  ;;  %2710 = vst.msk [vmem:[#allocation2 + $0x4c] sm:$0xf] %vm172_vm0, %v4482_v49  ;;  %v5154_v48 = vld [vmem:[#allocation2 + $0x38] sm:$0xff]   ;;  %4965 = vmatprep.mubr.msk.bf16.mxu1 %vm1016_vm6, %v5153_v1  ;;  %v5174_v9 = vld [vmem:[#allocation2 + $0x20] sm:$0xff]  }
 0x2b5   : > { %v2442_v20 = vpop.permute.xlu0 %2441  ;;  %5000 = vmatmul.mubr.msk.bf16.gmra.mxu0 %vm1016_vm6, %v5154_v48  ;;  %4966 = vmatmul.mubr.msk.bf16.gmra.mxu1 %vm1016_vm6, %v5155_v22  ;;  %v2536_v37 = vsel %vm635_vm7, %v8015_v30, %v2444_v7  ;;  %v5173_v19 = vld [vmem:[#allocation2 + $0x18] sm:$0xff]   ;;  %v5176_v47 = vld [vmem:[#allocation2 + $0x30] sm:$0xff]   ;;  %v5178_v22 = vld [vmem:[#allocation2 + $0x40] sm:$0xff]  }
 0x2b6   : > { %5003 = vmatprep.mubr.msk.bf16.mxu0 %vm1016_vm6, %v5156_v5  ;;  %v2533_v56 = vsel %vm635_vm7, %v8016_v34, %v2442_v20  ;;  %v5177_v49 = vld [vmem:[#allocation2 + $0x38] sm:$0xff]   ;;  %v5187_v34 = vld [vmem:[#allocation2 + $0x88] sm:$0xff]  }
 0x2b8   : > { %v2492_v58 = vpop.permute.xlu1 %2491 }
 0x2b9   : > { %v2572_v28 = vsel %vm684_vm8, %v2536_v37, %v2492_v58  ;;  %v2490_v2 = vpop.permute.xlu0 %2489 }
 0x2ba   : > { %v4487_v3 = vcombine.low %v2572_v28, %v2572_v28  ;;  %v4488_v16 = vcombine.high %v2572_v28, %v2572_v28  ;;  %v2570_v43 = vsel %vm684_vm8, %v2533_v56, %v2490_v2  ;;  %v5159_v25 = vld [vmem:[#allocation2 + $0x50] sm:$0xff]  }
 0x2bb   : > { %v4485_v23 = vcombine.low %v2570_v43, %v2570_v43  ;;  %v4486_v12 = vcombine.high %v2570_v43, %v2570_v43  ;;  %v5157_v29 = vld [vmem:[#allocation2 + $0x48] sm:$0xff]   ;;  %v5160_v10 = vld [vmem:[#allocation2 + $0x50] sm:$0xff]  }
 0x2bc   : > { %2715 = vst.msk [vmem:[#allocation2 + $0x60] sm:$0xf] %vm172_vm0, %v4487_v3  ;;  %2716 = vst.msk [vmem:[#allocation2 + $0x64] sm:$0xf] %vm172_vm0, %v4488_v16  ;;  %v2448_v40 = vpop.permute.xlu1 %2447  ;;  %v5158_v35 = vld [vmem:[#allocation2 + $0x48] sm:$0xff]   ;;  %4969 = vmatprep.mubr.msk.bf16.mxu1 %vm1016_vm6, %v5157_v29  ;;  %v5180_v1 = vld [vmem:[#allocation2 + $0x50] sm:$0xff]  }
 0x2bd   : > { %2713 = vst.msk [vmem:[#allocation2 + $0x58] sm:$0xf] %vm172_vm0, %v4485_v23  ;;  %2714 = vst.msk [vmem:[#allocation2 + $0x5c] sm:$0xf] %vm172_vm0, %v4486_v12  ;;  %v2446_v39 = vpop.permute.xlu0 %2445  ;;  %5004 = vmatmul.mubr.msk.bf16.gmra.mxu0 %vm1016_vm6, %v5158_v35  ;;  %4970 = vmatmul.mubr.msk.bf16.gmra.mxu1 %vm1016_vm6, %v5159_v25  ;;  %v2542_v33 = vsel %vm635_vm7, %v8017_v24, %v2448_v40  ;;  %v5179_v7 = vld [vmem:[#allocation2 + $0x48] sm:$0xff]  }
 0x2be   : > { %5007 = vmatprep.mubr.msk.bf16.mxu0 %vm1016_vm6, %v5160_v10  ;;  %v2539_v6 = vsel %vm635_vm7, %v2369_v61, %v2446_v39 }
 0x2c0   : > { %v2496_v46 = vpop.permute.xlu1 %2495 }
 0x2c1   : > { %v2576_v31 = vsel %vm684_vm8, %v2542_v33, %v2496_v46  ;;  %v2494_v52 = vpop.permute.xlu0 %2493 }
 0x2c2   : > { %v4491_v14 = vcombine.low %v2576_v31, %v2576_v31  ;;  %v4492_v0 = vcombine.high %v2576_v31, %v2576_v31  ;;  %v2574_v54 = vsel %vm684_vm8, %v2539_v6, %v2494_v52 }
 0x2c3   : > { %v4489_v18 = vcombine.low %v2574_v54, %v2574_v54  ;;  %v4490_v59 = vcombine.high %v2574_v54, %v2574_v54  ;;  %v5163_v42 = vld [vmem:[#allocation2 + $0x60] sm:$0xff]  }
 0x2c4   : > { %2719 = vst.msk [vmem:[#allocation2 + $0x70] sm:$0xf] %vm172_vm0, %v4491_v14  ;;  %2720 = vst.msk [vmem:[#allocation2 + $0x74] sm:$0xf] %vm172_vm0, %v4492_v0  ;;  %v2452_v41 = vpop.permute.xlu1 %2451  ;;  %v5161_v50 = vld [vmem:[#allocation2 + $0x58] sm:$0xff]   ;;  %v5164_v61 = vld [vmem:[#allocation2 + $0x60] sm:$0xff]  }
 0x2c5   : > { %2717 = vst.msk [vmem:[#allocation2 + $0x68] sm:$0xf] %vm172_vm0, %v4489_v18  ;;  %2718 = vst.msk [vmem:[#allocation2 + $0x6c] sm:$0xf] %vm172_vm0, %v4490_v59  ;;  %v2450_v8 = vpop.permute.xlu0 %2449  ;;  %v5162_v26 = vld [vmem:[#allocation2 + $0x58] sm:$0xff]   ;;  %4973 = vmatprep.mubr.msk.bf16.mxu1 %vm1016_vm6, %v5161_v50  ;;  %v2548_v11 = vsel %vm635_vm7, %v2372_v57, %v2452_v41  ;;  %v5182_v48 = vld [vmem:[#allocation2 + $0x60] sm:$0xff]  }
 0x2c6   : > { %5008 = vmatmul.mubr.msk.bf16.gmra.mxu0 %vm1016_vm6, %v5162_v26  ;;  %4974 = vmatmul.mubr.msk.bf16.gmra.mxu1 %vm1016_vm6, %v5163_v42  ;;  %v2545_v38 = vsel %vm635_vm7, %v2371_v51, %v2450_v8  ;;  %v5181_v20 = vld [vmem:[#allocation2 + $0x58] sm:$0xff]  }
 0x2c7   : > { %5011 = vmatprep.mubr.msk.bf16.mxu0 %vm1016_vm6, %v5164_v61 }
 0x2c8   : > { %v2500_v63 = vpop.permute.xlu1 %2499 }
 0x2c9   : > { %v2580_v44 = vsel %vm684_vm8, %v2548_v11, %v2500_v63  ;;  %v2498_v13 = vpop.permute.xlu0 %2497 }
 0x2ca   : > { %v4495_v53 = vcombine.low %v2580_v44, %v2580_v44  ;;  %v4496_v62 = vcombine.high %v2580_v44, %v2580_v44  ;;  %v2578_v55 = vsel %vm684_vm8, %v2545_v38, %v2498_v13 }
 0x2cb   : > { %v4493_v60 = vcombine.low %v2578_v55, %v2578_v55  ;;  %v4494_v27 = vcombine.high %v2578_v55, %v2578_v55  ;;  %v5167_v17 = vld [vmem:[#allocation2 + $0x70] sm:$0xff]  }
 0x2cc   : > { %2723 = vst.msk [vmem:[#allocation2 + $0x80] sm:$0xf] %vm172_vm0, %v4495_v53  ;;  %2724 = vst.msk [vmem:[#allocation2 + $0x84] sm:$0xf] %vm172_vm0, %v4496_v62  ;;  %v5165_v36 = vld [vmem:[#allocation2 + $0x68] sm:$0xff]   ;;  %v5168_v57 = vld [vmem:[#allocation2 + $0x70] sm:$0xff]  }
 0x2cd   : > { %2721 = vst.msk [vmem:[#allocation2 + $0x78] sm:$0xf] %vm172_vm0, %v4493_v60  ;;  %2722 = vst.msk [vmem:[#allocation2 + $0x7c] sm:$0xf] %vm172_vm0, %v4494_v27  ;;  %v5166_v4 = vld [vmem:[#allocation2 + $0x68] sm:$0xff]   ;;  %4977 = vmatprep.mubr.msk.bf16.mxu1 %vm1016_vm6, %v5165_v36  ;;  %v5184_v30 = vld [vmem:[#allocation2 + $0x70] sm:$0xff]  }
 0x2ce   : > { %5012 = vmatmul.mubr.msk.bf16.gmra.mxu0 %vm1016_vm6, %v5166_v4  ;;  %4978 = vmatmul.mubr.msk.bf16.gmra.mxu1 %vm1016_vm6, %v5167_v17  ;;  %v5183_v5 = vld [vmem:[#allocation2 + $0x68] sm:$0xff]  }
 0x2cf   : > { %5015 = vmatprep.mubr.msk.bf16.mxu0 %vm1016_vm6, %v5168_v57 }
 0x2d3   : > { %v5171_v45 = vld [vmem:[#allocation2 + $0x80] sm:$0xff]  }
 0x2d4   : > { %v5169_v51 = vld [vmem:[#allocation2 + $0x78] sm:$0xff]   ;;  %v5186_v58 = vld [vmem:[#allocation2 + $0x80] sm:$0xff]  }
 0x2d5   : > { %v5170_v32 = vld [vmem:[#allocation2 + $0x78] sm:$0xff]   ;;  %4981 = vmatprep.mubr.msk.bf16.mxu1 %vm1016_vm6, %v5169_v51 }
 0x2d6   : > { %5016 = vmatmul.mubr.msk.bf16.gmra.mxu0 %vm1016_vm6, %v5170_v32  ;;  %4982 = vmatmul.mubr.msk.bf16.gmra.mxu1 %vm1016_vm6, %v5171_v45  ;;  %v5185_v37 = vld [vmem:[#allocation2 + $0x78] sm:$0xff]  }
 0x2d7   : > { %5021 = vmatprep.mubr.msk.bf16.mxu1 %vm1016_vm6, %v5172_v15 }
 0x2de   : > { %5022 = vmatmul.mubr.msk.bf16.vlgmr.msra.gmra.mxu1 %vm1016_vm6, %v5173_v19 }
 0x2df   : > { %5025 = vmatprep.mubr.msk.bf16.mxu1 %vm1016_vm6, %v5174_v9 }
 0x2e6   : > { %5026 = vmatmul.mubr.msk.bf16.gmra.mxu1 %vm1016_vm6, %v5175_v21 }
 0x2e7   : > { %5029 = vmatprep.mubr.msk.bf16.mxu1 %vm1016_vm6, %v5176_v47 }
 0x2ee   : > { %5030 = vmatmul.mubr.msk.bf16.gmra.mxu1 %vm1016_vm6, %v5177_v49 }
 0x2ef   : > { %5033 = vmatprep.mubr.msk.bf16.mxu1 %vm1016_vm6, %v5178_v22 }
 0x2f6   : > { %5034 = vmatmul.mubr.msk.bf16.gmra.mxu1 %vm1016_vm6, %v5179_v7 }
 0x2f7   : > { %5037 = vmatprep.mubr.msk.bf16.mxu1 %vm1016_vm6, %v5180_v1 }
 0x2fe   : > { %5038 = vmatmul.mubr.msk.bf16.gmra.mxu1 %vm1016_vm6, %v5181_v20 }
 0x2ff   : > { %5041 = vmatprep.mubr.msk.bf16.mxu1 %vm1016_vm6, %v5182_v48 }
 0x306   : > { %5042 = vmatmul.mubr.msk.bf16.gmra.mxu1 %vm1016_vm6, %v5183_v5 }
 0x307   : > { %5045 = vmatprep.mubr.msk.bf16.mxu1 %vm1016_vm6, %v5184_v30 }
 0x30e   : > { %5046 = vmatmul.mubr.msk.bf16.gmra.mxu1 %vm1016_vm6, %v5185_v37 }
 0x30f   : > { %5049 = vmatprep.mubr.msk.bf16.mxu1 %vm1016_vm6, %v5186_v58 }
 0x316   : > { %5050 = vmatmul.mubr.msk.bf16.gmra.mxu1 %vm1016_vm6, %v5187_v34 }
 0x35d   : > { %v4989_v56 = vpop.f32.mrf.mxu0  ;;  %v4955_v28 = vpop.f32.mrf.mxu1 }
 0x35e   : > { %v3270_v49 = vadd.f32 %v4989_v56, %v4955_v28 }
 0x35f   : > { %v3261_v2 = vpop.f32.mrf.mxu0  ;;  %v2964_v3 = vpop.f32.mrf.mxu1 }
 0x360   : > { %v3262_v9 = vadd.f32 %v3261_v2, %v2964_v3 }
 0x361   : > { %v4956_v16 = vpop.f32.mrf.mxu1  ;;  %v4990_v43 = vpop.f32.mrf.mxu0 }
 0x362   : > { %v3273_v1 = vadd.f32 %v4990_v43, %v4956_v16 }
 0x363   : > { %v2967_v23 = vpop.f32.mrf.mxu1  ;;  %v3264_v25 = vpop.f32.mrf.mxu0 }
 0x364   : > { %v3265_v20 = vadd.f32 %v3264_v25, %v2967_v23 }
 0x365   : > { %v7222_v12 = vpop.f32.mrf.mxu1  ;;  %v4993_v39 = vpop.f32.mrf.mxu0 }
 0x366   : > { %v3286_v25 = vadd.f32 %v4993_v39, %v7222_v12 }
 0x367   : > { %v2980_v40 = vpop.f32.mrf.mxu1  ;;  %v3277_v24 = vpop.f32.mrf.mxu0 }
 0x368   : > { %v3278_v2 = vadd.f32 %v3277_v24, %v2980_v40 }
 0x369   : > { %v7224_v29 = vpop.f32.mrf.mxu1  ;;  %v4994_v6 = vpop.f32.mrf.mxu0 }
 0x36b   : > { %v7226_v35 = vpop.f32.mrf.mxu1  ;;  %v3280_v14 = vpop.f32.mrf.mxu0 }
 0x36d   : > { %v7228_v10 = vpop.f32.mrf.mxu1  ;;  %v7242_v18 = vpop.f32.mrf.mxu0 }
 0x36f   : > { %v7230_v33 = vpop.f32.mrf.mxu1  ;;  %v7248_v41 = vpop.f32.mrf.mxu0 }
 0x371   : > { %v7232_v46 = vpop.f32.mrf.mxu1  ;;  %v7254_v26 = vpop.f32.mrf.mxu0 }
 0x373   : > { %v7234_v31 = vpop.f32.mrf.mxu1  ;;  %v7260_v63 = vpop.f32.mrf.mxu0 }
 0x375   : > { %v7236_v52 = vpop.f32.mrf.mxu1  ;;  %v7266_v13 = vpop.f32.mrf.mxu0 }
 0x377   : > { %v7238_v0 = vpop.f32.mrf.mxu1  ;;  %v7272_v55 = vpop.f32.mrf.mxu0 }
 0x379   : > { %v7240_v54 = vpop.f32.mrf.mxu1  ;;  %v7278_v17 = vpop.f32.mrf.mxu0 }
 0x37b   : > { %v7244_v59 = vpop.f32.mrf.mxu1  ;;  %v7284_v57 = vpop.f32.mrf.mxu0 }
 0x37d   : > { %v7246_v42 = vpop.f32.mrf.mxu1  ;;  %v7290_v32 = vpop.f32.mrf.mxu0 }
 0x37f   : > { %v7250_v50 = vpop.f32.mrf.mxu1  ;;  %v7294_v21 = vpop.f32.mrf.mxu0 }
 0x381   : > { %v7252_v8 = vpop.f32.mrf.mxu1  ;;  %v7298_v48 = vpop.f32.mrf.mxu0 }
 0x383   : > { %v7256_v61 = vpop.f32.mrf.mxu1  ;;  %v7308_v56 = vpop.f32.mrf.mxu0 }
 0x386   : > { %v7258_v11 = vpop.f32.mrf.mxu1 }
 0x388   : > { %v7262_v38 = vpop.f32.mrf.mxu1 }
 0x38a   : > { %v7264_v44 = vpop.f32.mrf.mxu1 }
 0x38c   : > { %v7268_v53 = vpop.f32.mrf.mxu1 }
 0x38e   : > { %v7270_v62 = vpop.f32.mrf.mxu1 }
 0x390   : > { %v7274_v60 = vpop.f32.mrf.mxu1 }
 0x392   : > { %v7276_v27 = vpop.f32.mrf.mxu1 }
 0x394   : > { %v7280_v36 = vpop.f32.mrf.mxu1 }
 0x396   : > { %v7282_v4 = vpop.f32.mrf.mxu1 }
 0x398   : > { %v7286_v45 = vpop.f32.mrf.mxu1 }
 0x39a   : > { %v7288_v51 = vpop.f32.mrf.mxu1 }
 0x39c   : > { %v7292_v15 = vpop.f32.mrf.mxu1 }
 0x39e   : > { %v5023_v19 = vpop.f32.mrf.mxu1 }
 0x39f   : > { %v7300_v5 = vadd.f32 %v5023_v19, %v3270_v49 }
 0x3a0   : > { %v3593_v47 = vpop.f32.mrf.mxu1 }
 0x3a1   : > { %v7296_v22 = vadd.f32 %v3593_v47, %v3262_v9  ;;  %v3824_v28 = vmul.f32 %v7300_v5, %v7300_v5  ;;  %v3755_v40 = vsel %vm635_vm7, %v7300_v5, 0.0 }
 0x3a2   : > { %v5024_v7 = vpop.f32.mrf.mxu1 }
 0x3a3   : > { %v3822_v37 = vmul.f32 %v7296_v22, %v7296_v22  ;;  %v7304_v58 = vadd.f32 %v5024_v7, %v3273_v1  ;;  %v3752_v16 = vsel %vm635_vm7, %v7296_v22, 0.0  ;;  %v3289_v1 = vadd.f32 %v4994_v6, %v7224_v29 }
 0x3a4   : > { %v3596_v30 = vpop.f32.mrf.mxu1 }
 0x3a5   : > { %v7306_v34 = vadd.f32 %v3596_v30, %v3265_v20  ;;  %v3854_v9 = vsel %vm635_vm7, %v3822_v37, 0.0  ;;  %v3825_v47 = vmul.f32 %v7304_v58, %v7304_v58  ;;  %v3281_v20 = vadd.f32 %v3280_v14, %v7226_v35 }
 0x3a6   : > { %v5027_v3 = vpop.f32.mrf.mxu1  ;;  %v3757_v37 = vsel %vm635_vm7, %v7304_v58, 0.0 }
 0x3a7   : > { %8018 = vst [vmem:[#allocation6_spill] sm:$0xff] %v7306_v34  ;;  %v3753_v43 = vsel %vm635_vm7, %v7306_v34, 0.0  ;;  %v3823_v23 = vmul.f32 %v7306_v34, %v7306_v34  ;;  %v7329_v34 = vpop.f32.mrf.mxu0  ;;  %v3859_v35 = vsel %vm635_vm7, %v3825_v47, 0.0 }
 0x3a8   : > { %v3754_v24 = vadd.f32 %v3753_v43, %v3752_v16  ;;  %v3609_v19 = vpop.f32.mrf.mxu1  ;;  %v3857_v16 = vsel %vm635_vm7, %v3824_v28, 0.0  ;;  %v7334_v43 = vadd.f32 %v5027_v3, %v3286_v25  ;;  %v3294_v28 = vadd.f32 %v7248_v41, %v7230_v33 }
 0x3a9   : > { %v3855_v49 = vsel %vm635_vm7, %v3823_v23, 0.0  ;;  %v7325_v7 = vadd.f32 %v3609_v19, %v3278_v2 }
 0x3aa   : > { %v3756_v30 = vadd.f32 %v3755_v40, %v3754_v24  ;;  %v3856_v12 = vadd.f32 %v3855_v49, %v3854_v9  ;;  %v5028_v39 = vpop.f32.mrf.mxu1  ;;  %v7347_v9 = vpop.f32.mrf.mxu0  ;;  %v3828_v49 = vmul.f32 %v7334_v43, %v7334_v43 }
 0x3ab   : > { %v3826_v2 = vmul.f32 %v7325_v7, %v7325_v7  ;;  %v3759_v6 = vsel %vm635_vm7, %v7325_v7, 0.0  ;;  %v7341_v14 = vadd.f32 %v5028_v39, %v3289_v1  ;;  %v3763_v39 = vsel %vm635_vm7, %v7334_v43, 0.0 }
 0x3ac   : > { %v3858_v23 = vadd.f32 %v3857_v16, %v3856_v12  ;;  %v3758_v19 = vadd.f32 %v3757_v37, %v3756_v30  ;;  %v3612_v29 = vpop.f32.mrf.mxu1 }
 0x3ad   : > { %v7343_v40 = vadd.f32 %v3612_v29, %v3281_v20  ;;  %v3861_v47 = vsel %vm635_vm7, %v3826_v2, 0.0  ;;  %v3302_v20 = vadd.f32 %v7242_v18, %v7228_v10  ;;  %v3829_v16 = vmul.f32 %v7341_v14, %v7341_v14 }
 0x3ae   : > { %v3760_v3 = vadd.f32 %v3759_v6, %v3758_v19  ;;  %v3860_v25 = vadd.f32 %v3859_v35, %v3858_v23  ;;  %v5031_v24 = vpop.f32.mrf.mxu1  ;;  %v3305_v23 = vadd.f32 %v7254_v26, %v7232_v46  ;;  %v3297_v19 = vadd.f32 %v7260_v63, %v7234_v31  ;;  %v7369_v35 = vpop.f32.mrf.mxu0 }
 0x3af   : > { %v3761_v30 = vsel %vm635_vm7, %v7343_v40, 0.0  ;;  %v3827_v1 = vmul.f32 %v7343_v40, %v7343_v40  ;;  %v3865_v6 = vsel %vm635_vm7, %v3828_v49, 0.0  ;;  %v3867_v31 = vsel %vm635_vm7, %v3829_v16, 0.0 }
 0x3b0   : > { %v3862_v33 = vadd.f32 %v3861_v47, %v3860_v25  ;;  %v3762_v41 = vadd.f32 %v3761_v30, %v3760_v3  ;;  %v3625_v12 = vpop.f32.mrf.mxu1  ;;  %v3765_v3 = vsel %vm635_vm7, %v7341_v14, 0.0  ;;  %v7374_v25 = vadd.f32 %v5031_v24, %v3302_v20 }
 0x3b1   : > { %v3863_v37 = vsel %vm635_vm7, %v3827_v1, 0.0  ;;  %v7363_v2 = vadd.f32 %v3625_v12, %v3294_v28  ;;  %v3310_v49 = vadd.f32 %v7272_v55, %v7238_v0 }
 0x3b2   : > { %v3764_v10 = vadd.f32 %v3763_v39, %v3762_v41  ;;  %v3864_v18 = vadd.f32 %v3863_v37, %v3862_v33  ;;  %v5032_v29 = vpop.f32.mrf.mxu1  ;;  %v7387_v41 = vpop.f32.mrf.mxu0  ;;  %v3832_v12 = vmul.f32 %v7374_v25, %v7374_v25 }
 0x3b3   : > { %v3830_v28 = vmul.f32 %v7363_v2, %v7363_v2  ;;  %v3767_v63 = vsel %vm635_vm7, %v7363_v2, 0.0  ;;  %v7381_v30 = vadd.f32 %v5032_v29, %v3305_v23  ;;  %v3318_v23 = vadd.f32 %v7266_v13, %v7236_v52 }
 0x3b4   : > { %v3866_v47 = vadd.f32 %v3865_v6, %v3864_v18  ;;  %v3766_v46 = vadd.f32 %v3765_v3, %v3764_v10  ;;  %v3628_v26 = vpop.f32.mrf.mxu1  ;;  %v3771_v10 = vsel %vm635_vm7, %v7374_v25, 0.0  ;;  %v3321_v3 = vadd.f32 %v7278_v17, %v7240_v54 }
 0x3b5   : > { %v7383_v1 = vadd.f32 %v3628_v26, %v3297_v19  ;;  %v3869_v39 = vsel %vm635_vm7, %v3830_v28, 0.0  ;;  %v3833_v18 = vmul.f32 %v7381_v30, %v7381_v30  ;;  %v3313_v28 = vadd.f32 %v7284_v57, %v7244_v59 }
 0x3b6   : > { %v3768_v24 = vadd.f32 %v3767_v63, %v3766_v46  ;;  %v3868_v20 = vadd.f32 %v3867_v31, %v3866_v47  ;;  %v5035_v33 = vpop.f32.mrf.mxu1  ;;  %v7409_v46 = vpop.f32.mrf.mxu0  ;;  %v3873_v26 = vsel %vm635_vm7, %v3832_v12, 0.0  ;;  %v3773_v31 = vsel %vm635_vm7, %v7381_v30, 0.0 }
 0x3b7   : > { %v3769_v16 = vsel %vm635_vm7, %v7383_v1, 0.0  ;;  %v3831_v37 = vmul.f32 %v7383_v1, %v7383_v1  ;;  %v7414_v63 = vadd.f32 %v5035_v33, %v3318_v23  ;;  %v3875_v59 = vsel %vm635_vm7, %v3833_v18, 0.0 }
 0x3b8   : > { %v3870_v0 = vadd.f32 %v3869_v39, %v3868_v20  ;;  %v3770_v55 = vadd.f32 %v3769_v16, %v3768_v24  ;;  %v3641_v19 = vpop.f32.mrf.mxu1  ;;  %v3326_v12 = vadd.f32 %v7294_v21, %v7250_v50  ;;  %v7427_v23 = vpop.f32.mrf.mxu0  ;;  %v3334_v18 = vadd.f32 %v7290_v32, %v7246_v42 }
 0x3b9   : > { %v3871_v29 = vsel %vm635_vm7, %v3831_v37, 0.0  ;;  %v7403_v6 = vadd.f32 %v3641_v19, %v3310_v49 }
 0x3ba   : > { %v3772_v52 = vadd.f32 %v3771_v10, %v3770_v55  ;;  %v3872_v13 = vadd.f32 %v3871_v29, %v3870_v0  ;;  %v5036_v47 = vpop.f32.mrf.mxu1  ;;  %v3836_v0 = vmul.f32 %v7414_v63, %v7414_v63 }
 0x3bb   : > { %v3834_v49 = vmul.f32 %v7403_v6, %v7403_v6  ;;  %v3775_v57 = vsel %vm635_vm7, %v7403_v6, 0.0  ;;  %v7421_v20 = vadd.f32 %v5036_v47, %v3321_v3  ;;  %v3779_v3 = vsel %vm635_vm7, %v7414_v63, 0.0 }
 0x3bc   : > { %v3874_v24 = vadd.f32 %v3873_v26, %v3872_v13  ;;  %v3774_v54 = vadd.f32 %v3773_v31, %v3772_v52  ;;  %v3644_v17 = vpop.f32.mrf.mxu1  ;;  %v3337_v47 = vadd.f32 %v7298_v48, %v7252_v8  ;;  %v3329_v26 = vadd.f32 %v7308_v56, %v7256_v61 }
 0x3bd   : > { %v7423_v39 = vadd.f32 %v3644_v17, %v3313_v28  ;;  %v3877_v55 = vsel %vm635_vm7, %v3834_v49, 0.0  ;;  %v3837_v28 = vmul.f32 %v7421_v20, %v7421_v20  ;;  %v7449_v49 = vpop.f32.mrf.mxu0 }
 0x3be   : > { %v3776_v33 = vadd.f32 %v3775_v57, %v3774_v54  ;;  %v3876_v16 = vadd.f32 %v3875_v59, %v3874_v24  ;;  %v5039_v37 = vpop.f32.mrf.mxu1  ;;  %v3881_v24 = vsel %vm635_vm7, %v3836_v0, 0.0  ;;  %v3781_v54 = vsel %vm635_vm7, %v7421_v20, 0.0 }
 0x3bf   : > { %v3777_v19 = vsel %vm635_vm7, %v7423_v39, 0.0  ;;  %v3835_v10 = vmul.f32 %v7423_v39, %v7423_v39  ;;  %v7454_v17 = vadd.f32 %v5039_v37, %v3334_v18  ;;  %v3883_v61 = vsel %vm635_vm7, %v3837_v28, 0.0 }
 0x3c0   : > { %v3878_v50 = vadd.f32 %v3877_v55, %v3876_v16  ;;  %v3778_v21 = vadd.f32 %v3777_v19, %v3776_v33  ;;  %v3657_v29 = vpop.f32.mrf.mxu1  ;;  %v3342_v16 = vadd.f32 %v7347_v9, %v7262_v38  ;;  %v3360_v19 = vpop.f32.mrf.mxu0 }
 0x3c1   : > { %v3879_v52 = vsel %vm635_vm7, %v3835_v10, 0.0  ;;  %v7443_v13 = vadd.f32 %v3657_v29, %v3326_v12  ;;  %v3840_v10 = vmul.f32 %v7454_v17, %v7454_v17  ;;  %v3350_v29 = vadd.f32 %v7329_v34, %v7258_v11 }
 0x3c2   : > { %v3780_v42 = vadd.f32 %v3779_v3, %v3778_v21  ;;  %v3880_v32 = vadd.f32 %v3879_v52, %v3878_v50  ;;  %v5040_v31 = vpop.f32.mrf.mxu1  ;;  %v3787_v28 = vsel %vm635_vm7, %v7454_v17, 0.0 }
 0x3c3   : > { %v3838_v59 = vmul.f32 %v7443_v13, %v7443_v13  ;;  %v3783_v56 = vsel %vm635_vm7, %v7443_v13, 0.0  ;;  %v7461_v12 = vadd.f32 %v5040_v31, %v3337_v47 }
 0x3c4   : > { %v3882_v57 = vadd.f32 %v3881_v24, %v3880_v32  ;;  %v3782_v8 = vadd.f32 %v3781_v54, %v3780_v42  ;;  %v3660_v48 = vpop.f32.mrf.mxu1  ;;  %v3353_v42 = vadd.f32 %v7369_v35, %v7264_v44  ;;  %v3345_v32 = vadd.f32 %v7387_v41, %v7268_v53  ;;  %v5017_v24 = vpop.f32.mrf.mxu0 }
 0x3c5   : > { %v7463_v33 = vadd.f32 %v3660_v48, %v3329_v26  ;;  %v3885_v18 = vsel %vm635_vm7, %v3838_v59, 0.0  ;;  %v3841_v52 = vmul.f32 %v7461_v12, %v7461_v12  ;;  %v3889_v54 = vsel %vm635_vm7, %v3840_v10, 0.0 }
 0x3c6   : > { %v3784_v37 = vadd.f32 %v3783_v56, %v3782_v8  ;;  %v3884_v0 = vadd.f32 %v3883_v61, %v3882_v57  ;;  %v5043_v55 = vpop.f32.mrf.mxu1  ;;  %v3789_v59 = vsel %vm635_vm7, %v7461_v12, 0.0  ;;  %v3373_v10 = vpop.f32.mrf.mxu0 }
 0x3c7   : > { %v3785_v50 = vsel %vm635_vm7, %v7463_v33, 0.0  ;;  %v3839_v21 = vmul.f32 %v7463_v33, %v7463_v33  ;;  %v7490_v57 = vadd.f32 %v5043_v55, %v3350_v29  ;;  %v3891_v35 = vsel %vm635_vm7, %v3841_v52, 0.0 }
 0x3c8   : > { %v3886_v3 = vadd.f32 %v3885_v18, %v3884_v0  ;;  %v3786_v38 = vadd.f32 %v3785_v50, %v3784_v37  ;;  %v3673_v9 = vpop.f32.mrf.mxu1 }
 0x3c9   : > { %v3887_v47 = vsel %vm635_vm7, %v3839_v21, 0.0  ;;  %v7481_v26 = vadd.f32 %v3673_v9, %v3342_v16  ;;  %v3358_v16 = vadd.f32 %v7427_v23, %v7274_v60  ;;  %v3844_v18 = vmul.f32 %v7490_v57, %v7490_v57 }
 0x3ca   : > { %v3788_v11 = vadd.f32 %v3787_v28, %v3786_v38  ;;  %v3888_v34 = vadd.f32 %v3887_v47, %v3886_v3  ;;  %v5044_v31 = vpop.f32.mrf.mxu1  ;;  %v3366_v3 = vadd.f32 %v7409_v46, %v7270_v62  ;;  %v3795_v9 = vsel %vm635_vm7, %v7490_v57, 0.0 }
 0x3cb   : > { %v3842_v8 = vmul.f32 %v7481_v26, %v7481_v26  ;;  %v3791_v53 = vsel %vm635_vm7, %v7481_v26, 0.0  ;;  %v7497_v41 = vadd.f32 %v5044_v31, %v3353_v42  ;;  %v3369_v42 = vadd.f32 %v7449_v49, %v7276_v27 }
 0x3cc   : > { %v3890_v48 = vadd.f32 %v3889_v54, %v3888_v34  ;;  %v3790_v61 = vadd.f32 %v3789_v59, %v3788_v11  ;;  %v3676_v44 = vpop.f32.mrf.mxu1  ;;  %v5018_v34 = vpop.f32.mrf.mxu0  ;;  %v3897_v31 = vsel %vm635_vm7, %v3844_v18, 0.0 }
 0x3cd   : > { %v7499_v56 = vadd.f32 %v3676_v44, %v3345_v32  ;;  %v3893_v50 = vsel %vm635_vm7, %v3842_v8, 0.0  ;;  %v3845_v28 = vmul.f32 %v7497_v41, %v7497_v41  ;;  %v3361_v32 = vadd.f32 %v3360_v19, %v7280_v36 }
 0x3ce   : > { %v3792_v37 = vadd.f32 %v3791_v53, %v3790_v61  ;;  %v3892_v0 = vadd.f32 %v3891_v35, %v3890_v48  ;;  %v5047_v55 = vpop.f32.mrf.mxu1  ;;  %v3797_v54 = vsel %vm635_vm7, %v7497_v41, 0.0  ;;  %v3374_v35 = vadd.f32 %v3373_v10, %v7286_v45 }
 0x3cf   : > { %v3793_v21 = vsel %vm635_vm7, %v7499_v56, 0.0  ;;  %v3843_v29 = vmul.f32 %v7499_v56, %v7499_v56  ;;  %v7525_v59 = vadd.f32 %v5047_v55, %v3366_v3  ;;  %v3899_v27 = vsel %vm635_vm7, %v3845_v28, 0.0 }
 0x3d0   : > { %v3894_v38 = vadd.f32 %v3893_v50, %v3892_v0  ;;  %v3794_v60 = vadd.f32 %v3793_v21, %v3792_v37  ;;  %v3689_v23 = vpop.f32.mrf.mxu1  ;;  %v3376_v0 = vpop.f32.mrf.mxu0  ;;  %v3385_v28 = vadd.f32 %v5018_v34, %v7288_v51 }
 0x3d1   : > { %v3895_v52 = vsel %vm635_vm7, %v3843_v29, 0.0  ;;  %v7517_v47 = vadd.f32 %v3689_v23, %v3358_v16  ;;  %v3848_v55 = vmul.f32 %v7525_v59, %v7525_v59  ;;  %v3382_v29 = vadd.f32 %v5017_v24, %v7282_v4 }
 0x3d2   : > { %v3796_v11 = vadd.f32 %v3795_v9, %v3794_v60  ;;  %v3896_v62 = vadd.f32 %v3895_v52, %v3894_v38  ;;  %v5048_v46 = vpop.f32.mrf.mxu1  ;;  %v3803_v10 = vsel %vm635_vm7, %v7525_v59, 0.0  ;;  %v3377_v52 = vadd.f32 %v3376_v0, %v7292_v15 }
 0x3d3   : > { %v3846_v8 = vmul.f32 %v7517_v47, %v7517_v47  ;;  %v3799_v36 = vsel %vm635_vm7, %v7517_v47, 0.0  ;;  %v7532_v49 = vadd.f32 %v5048_v46, %v3369_v42  ;;  %v3905_v24 = vsel %vm635_vm7, %v3848_v55, 0.0 }
 0x3d4   : > { %v3898_v48 = vadd.f32 %v3897_v31, %v3896_v62  ;;  %v3798_v61 = vadd.f32 %v3797_v54, %v3796_v11  ;;  %v3692_v44 = vpop.f32.mrf.mxu1 }
 0x3d5   : > { %v7534_v19 = vadd.f32 %v3692_v44, %v3361_v32  ;;  %v3901_v18 = vsel %vm635_vm7, %v3846_v8, 0.0  ;;  %v3849_v60 = vmul.f32 %v7532_v49, %v7532_v49  ;;  %v3805_v11 = vsel %vm635_vm7, %v7532_v49, 0.0 }
 0x3d6   : > { %v3800_v53 = vadd.f32 %v3799_v36, %v3798_v61  ;;  %v3900_v16 = vadd.f32 %v3899_v27, %v3898_v48  ;;  %v5051_v37 = vpop.f32.mrf.mxu1 }
 0x3d7   : > { %v3801_v50 = vsel %vm635_vm7, %v7534_v19, 0.0  ;;  %v3847_v21 = vmul.f32 %v7534_v19, %v7534_v19  ;;  %v7557_v62 = vadd.f32 %v5051_v37, %v3382_v29  ;;  %v3907_v51 = vsel %vm635_vm7, %v3849_v60, 0.0 }
 0x3d8   : > { %v3902_v3 = vadd.f32 %v3901_v18, %v3900_v16  ;;  %v3802_v38 = vadd.f32 %v3801_v50, %v3800_v53  ;;  %v3705_v45 = vpop.f32.mrf.mxu1 }
 0x3d9   : > { %v3903_v23 = vsel %vm635_vm7, %v3847_v21, 0.0  ;;  %v7550_v9 = vadd.f32 %v3705_v45, %v3374_v35  ;;  %v3852_v27 = vmul.f32 %v7557_v62, %v7557_v62  ;;  %v3811_v0 = vsel %vm635_vm7, %v7557_v62, 0.0 }
 0x3da   : > { %v3804_v42 = vadd.f32 %v3803_v10, %v3802_v38  ;;  %v3904_v32 = vadd.f32 %v3903_v23, %v3902_v3  ;;  %v5052_v4 = vpop.f32.mrf.mxu1 }
 0x3db   : > { %v3850_v46 = vmul.f32 %v7550_v9, %v7550_v9  ;;  %v3807_v15 = vsel %vm635_vm7, %v7550_v9, 0.0  ;;  %v7564_v34 = vadd.f32 %v5052_v4, %v3385_v28  ;;  %v3913_v29 = vsel %vm635_vm7, %v3852_v27, 0.0 }
 0x3dc   : > { %v3906_v31 = vadd.f32 %v3905_v24, %v3904_v32  ;;  %v3806_v54 = vadd.f32 %v3805_v11, %v3804_v42  ;;  %v3708_v8 = vpop.f32.mrf.mxu1 }
 0x3dd   : > { %v7566_v48 = vadd.f32 %v3708_v8, %v3377_v52  ;;  %v3909_v36 = vsel %vm635_vm7, %v3850_v46, 0.0  ;;  %v3853_v55 = vmul.f32 %v7564_v34, %v7564_v34  ;;  %v3813_v3 = vsel %vm635_vm7, %v7564_v34, 0.0 }
 0x3de   : > { %v3808_v61 = vadd.f32 %v3807_v15, %v3806_v54  ;;  %v3908_v44 = vadd.f32 %v3907_v51, %v3906_v31 }
 0x3df   : > { %v3809_v35 = vsel %vm635_vm7, %v7566_v48, 0.0  ;;  %v3851_v53 = vmul.f32 %v7566_v48, %v7566_v48  ;;  %v3915_v10 = vsel %vm635_vm7, %v3853_v55, 0.0  ;;  %v8021_v55 = vld [vmem:[#allocation6_spill] sm:$0xff] }
 0x3e0   : > { %v3910_v16 = vadd.f32 %v3909_v36, %v3908_v44  ;;  %v3810_v37 = vadd.f32 %v3809_v35, %v3808_v61 }
 0x3e1   : > { %v3911_v18 = vsel %vm635_vm7, %v3851_v53, 0.0 }
 0x3e2   : > { %v3812_v50 = vadd.f32 %v3811_v0, %v3810_v37  ;;  %v3912_v21 = vadd.f32 %v3911_v18, %v3910_v16 }
 0x3e4   : > { %v3814_v38 = vadd.f32 %v3813_v3, %v3812_v50  ;;  %v3914_v45 = vadd.f32 %v3913_v29, %v3912_v21  ;;  %v7685_v29 = vld [vmem:[%s5264_s17 + $0x70] sm:$0xff]   ;;  %v7692_v50 = vld [vmem:[%s5264_s17 + $0x78] sm:$0xff]  }
 0x3e5   : > { %8019 = vst [vmem:[#allocation5_spill] sm:$0xff] %v7685_v29  ;;  %8020 = vst [vmem:[#allocation3_spill] sm:$0xff] %v7692_v50 }
 0x3e6   : > { %v3815_v60 = vrot.slane %v3814_v38, 4  ;;  %v3916_v23 = vadd.f32 %v3915_v10, %v3914_v45  ;;  %v7672_v45 = vld [vmem:[%s5264_s17 + $0x58] sm:$0xff]  }
 0x3e8   : > { %v3816_v28 = vadd.f32 %v3815_v60, %v3814_v38  ;;  %v3917_v52 = vrot.slane %v3916_v23, 4  ;;  %v7665_v60 = vld [vmem:[%s5264_s17 + $0x50] sm:$0xff]  }
 0x3ea   : > { %v3817_v42 = vrot.slane %v3816_v28, 2  ;;  %v3918_v32 = vadd.f32 %v3917_v52, %v3916_v23 }
 0x3ec   : > { %v3818_v4 = vadd.f32 %v3817_v42, %v3816_v28  ;;  %v3919_v24 = vrot.slane %v3918_v32, 2  ;;  %v7625_v42 = vld [vmem:[%s5264_s17] sm:$0xff]  }
 0x3ed   : > { %v7655_v28 = vld [vmem:[%s5264_s17 + $0x40] sm:$0xff]  }
 0x3ee   : > { %v3819_v11 = vrot.slane %v3818_v4, 1  ;;  %v3920_v46 = vadd.f32 %v3919_v24, %v3918_v32  ;;  %v7628_v32 = vld [vmem:[%s5264_s17 + $0x8] sm:$0xff]   ;;  %v7634_v24 = vld [vmem:[%s5264_s17 + $0x18] sm:$0xff]  }
 0x3f0   : > { %v3820_v31 = vadd.f32 %v3819_v11, %v3818_v4  ;;  %v3921_v54 = vrot.slane %v3920_v46, 1  ;;  %v7631_v4 = vld [vmem:[%s5264_s17 + $0x10] sm:$0xff]   ;;  %v7637_v11 = vld [vmem:[%s5264_s17 + $0x20] sm:$0xff]  }
 0x3f2   : > { %v7584_v8 = vmul.f32 0.00390625, %v3820_v31  ;;  %v3922_v51 = vadd.f32 %v3921_v54, %v3920_v46  ;;  %v7642_v54 = vld [vmem:[%s5264_s17 + $0x28] sm:$0xff]   ;;  %v7675_v46 = vld [vmem:[%s5264_s17 + $0x60] sm:$0xff]  }
 0x3f4   : > { %v3923_v15 = vmul.f32 0.00390625, %v3922_v51  ;;  %v3924_v61 = vmul.f32 %v7584_v8, %v7584_v8  ;;  %v3936_v27 = vsub.f32 %v7383_v1, %v7584_v8  ;;  %v7645_v51 = vld [vmem:[%s5264_s17 + $0x30] sm:$0xff]   ;;  %v3927_v21 = vsub.f32 %v7296_v22, %v7584_v8 }
 0x3f5   : > { %v3928_v23 = vsub.f32 %v8021_v55, %v7584_v8  ;;  %v3930_v10 = vsub.f32 %v7304_v58, %v7584_v8  ;;  %v3931_v31 = vsub.f32 %v7325_v7, %v7584_v8  ;;  %v3933_v22 = vsub.f32 %v7334_v43, %v7584_v8 }
 0x3f6   : > { %v3925_v44 = vsub.f32 %v3923_v15, %v3924_v61  ;;  %v7662_v61 = vld [vmem:[%s5264_s17 + $0x48] sm:$0xff]   ;;  %v3929_v15 = vsub.f32 %v7300_v5, %v7584_v8  ;;  %v3934_v55 = vsub.f32 %v7341_v14, %v7584_v8  ;;  %v3935_v3 = vsub.f32 %v7363_v2, %v7584_v8 }
 0x3f7   : > { %v3937_v5 = vsub.f32 %v7374_v25, %v7584_v8  ;;  %v3938_v58 = vsub.f32 %v7381_v30, %v7584_v8  ;;  %v3948_v7 = vsub.f32 %v7499_v56, %v7584_v8  ;;  %v3956_v43 = vsub.f32 %v7566_v48, %v7584_v8 }
 0x3f8   : > { %v3926_v35 = vmax.f32 %v3925_v44, 0.0  ;;  %v3932_v44 = vsub.f32 %v7343_v40, %v7584_v8  ;;  %v3952_v40 = vsub.f32 %v7534_v19, %v7584_v8  ;;  %v8022_v19 = vsub.f32 %v7403_v6, %v7584_v8 }
 0x3f9   : > { %v8023_v48 = vsub.f32 %v7423_v39, %v7584_v8  ;;  %v8026_v1 = vsub.f32 %v7443_v13, %v7584_v8  ;;  %v8027_v6 = vsub.f32 %v7463_v33, %v7584_v8  ;;  %v8028_v39 = vsub.f32 %v7454_v17, %v7584_v8 }
 0x3fa   : > { %v3959_v52 = vadd.f32 1e-05, %v3926_v35  ;;  %v7682_v35 = vld [vmem:[%s5264_s17 + $0x68] sm:$0xff]   ;;  %v8031_v13 = vsub.f32 %v7490_v57, %v7584_v8  ;;  %v8032_v33 = vsub.f32 %v7497_v41, %v7584_v8  ;;  %v8033_v17 = vsub.f32 %v7517_v47, %v7584_v8 }
 0x3fb   : > { %v8036_v57 = vsub.f32 %v7550_v9, %v7584_v8  ;;  %v8037_v41 = vsub.f32 %v7557_v62, %v7584_v8  ;;  %v8038_v47 = vsub.f32 %v7564_v34, %v7584_v8  ;;  %v8043_v62 = vunpack.c.l.bf16 %v7631_v4 }
 0x3fc   : > { %5206 = vrsqrt.f32 %v3959_v52  ;;  %v7652_v52 = vld [vmem:[%s5264_s17 + $0x38] sm:$0xff]  }
 0x409   : > { %v5207_v38 = vpop.eup %5206 }
 0x40a   : > { %v3961_v14 = vmul.f32 %v5207_v38, %v3927_v21  ;;  %v3962_v18 = vmul.f32 %v5207_v38, %v3928_v23  ;;  %v3963_v0 = vmul.f32 %v5207_v38, %v3929_v15  ;;  %v3964_v2 = vmul.f32 %v5207_v38, %v3930_v10 }
 0x40b   : > { %v3965_v37 = vmul.f32 %v5207_v38, %v3931_v31  ;;  %v3966_v16 = vmul.f32 %v5207_v38, %v3932_v44  ;;  %v3967_v25 = vmul.f32 %v5207_v38, %v3933_v22  ;;  %v3968_v53 = vmul.f32 %v5207_v38, %v3934_v55 }
 0x40c   : > { %v3969_v36 = vmul.f32 %v5207_v38, %v3935_v3  ;;  %v3970_v30 = vmul.f32 %v5207_v38, %v3936_v27  ;;  %v3971_v56 = vmul.f32 %v5207_v38, %v3937_v5  ;;  %v3972_v50 = vmul.f32 %v5207_v38, %v3938_v58 }
 0x40d   : > { %v3973_v29 = vmul.f32 %v5207_v38, %v8022_v19  ;;  %v3974_v21 = vmul.f32 %v5207_v38, %v8023_v48  ;;  %v8024_v10 = vsub.f32 %v7414_v63, %v7584_v8  ;;  %v8025_v3 = vsub.f32 %v7421_v20, %v7584_v8 }
 0x40e   : > { %v3977_v27 = vmul.f32 %v5207_v38, %v8026_v1  ;;  %v3978_v15 = vmul.f32 %v5207_v38, %v8027_v6  ;;  %v3979_v44 = vmul.f32 %v5207_v38, %v8028_v39  ;;  %v8029_v63 = vsub.f32 %v7461_v12, %v7584_v8 }
 0x40f   : > { %v3975_v23 = vmul.f32 %v5207_v38, %v8024_v10  ;;  %v3976_v31 = vmul.f32 %v5207_v38, %v8025_v3  ;;  %v8030_v20 = vsub.f32 %v7481_v26, %v7584_v8  ;;  %v3982_v5 = vmul.f32 %v5207_v38, %v3948_v7 }
 0x410   : > { %v3980_v22 = vmul.f32 %v5207_v38, %v8029_v63  ;;  %v3983_v58 = vmul.f32 %v5207_v38, %v8031_v13  ;;  %v3984_v19 = vmul.f32 %v5207_v38, %v8032_v33  ;;  %v3985_v48 = vmul.f32 %v5207_v38, %v8033_v17 }
 0x411   : > { %v3981_v55 = vmul.f32 %v5207_v38, %v8030_v20  ;;  %v3986_v10 = vmul.f32 %v5207_v38, %v3952_v40  ;;  %v8034_v12 = vsub.f32 %v7525_v59, %v7584_v8  ;;  %v8035_v26 = vsub.f32 %v7532_v49, %v7584_v8 }
 0x412   : > { %v3989_v1 = vmul.f32 %v5207_v38, %v8036_v57  ;;  %v3990_v6 = vmul.f32 %v5207_v38, %v3956_v43  ;;  %v3991_v39 = vmul.f32 %v5207_v38, %v8037_v41  ;;  %v3992_v40 = vmul.f32 %v5207_v38, %v8038_v47 }
 0x413   : > { %v3987_v3 = vmul.f32 %v5207_v38, %v8034_v12  ;;  %v3988_v7 = vmul.f32 %v5207_v38, %v8035_v26  ;;  %v8039_v59 = vunpack.c.l.bf16 %v7625_v42  ;;  %v8040_v49 = vunpack.c.h.bf16 %v7625_v42 }
 0x414   : > { %v8041_v13 = vunpack.c.l.bf16 %v7628_v32  ;;  %v8042_v43 = vunpack.c.h.bf16 %v7628_v32  ;;  %v4061_v17 = vadd.f32 %v8043_v62, %v3965_v37  ;;  %v8044_v12 = vunpack.c.h.bf16 %v7631_v4 }
 0x415   : > { %v4057_v63 = vadd.f32 %v8039_v59, %v3961_v14  ;;  %v4058_v20 = vadd.f32 %v8040_v49, %v3962_v18  ;;  %v8045_v8 = vunpack.c.l.bf16 %v7634_v24  ;;  %v8046_v14 = vunpack.c.h.bf16 %v7634_v24 }
 0x416   : > { %v4059_v9 = vadd.f32 %v8041_v13, %v3963_v0  ;;  %v4060_v33 = vadd.f32 %v8042_v43, %v3964_v2  ;;  %v4062_v34 = vadd.f32 %v8044_v12, %v3966_v16  ;;  %v8047_v18 = vunpack.c.l.bf16 %v7637_v11 }
 0x417   : > { %v4063_v38 = vadd.f32 %v8045_v8, %v3967_v25  ;;  %v4064_v26 = vadd.f32 %v8046_v14, %v3968_v53  ;;  %v8048_v0 = vunpack.c.h.bf16 %v7637_v11  ;;  %v8049_v32 = vunpack.c.l.bf16 %v7642_v54 }
 0x418   : > { %v4065_v42 = vadd.f32 %v8047_v18, %v3969_v36  ;;  %v8050_v37 = vunpack.c.h.bf16 %v7642_v54  ;;  %v8051_v16 = vunpack.c.l.bf16 %v7645_v51  ;;  %v8052_v25 = vunpack.c.h.bf16 %v7645_v51 }
 0x419   : > { %v4066_v57 = vadd.f32 %v8048_v0, %v3970_v30  ;;  %v4067_v2 = vadd.f32 %v8049_v32, %v3971_v56  ;;  %v8053_v53 = vunpack.c.l.bf16 %v7652_v52  ;;  %v8054_v36 = vunpack.c.h.bf16 %v7652_v52 }
 0x41a   : > { %v4068_v41 = vadd.f32 %v8050_v37, %v3972_v50  ;;  %v4069_v4 = vadd.f32 %v8051_v16, %v3973_v29  ;;  %v4070_v24 = vadd.f32 %v8052_v25, %v3974_v21  ;;  %v8055_v30 = vunpack.c.l.bf16 %v7655_v28 }
 0x41b   : > { %v4071_v47 = vadd.f32 %v8053_v53, %v3975_v23  ;;  %v4072_v11 = vadd.f32 %v8054_v36, %v3976_v31  ;;  %v8056_v56 = vunpack.c.h.bf16 %v7655_v28  ;;  %v8057_v50 = vunpack.c.l.bf16 %v7662_v61 }
 0x41c   : > { %v4073_v59 = vadd.f32 %v8055_v30, %v3977_v27  ;;  %v8058_v29 = vunpack.c.h.bf16 %v7662_v61  ;;  %v8059_v21 = vunpack.c.l.bf16 %v7665_v60  ;;  %v8060_v23 = vunpack.c.h.bf16 %v7665_v60 }
 0x41d   : > { %v4074_v54 = vadd.f32 %v8056_v56, %v3978_v15  ;;  %v4075_v49 = vadd.f32 %v8057_v50, %v3979_v44  ;;  %v8061_v31 = vunpack.c.l.bf16 %v7672_v45  ;;  %v8062_v28 = vunpack.c.h.bf16 %v7672_v45  ;;  %v8067_v45 = vld [vmem:[#allocation5_spill] sm:$0xff] }
 0x41e   : > { %v4076_v51 = vadd.f32 %v8058_v29, %v3980_v22  ;;  %v7828_v13 = vadd.f32 %v8059_v21, %v3981_v55  ;;  %v7832_v52 = vadd.f32 %v8060_v23, %v3982_v5  ;;  %v8063_v44 = vunpack.c.l.bf16 %v7675_v46 }
 0x41f   : > { %v7836_v27 = vadd.f32 %v8061_v31, %v3983_v58  ;;  %v7840_v15 = vadd.f32 %v8062_v28, %v3984_v19  ;;  %v8064_v22 = vunpack.c.h.bf16 %v7675_v46  ;;  %v8065_v60 = vunpack.c.l.bf16 %v7682_v35 }
 0x420   : > { %v7844_v61 = vadd.f32 %v8063_v44, %v3985_v48  ;;  %v8066_v43 = vunpack.c.h.bf16 %v7682_v35  ;;  %v8068_v19 = vunpack.c.l.bf16 %v8067_v45  ;;  %v8069_v46 = vunpack.c.h.bf16 %v8067_v45 }
 0x421   : > { %v7848_v55 = vadd.f32 %v8064_v22, %v3986_v10  ;;  %v7852_v5 = vadd.f32 %v8065_v60, %v3987_v3  ;;  %v8070_v3 = vld [vmem:[#allocation3_spill] sm:$0xff]  ;;  %v4636_v8 = vpack.c.bf16 %v4057_v63, %v4057_v63  ;;  %v4637_v14 = vpack.c.bf16 %v4058_v20, %v4058_v20 }
 0x422   : > { %v7856_v58 = vadd.f32 %v8066_v43, %v3988_v7  ;;  %v7867_v48 = vadd.f32 %v8068_v19, %v3989_v1  ;;  %v7871_v10 = vadd.f32 %v8069_v46, %v3990_v6  ;;  %v8071_v62 = vunpack.c.l.bf16 %v8070_v3 }
 0x423   : > { %v8072_v7 = vunpack.c.h.bf16 %v8070_v3  ;;  %v4638_v1 = vpack.c.bf16 %v4059_v9, %v4059_v9  ;;  %v4639_v18 = vpack.c.bf16 %v4060_v33, %v4060_v33  ;;  %v4640_v0 = vpack.c.bf16 %v4061_v17, %v4061_v17  ;;  %4218 = vst.msk [vmem:[%s7863_s7] sm:$0xf] %vm4217_vm9, %v4636_v8  ;;  %4219 = vst.msk [vmem:[%s7863_s7 + $0x4] sm:$0xf] %vm4217_vm9, %v4637_v14 }
 0x424   : > { %v7875_v35 = vadd.f32 %v8071_v62, %v3991_v39  ;;  %v4641_v32 = vpack.c.bf16 %v4062_v34, %v4062_v34  ;;  %v4642_v6 = vpack.c.bf16 %v4063_v38, %v4063_v38  ;;  %v4643_v37 = vpack.c.bf16 %v4064_v26, %v4064_v26 }
 0x425   : > { %v7879_v12 = vadd.f32 %v8072_v7, %v3992_v40  ;;  %v4644_v39 = vpack.c.bf16 %v4065_v42, %v4065_v42  ;;  %v4645_v16 = vpack.c.bf16 %v4066_v57, %v4066_v57  ;;  %v4646_v25 = vpack.c.bf16 %v4067_v2, %v4067_v2  ;;  %4220 = vst.msk [vmem:[%s7863_s7 + $0x8] sm:$0xf] %vm4217_vm9, %v4638_v1 }
 0x426   : > { %v4647_v53 = vpack.c.bf16 %v4068_v41, %v4068_v41  ;;  %4221 = vst.msk [vmem:[%s7863_s7 + $0xc] sm:$0xf] %vm4217_vm9, %v4639_v18  ;;  %v4648_v40 = vpack.c.bf16 %v4069_v4, %v4069_v4  ;;  %v4649_v63 = vpack.c.bf16 %v4070_v24, %v4070_v24  ;;  %v4650_v20 = vpack.c.bf16 %v4071_v47, %v4071_v47 }
 0x427   : > { %v4651_v9 = vpack.c.bf16 %v4072_v11, %v4072_v11  ;;  %4222 = vst.msk [vmem:[%s7863_s7 + $0x10] sm:$0xf] %vm4217_vm9, %v4640_v0  ;;  %4223 = vst.msk [vmem:[%s7863_s7 + $0x14] sm:$0xf] %vm4217_vm9, %v4641_v32  ;;  %v4652_v33 = vpack.c.bf16 %v4073_v59, %v4073_v59  ;;  %v4653_v17 = vpack.c.bf16 %v4074_v54, %v4074_v54 }
 0x428   : > { %4224 = vst.msk [vmem:[%s7863_s7 + $0x18] sm:$0xf] %vm4217_vm9, %v4642_v6  ;;  %4225 = vst.msk [vmem:[%s7863_s7 + $0x1c] sm:$0xf] %vm4217_vm9, %v4643_v37  ;;  %v4654_v34 = vpack.c.bf16 %v4075_v49, %v4075_v49  ;;  %v4655_v38 = vpack.c.bf16 %v4076_v51, %v4076_v51  ;;  %v4656_v26 = vpack.c.bf16 %v7828_v13, %v7828_v13 }
 0x429   : > { %4226 = vst.msk [vmem:[%s7863_s7 + $0x20] sm:$0xf] %vm4217_vm9, %v4644_v39  ;;  %4227 = vst.msk [vmem:[%s7863_s7 + $0x24] sm:$0xf] %vm4217_vm9, %v4645_v16  ;;  %v4657_v42 = vpack.c.bf16 %v7832_v52, %v7832_v52  ;;  %v4658_v57 = vpack.c.bf16 %v7836_v27, %v7836_v27  ;;  %v4659_v2 = vpack.c.bf16 %v7840_v15, %v7840_v15 }
 0x42a   : > { %4228 = vst.msk [vmem:[%s7863_s7 + $0x28] sm:$0xf] %vm4217_vm9, %v4646_v25  ;;  %4229 = vst.msk [vmem:[%s7863_s7 + $0x2c] sm:$0xf] %vm4217_vm9, %v4647_v53  ;;  %v4660_v41 = vpack.c.bf16 %v7844_v61, %v7844_v61  ;;  %v4661_v4 = vpack.c.bf16 %v7848_v55, %v7848_v55  ;;  %v4662_v24 = vpack.c.bf16 %v7852_v5, %v7852_v5 }
 0x42b   : > { %4230 = vst.msk [vmem:[%s7863_s7 + $0x30] sm:$0xf] %vm4217_vm9, %v4648_v40  ;;  %4231 = vst.msk [vmem:[%s7863_s7 + $0x34] sm:$0xf] %vm4217_vm9, %v4649_v63  ;;  %v4663_v47 = vpack.c.bf16 %v7856_v58, %v7856_v58  ;;  %v4664_v36 = vpack.c.bf16 %v7867_v48, %v7867_v48  ;;  %v4665_v11 = vpack.c.bf16 %v7871_v10, %v7871_v10 }
 0x42c   : > { %4232 = vst.msk [vmem:[%s7863_s7 + $0x38] sm:$0xf] %vm4217_vm9, %v4650_v20  ;;  %4233 = vst.msk [vmem:[%s7863_s7 + $0x3c] sm:$0xf] %vm4217_vm9, %v4651_v9  ;;  %v4666_v30 = vpack.c.bf16 %v7875_v35, %v7875_v35  ;;  %v4667_v59 = vpack.c.bf16 %v7879_v12, %v7879_v12 }
 0x42d   : > { %4234 = vst.msk [vmem:[%s7863_s7 + $0x40] sm:$0xf] %vm4217_vm9, %v4652_v33  ;;  %4235 = vst.msk [vmem:[%s7863_s7 + $0x44] sm:$0xf] %vm4217_vm9, %v4653_v17 }
 0x42e   : > { %4236 = vst.msk [vmem:[%s7863_s7 + $0x48] sm:$0xf] %vm4217_vm9, %v4654_v34  ;;  %4237 = vst.msk [vmem:[%s7863_s7 + $0x4c] sm:$0xf] %vm4217_vm9, %v4655_v38 }
 0x42f   : > { %4238 = vst.msk [vmem:[%s7863_s7 + $0x50] sm:$0xf] %vm4217_vm9, %v4656_v26  ;;  %4239 = vst.msk [vmem:[%s7863_s7 + $0x54] sm:$0xf] %vm4217_vm9, %v4657_v42 }
 0x430   : > { %4240 = vst.msk [vmem:[%s7863_s7 + $0x58] sm:$0xf] %vm4217_vm9, %v4658_v57  ;;  %4241 = vst.msk [vmem:[%s7863_s7 + $0x5c] sm:$0xf] %vm4217_vm9, %v4659_v2 }
 0x431   : > { %4242 = vst.msk [vmem:[%s7863_s7 + $0x60] sm:$0xf] %vm4217_vm9, %v4660_v41  ;;  %4243 = vst.msk [vmem:[%s7863_s7 + $0x64] sm:$0xf] %vm4217_vm9, %v4661_v4 }
 0x432   : > { %4244 = vst.msk [vmem:[%s7863_s7 + $0x68] sm:$0xf] %vm4217_vm9, %v4662_v24  ;;  %4245 = vst.msk [vmem:[%s7863_s7 + $0x6c] sm:$0xf] %vm4217_vm9, %v4663_v47 }
 0x433   : > { %4246 = vst.msk [vmem:[%s7863_s7 + $0x70] sm:$0xf] %vm4217_vm9, %v4664_v36  ;;  %4247 = vst.msk [vmem:[%s7863_s7 + $0x74] sm:$0xf] %vm4217_vm9, %v4665_v11 }
 0x434   : > { %4248 = vst.msk [vmem:[%s7863_s7 + $0x78] sm:$0xf] %vm4217_vm9, %v4666_v30  ;;  %4249 = vst.msk [vmem:[%s7863_s7 + $0x7c] sm:$0xf] %vm4217_vm9, %v4667_v59 }
 0x435 PF: > { %s13_s12 = sadd.s32 1, %s5214_s12  }
 0x436   : > { %p10_p4 = scmp.ge.s32.totalorder %s13_s12, 4  }
 0x438   :  { %12 = sbr.rel (!%p10_p4) target bundleno = 1 (0x1), region = 69 }

</bundles_post_ra>
